<compile_context>
chip_gen: v7x
topology: tpu7x:2x2x1
jax: 0.10.0
libtpu: 0.0.40
codegen_flags: <defaults>
</compile_context>

<pallas_src>
import functools

import jax
import jax.numpy as jnp
from jax.experimental import pallas as pl
from jax.experimental.pallas import tpu as pltpu


# ----------------------------- fused kernel ------------------------------- #

def _tap_accumulate(src_ref, w_ref, *, kh, kw, oh, ow_pad, cin, n_batch):
    """Sum over (kh,kw) taps of MXU matmuls on stride-2 slices of src_ref.

    src_ref : (N, Hpad, Wpad, cin) f32 VMEM scratch (zero-padded activation)
    w_ref   : (kh*kw, cin, cout)   bf16 per-tap weights
    returns : (N*oh*ow_pad, cout)  f32 accumulator
    """
    acc = None
    for i in range(kh):
        for j in range(kw):
            g = src_ref[:, pl.ds(i, oh, stride=2), pl.ds(j, ow_pad, stride=2), :]
            gm = g.reshape(n_batch * oh * ow_pad, cin).astype(jnp.bfloat16)
            t = jnp.dot(gm, w_ref[i * kw + j],
                        preferred_element_type=jnp.float32)
            acc = t if acc is None else acc + t
    return acc


def _disc_kernel(p1_ref, w1_ref, b1_ref, w2_ref, b2_ref, w3_ref, b3_ref,
                 w4_ref, b4_ref, out_ref, a1_ref, a2_ref):
    """Whole-discriminator forward.

    p1_ref : (N*256, 16)    bf16  layer-1 patches on a padded 16x16 grid
    w1_ref : (16, 64)       bf16
    w2_ref : (16, 64, 128)  bf16  per-tap (kh*kw, Cin, Cout)
    w3_ref : (9, 128, 256)  bf16
    w4_ref : (32, 256)      f32   layer-4 weights on the (4, 8) row grid
                                  (fake columns already zeroed)
    b*_ref : (1, C)         f32
    out_ref: (N, 1)         f32   sigmoid probabilities
    a1_ref : (N, 16, 18, 64)  f32 VMEM scratch (padded layer-1 activation)
    a2_ref : (N, 9, 18, 128)  f32 VMEM scratch (padded layer-2 activation)
    """
    n_batch = out_ref.shape[0]

    def leaky(x):  # PyTorch nn.LeakyReLU() default slope = 0.01
        return jnp.where(x >= 0, x, 0.01 * x)

    # ---------------- Layer 1: (N*256,16) @ (16,64) ---------------- #
    acc1 = jnp.dot(p1_ref[...], w1_ref[...],
                   preferred_element_type=jnp.float32)
    a1 = leaky(acc1 + b1_ref[...])                     # (N*256, 64) f32
    a1 = a1.reshape(n_batch, 16, 16, 64)               # tile-aligned reshape
    # Zero-init padded buffer, then write the real 14x14 interior only
    # (ring rows of the 16x16 grid are fake and must stay zero padding).
    a1_ref[...] = jnp.zeros(a1_ref.shape, jnp.float32)
    a1_ref[:, 1:15, 1:15, :] = a1[:, 1:15, 1:15, :]

    # ---------------- Layer 2: k=4, s=2, p=1 (14 -> 7) ---------------- #
    # W is read 8 output columns wide so reshapes stay aligned; the 8th
    # output column is junk and is dropped at store time.
    acc2 = _tap_accumulate(a1_ref, w2_ref, kh=4, kw=4, oh=7, ow_pad=8,
                           cin=64, n_batch=n_batch)
    a2 = leaky(acc2 + b2_ref[...])                     # (N*56, 128) f32
    a2 = a2.reshape(n_batch, 7, 8, 128)
    a2_ref[...] = jnp.zeros(a2_ref.shape, jnp.float32)
    a2_ref[:, 1:8, 1:8, :] = a2[:, :, 0:7, :]          # drop junk column 7

    # ---------------- Layer 3: k=3, s=2, p=1 (7 -> 4) ---------------- #
    acc3 = _tap_accumulate(a2_ref, w3_ref, kh=3, kw=3, oh=4, ow_pad=8,
                           cin=128, n_batch=n_batch)
    a3 = leaky(acc3 + b3_ref[...])                     # (N*32, 256) f32
    # rows per batch: (oh in [0,4), ow in [0,8)); ow >= 4 is junk but the
    # corresponding w4 rows are zero, so those rows contribute nothing.

    # --------- Layer 4 (Cout=1) folded as reduction + sigmoid ---------- #
    a3r = a3.reshape(n_batch, 32, 256)
    prod = a3r * w4_ref[...][None, :, :]               # (N, 32, 256)
    s = jnp.sum(prod, axis=1)                          # (N, 256)
    logit = jnp.sum(s, axis=-1, keepdims=True) + b4_ref[...]   # (N, 1)
    out_ref[...] = 1.0 / (1.0 + jnp.exp(-logit))


def _build_disc_call(n_batch):
    vmem = pl.BlockSpec(memory_space=pltpu.MemorySpace.VMEM)
    return pl.pallas_call(
        _disc_kernel,
        out_shape=jax.ShapeDtypeStruct((n_batch, 1), jnp.float32),
        in_specs=[vmem] * 9,
        out_specs=vmem,
        scratch_shapes=[
            pltpu.VMEM((n_batch, 16, 18, 64), jnp.float32),   # padded act 1
            pltpu.VMEM((n_batch, 9, 18, 128), jnp.float32),   # padded act 2
        ],
    )


# ------------------------------- host glue --------------------------------- #

def _layer1_patches(x_nchw):
    """im2col for layer 1 only (Cin=1, ~16 KB). Padded 16x16 output grid so
    the in-kernel reshape is tile-aligned; ring positions are zero patches."""
    n = x_nchw.shape[0]
    x = jnp.transpose(x_nchw, (0, 2, 3, 1))                  # (N,28,28,1)
    xp = jnp.pad(x, ((0, 0), (1, 1), (1, 1), (0, 0)))        # (N,30,30,1)
    cols = []
    for i in range(4):
        for j in range(4):
            cols.append(xp[:, i:i + 27:2, j:j + 27:2, 0])    # (N,14,14)
    p = jnp.stack(cols, axis=-1)                             # (N,14,14,16)
    p = jnp.pad(p, ((0, 0), (1, 1), (1, 1), (0, 0)))         # (N,16,16,16)
    return p.reshape(n * 256, 16).astype(jnp.bfloat16)


def prepare_params(params):
    """One-time re-layout of PyTorch-style (OIHW, bias) params for the kernel."""
    (w1, b1), (w2, b2), (w3, b3), (w4, b4) = params
    w1m = jnp.transpose(w1, (2, 3, 1, 0)).reshape(16, 64).astype(jnp.bfloat16)
    w2m = jnp.transpose(w2, (2, 3, 1, 0)).reshape(16, 64, 128).astype(jnp.bfloat16)
    w3m = jnp.transpose(w3, (2, 3, 1, 0)).reshape(9, 128, 256).astype(jnp.bfloat16)
    w4t = jnp.transpose(w4[0], (1, 2, 0))                    # (4,4,256) [i,j,ci]
    w4f = jnp.pad(w4t, ((0, 0), (0, 4), (0, 0))).reshape(32, 256)  # zero fake cols
    return (
        w1m, b1.reshape(1, 64).astype(jnp.float32),
        w2m, b2.reshape(1, 128).astype(jnp.float32),
        w3m, b3.reshape(1, 256).astype(jnp.float32),
        w4f.astype(jnp.float32), b4.reshape(1, 1).astype(jnp.float32),
    )


@functools.partial(jax.jit, static_argnames=())
def discriminator_forward(x_nchw, prepared):
    n = x_nchw.shape[0]
    p1 = _layer1_patches(x_nchw)
    out = _build_disc_call(n)(p1, *prepared)
    return out.reshape(n, 1, 1, 1)                           # NCHW like PyTorch


# ------------------------- params & f32 reference -------------------------- #

_LAYER_CFG = [  # (stride, pad, activation)
    (2, 1, "leaky_relu"),
    (2, 1, "leaky_relu"),
    (2, 1, "leaky_relu"),
    (2, 0, "sigmoid"),
]


def init_params(key):
    shapes = [
        (64, 1, 4, 4),
        (128, 64, 4, 4),
        (256, 128, 3, 3),
        (1, 256, 4, 4),
    ]
    params = []
    for i, (co, ci, kh, kw) in enumerate(shapes):
        kw_key, kb_key = jax.random.split(jax.random.fold_in(key, i))
        w = jax.random.normal(kw_key, (co, ci, kh, kw), jnp.float32) * 0.05
        b = jax.random.normal(kb_key, (co,), jnp.float32) * 0.05
        params.append((w, b))
    return params


def reference_forward(x_nchw, params):
    x = x_nchw
    for (w, b), (stride, pad, act) in zip(params, _LAYER_CFG):
        x = jax.lax.conv_general_dilated(
            x, w, (stride, stride), [(pad, pad), (pad, pad)],
            dimension_numbers=("NCHW", "OIHW", "NCHW"),
        )
        x = x + b.reshape(1, -1, 1, 1)
        if act == "leaky_relu":
            x = jnp.where(x >= 0, x, 0.01 * x)
        else:
            x = jax.nn.sigmoid(x)
    return x


# --------------------------------- main ------------------------------------ #

if __name__ == "__main__":
    key = jax.random.PRNGKey(0)
    pkey, xkey = jax.random.split(key)
    params = init_params(pkey)
    prepared = prepare_params(params)
    # Fashion-MNIST-shaped input (spatial 28 is required by the final conv).
    x = jax.random.normal(xkey, (2, 1, 28, 28), jnp.float32)

    out = discriminator_forward(x, prepared)
    out = jax.block_until_ready(out)

    ref = reference_forward(x, params)
    assert out.shape == (2, 1, 1, 1), out.shape
    # bf16 MXU inputs vs f32 reference -> allow a modest tolerance.
    assert jnp.allclose(out, ref, atol=2e-2, rtol=2e-2), (
        "mismatch vs lax.conv reference", out, ref
    )
    print("KERNEL_OK")
</pallas_src>

<mosaic_0001>
module attributes {stable_mosaic.version = 11 : i64} {
  func.func @_disc_kernel(%arg0: memref<512x16xbf16, #tpu.memory_space<vmem>>, %arg1: memref<16x64xbf16, #tpu.memory_space<vmem>>, %arg2: memref<1x64xf32, #tpu.memory_space<vmem>>, %arg3: memref<16x64x128xbf16, #tpu.memory_space<vmem>>, %arg4: memref<1x128xf32, #tpu.memory_space<vmem>>, %arg5: memref<9x128x256xbf16, #tpu.memory_space<vmem>>, %arg6: memref<1x256xf32, #tpu.memory_space<vmem>>, %arg7: memref<32x256xf32, #tpu.memory_space<vmem>>, %arg8: memref<1x1xf32, #tpu.memory_space<vmem>>, %arg9: memref<2x1xf32, #tpu.memory_space<vmem>>, %arg10: memref<2x16x18x64xf32, #tpu.memory_space<vmem>>, %arg11: memref<2x9x18x128xf32, #tpu.memory_space<vmem>>) attributes {dimension_semantics = [], scalar_prefetch = 0 : i64, scratch_operands = 2 : i64, tpu.core_type = #tpu.core_type<tc>} {
    %c0 = arith.constant 0 : index
    %c0_0 = arith.constant 0 : index
    %0 = vector.load %arg0[%c0, %c0_0] : memref<512x16xbf16, #tpu.memory_space<vmem>>, vector<512x16xbf16>
    %c0_1 = arith.constant 0 : index
    %c0_2 = arith.constant 0 : index
    %1 = vector.load %arg1[%c0_1, %c0_2] : memref<16x64xbf16, #tpu.memory_space<vmem>>, vector<16x64xbf16>
    %cst = arith.constant dense<0.000000e+00> : vector<512x64xf32>
    %2 = tpu.matmul %0, %1, %cst {dimension_numbers = #tpu.dot_dimension_numbers<[1], [0], [0], [1], [0, 0, 1, 1], [], []>} : vector<512x16xbf16>, vector<16x64xbf16>, vector<512x64xf32> -> vector<512x64xf32>
    %c0_3 = arith.constant 0 : index
    %c0_4 = arith.constant 0 : index
    %3 = vector.load %arg2[%c0_3, %c0_4] : memref<1x64xf32, #tpu.memory_space<vmem>>, vector<1x64xf32>
    %4 = vector.broadcast %3 : vector<1x64xf32> to vector<512x64xf32>
    %5 = arith.addf %2, %4 : vector<512x64xf32>
    %cst_5 = arith.constant 0.000000e+00 : f32
    %6 = vector.broadcast %cst_5 : f32 to vector<512x64xf32>
    %7 = arith.cmpf oge, %5, %6 : vector<512x64xf32>
    %cst_6 = arith.constant 0.00999999977 : f32
    %8 = vector.broadcast %cst_6 : f32 to vector<512x64xf32>
    %9 = arith.mulf %8, %5 : vector<512x64xf32>
    %10 = arith.select %7, %5, %9 : vector<512x64xi1>, vector<512x64xf32>
    %11 = vector.shape_cast %10 : vector<512x64xf32> to vector<2x16x16x64xf32>
    %cst_7 = arith.constant 0.000000e+00 : f32
    %12 = vector.broadcast %cst_7 : f32 to vector<2x16x18x64xf32>
    %c0_8 = arith.constant 0 : index
    %c0_9 = arith.constant 0 : index
    %c0_10 = arith.constant 0 : index
    %c0_11 = arith.constant 0 : index
    %13 = vector.load %arg10[%c0_8, %c0_9, %c0_10, %c0_11] : memref<2x16x18x64xf32, #tpu.memory_space<vmem>>, vector<2x16x18x64xf32>
    tpu.vector_store %arg10[%c0_8, %c0_9, %c0_10, %c0_11], %12 {strides = array<i32>} : memref<2x16x18x64xf32, #tpu.memory_space<vmem>>, vector<2x16x18x64xf32>,
    %14 = vector.extract_strided_slice %11 {offsets = [0, 1, 1, 0], sizes = [2, 14, 14, 64], strides = [1, 1, 1, 1]} : vector<2x16x16x64xf32> to vector<2x14x14x64xf32>
    %c0_12 = arith.constant 0 : index
    %c1 = arith.constant 1 : index
    %c1_13 = arith.constant 1 : index
    %c0_14 = arith.constant 0 : index
    %15 = vector.load %arg10[%c0_12, %c1, %c1_13, %c0_14] : memref<2x16x18x64xf32, #tpu.memory_space<vmem>>, vector<2x14x14x64xf32>
    tpu.vector_store %arg10[%c0_12, %c1, %c1_13, %c0_14], %14 {strides = array<i32>} : memref<2x16x18x64xf32, #tpu.memory_space<vmem>>, vector<2x14x14x64xf32>,
    %c0_15 = arith.constant 0 : index
    %c0_16 = arith.constant 0 : index
    %c0_17 = arith.constant 0 : index
    %c0_18 = arith.constant 0 : index
    %16 = tpu.strided_load %arg10[%c0_15, %c0_16, %c0_17, %c0_18] {strides = array<i32: 1, 2, 2, 1>} : memref<2x16x18x64xf32, #tpu.memory_space<vmem>>, vector<2x7x8x64xf32>
    %17 = vector.shape_cast %16 : vector<2x7x8x64xf32> to vector<112x64xf32>
    %18 = arith.truncf %17 : vector<112x64xf32> to vector<112x64xbf16>
    %c0_19 = arith.constant 0 : index
    %c0_20 = arith.constant 0 : index
    %c0_21 = arith.constant 0 : index
    %19 = vector.load %arg3[%c0_19, %c0_20, %c0_21] : memref<16x64x128xbf16, #tpu.memory_space<vmem>>, vector<1x64x128xbf16>
    %20 = vector.shape_cast %19 : vector<1x64x128xbf16> to vector<64x128xbf16>
    %cst_22 = arith.constant dense<0.000000e+00> : vector<112x128xf32>
    %21 = tpu.matmul %18, %20, %cst_22 {dimension_numbers = #tpu.dot_dimension_numbers<[1], [0], [0], [1], [0, 0, 1, 1], [], []>} : vector<112x64xbf16>, vector<64x128xbf16>, vector<112x128xf32> -> vector<112x128xf32>
    %c0_23 = arith.constant 0 : index
    %c0_24 = arith.constant 0 : index
    %c1_25 = arith.constant 1 : index
    %c0_26 = arith.constant 0 : index
    %22 = tpu.strided_load %arg10[%c0_23, %c0_24, %c1_25, %c0_26] {strides = array<i32: 1, 2, 2, 1>} : memref<2x16x18x64xf32, #tpu.memory_space<vmem>>, vector<2x7x8x64xf32>
    %23 = vector.shape_cast %22 : vector<2x7x8x64xf32> to vector<112x64xf32>
    %24 = arith.truncf %23 : vector<112x64xf32> to vector<112x64xbf16>
    %c1_27 = arith.constant 1 : index
    %c0_28 = arith.constant 0 : index
    %c0_29 = arith.constant 0 : index
    %25 = vector.load %arg3[%c1_27, %c0_28, %c0_29] : memref<16x64x128xbf16, #tpu.memory_space<vmem>>, vector<1x64x128xbf16>
    %26 = vector.shape_cast %25 : vector<1x64x128xbf16> to vector<64x128xbf16>
    %cst_30 = arith.constant dense<0.000000e+00> : vector<112x128xf32>
    %27 = tpu.matmul %24, %26, %cst_30 {dimension_numbers = #tpu.dot_dimension_numbers<[1], [0], [0], [1], [0, 0, 1, 1], [], []>} : vector<112x64xbf16>, vector<64x128xbf16>, vector<112x128xf32> -> vector<112x128xf32>
    %28 = arith.addf %21, %27 : vector<112x128xf32>
    %c0_31 = arith.constant 0 : index
    %c0_32 = arith.constant 0 : index
    %c2 = arith.constant 2 : index
    %c0_33 = arith.constant 0 : index
    %29 = tpu.strided_load %arg10[%c0_31, %c0_32, %c2, %c0_33] {strides = array<i32: 1, 2, 2, 1>} : memref<2x16x18x64xf32, #tpu.memory_space<vmem>>, vector<2x7x8x64xf32>
    %30 = vector.shape_cast %29 : vector<2x7x8x64xf32> to vector<112x64xf32>
    %31 = arith.truncf %30 : vector<112x64xf32> to vector<112x64xbf16>
    %c2_34 = arith.constant 2 : index
    %c0_35 = arith.constant 0 : index
    %c0_36 = arith.constant 0 : index
    %32 = vector.load %arg3[%c2_34, %c0_35, %c0_36] : memref<16x64x128xbf16, #tpu.memory_space<vmem>>, vector<1x64x128xbf16>
    %33 = vector.shape_cast %32 : vector<1x64x128xbf16> to vector<64x128xbf16>
    %cst_37 = arith.constant dense<0.000000e+00> : vector<112x128xf32>
    %34 = tpu.matmul %31, %33, %cst_37 {dimension_numbers = #tpu.dot_dimension_numbers<[1], [0], [0], [1], [0, 0, 1, 1], [], []>} : vector<112x64xbf16>, vector<64x128xbf16>, vector<112x128xf32> -> vector<112x128xf32>
    %35 = arith.addf %28, %34 : vector<112x128xf32>
    %c0_38 = arith.constant 0 : index
    %c0_39 = arith.constant 0 : index
    %c3 = arith.constant 3 : index
    %c0_40 = arith.constant 0 : index
    %36 = tpu.strided_load %arg10[%c0_38, %c0_39, %c3, %c0_40] {strides = array<i32: 1, 2, 2, 1>} : memref<2x16x18x64xf32, #tpu.memory_space<vmem>>, vector<2x7x8x64xf32>
    %37 = vector.shape_cast %36 : vector<2x7x8x64xf32> to vector<112x64xf32>
    %38 = arith.truncf %37 : vector<112x64xf32> to vector<112x64xbf16>
    %c3_41 = arith.constant 3 : index
    %c0_42 = arith.constant 0 : index
    %c0_43 = arith.constant 0 : index
    %39 = vector.load %arg3[%c3_41, %c0_42, %c0_43] : memref<16x64x128xbf16, #tpu.memory_space<vmem>>, vector<1x64x128xbf16>
    %40 = vector.shape_cast %39 : vector<1x64x128xbf16> to vector<64x128xbf16>
    %cst_44 = arith.constant dense<0.000000e+00> : vector<112x128xf32>
    %41 = tpu.matmul %38, %40, %cst_44 {dimension_numbers = #tpu.dot_dimension_numbers<[1], [0], [0], [1], [0, 0, 1, 1], [], []>} : vector<112x64xbf16>, vector<64x128xbf16>, vector<112x128xf32> -> vector<112x128xf32>
    %42 = arith.addf %35, %41 : vector<112x128xf32>
    %c0_45 = arith.constant 0 : index
    %c1_46 = arith.constant 1 : index
    %c0_47 = arith.constant 0 : index
    %c0_48 = arith.constant 0 : index
    %43 = tpu.strided_load %arg10[%c0_45, %c1_46, %c0_47, %c0_48] {strides = array<i32: 1, 2, 2, 1>} : memref<2x16x18x64xf32, #tpu.memory_space<vmem>>, vector<2x7x8x64xf32>
    %44 = vector.shape_cast %43 : vector<2x7x8x64xf32> to vector<112x64xf32>
    %45 = arith.truncf %44 : vector<112x64xf32> to vector<112x64xbf16>
    %c4 = arith.constant 4 : index
    %c0_49 = arith.constant 0 : index
    %c0_50 = arith.constant 0 : index
    %46 = vector.load %arg3[%c4, %c0_49, %c0_50] : memref<16x64x128xbf16, #tpu.memory_space<vmem>>, vector<1x64x128xbf16>
    %47 = vector.shape_cast %46 : vector<1x64x128xbf16> to vector<64x128xbf16>
    %cst_51 = arith.constant dense<0.000000e+00> : vector<112x128xf32>
    %48 = tpu.matmul %45, %47, %cst_51 {dimension_numbers = #tpu.dot_dimension_numbers<[1], [0], [0], [1], [0, 0, 1, 1], [], []>} : vector<112x64xbf16>, vector<64x128xbf16>, vector<112x128xf32> -> vector<112x128xf32>
    %49 = arith.addf %42, %48 : vector<112x128xf32>
    %c0_52 = arith.constant 0 : index
    %c1_53 = arith.constant 1 : index
    %c1_54 = arith.constant 1 : index
    %c0_55 = arith.constant 0 : index
    %50 = tpu.strided_load %arg10[%c0_52, %c1_53, %c1_54, %c0_55] {strides = array<i32: 1, 2, 2, 1>} : memref<2x16x18x64xf32, #tpu.memory_space<vmem>>, vector<2x7x8x64xf32>
    %51 = vector.shape_cast %50 : vector<2x7x8x64xf32> to vector<112x64xf32>
    %52 = arith.truncf %51 : vector<112x64xf32> to vector<112x64xbf16>
    %c5 = arith.constant 5 : index
    %c0_56 = arith.constant 0 : index
    %c0_57 = arith.constant 0 : index
    %53 = vector.load %arg3[%c5, %c0_56, %c0_57] : memref<16x64x128xbf16, #tpu.memory_space<vmem>>, vector<1x64x128xbf16>
    %54 = vector.shape_cast %53 : vector<1x64x128xbf16> to vector<64x128xbf16>
    %cst_58 = arith.constant dense<0.000000e+00> : vector<112x128xf32>
    %55 = tpu.matmul %52, %54, %cst_58 {dimension_numbers = #tpu.dot_dimension_numbers<[1], [0], [0], [1], [0, 0, 1, 1], [], []>} : vector<112x64xbf16>, vector<64x128xbf16>, vector<112x128xf32> -> vector<112x128xf32>
    %56 = arith.addf %49, %55 : vector<112x128xf32>
    %c0_59 = arith.constant 0 : index
    %c1_60 = arith.constant 1 : index
    %c2_61 = arith.constant 2 : index
    %c0_62 = arith.constant 0 : index
    %57 = tpu.strided_load %arg10[%c0_59, %c1_60, %c2_61, %c0_62] {strides = array<i32: 1, 2, 2, 1>} : memref<2x16x18x64xf32, #tpu.memory_space<vmem>>, vector<2x7x8x64xf32>
    %58 = vector.shape_cast %57 : vector<2x7x8x64xf32> to vector<112x64xf32>
    %59 = arith.truncf %58 : vector<112x64xf32> to vector<112x64xbf16>
    %c6 = arith.constant 6 : index
    %c0_63 = arith.constant 0 : index
    %c0_64 = arith.constant 0 : index
    %60 = vector.load %arg3[%c6, %c0_63, %c0_64] : memref<16x64x128xbf16, #tpu.memory_space<vmem>>, vector<1x64x128xbf16>
    %61 = vector.shape_cast %60 : vector<1x64x128xbf16> to vector<64x128xbf16>
    %cst_65 = arith.constant dense<0.000000e+00> : vector<112x128xf32>
    %62 = tpu.matmul %59, %61, %cst_65 {dimension_numbers = #tpu.dot_dimension_numbers<[1], [0], [0], [1], [0, 0, 1, 1], [], []>} : vector<112x64xbf16>, vector<64x128xbf16>, vector<112x128xf32> -> vector<112x128xf32>
    %63 = arith.addf %56, %62 : vector<112x128xf32>
    %c0_66 = arith.constant 0 : index
    %c1_67 = arith.constant 1 : index
    %c3_68 = arith.constant 3 : index
    %c0_69 = arith.constant 0 : index
    %64 = tpu.strided_load %arg10[%c0_66, %c1_67, %c3_68, %c0_69] {strides = array<i32: 1, 2, 2, 1>} : memref<2x16x18x64xf32, #tpu.memory_space<vmem>>, vector<2x7x8x64xf32>
    %65 = vector.shape_cast %64 : vector<2x7x8x64xf32> to vector<112x64xf32>
    %66 = arith.truncf %65 : vector<112x64xf32> to vector<112x64xbf16>
    %c7 = arith.constant 7 : index
    %c0_70 = arith.constant 0 : index
    %c0_71 = arith.constant 0 : index
    %67 = vector.load %arg3[%c7, %c0_70, %c0_71] : memref<16x64x128xbf16, #tpu.memory_space<vmem>>, vector<1x64x128xbf16>
    %68 = vector.shape_cast %67 : vector<1x64x128xbf16> to vector<64x128xbf16>
    %cst_72 = arith.constant dense<0.000000e+00> : vector<112x128xf32>
    %69 = tpu.matmul %66, %68, %cst_72 {dimension_numbers = #tpu.dot_dimension_numbers<[1], [0], [0], [1], [0, 0, 1, 1], [], []>} : vector<112x64xbf16>, vector<64x128xbf16>, vector<112x128xf32> -> vector<112x128xf32>
    %70 = arith.addf %63, %69 : vector<112x128xf32>
    %c0_73 = arith.constant 0 : index
    %c2_74 = arith.constant 2 : index
    %c0_75 = arith.constant 0 : index
    %c0_76 = arith.constant 0 : index
    %71 = tpu.strided_load %arg10[%c0_73, %c2_74, %c0_75, %c0_76] {strides = array<i32: 1, 2, 2, 1>} : memref<2x16x18x64xf32, #tpu.memory_space<vmem>>, vector<2x7x8x64xf32>
    %72 = vector.shape_cast %71 : vector<2x7x8x64xf32> to vector<112x64xf32>
    %73 = arith.truncf %72 : vector<112x64xf32> to vector<112x64xbf16>
    %c8 = arith.constant 8 : index
    %c0_77 = arith.constant 0 : index
    %c0_78 = arith.constant 0 : index
    %74 = vector.load %arg3[%c8, %c0_77, %c0_78] : memref<16x64x128xbf16, #tpu.memory_space<vmem>>, vector<1x64x128xbf16>
    %75 = vector.shape_cast %74 : vector<1x64x128xbf16> to vector<64x128xbf16>
    %cst_79 = arith.constant dense<0.000000e+00> : vector<112x128xf32>
    %76 = tpu.matmul %73, %75, %cst_79 {dimension_numbers = #tpu.dot_dimension_numbers<[1], [0], [0], [1], [0, 0, 1, 1], [], []>} : vector<112x64xbf16>, vector<64x128xbf16>, vector<112x128xf32> -> vector<112x128xf32>
    %77 = arith.addf %70, %76 : vector<112x128xf32>
    %c0_80 = arith.constant 0 : index
    %c2_81 = arith.constant 2 : index
    %c1_82 = arith.constant 1 : index
    %c0_83 = arith.constant 0 : index
    %78 = tpu.strided_load %arg10[%c0_80, %c2_81, %c1_82, %c0_83] {strides = array<i32: 1, 2, 2, 1>} : memref<2x16x18x64xf32, #tpu.memory_space<vmem>>, vector<2x7x8x64xf32>
    %79 = vector.shape_cast %78 : vector<2x7x8x64xf32> to vector<112x64xf32>
    %80 = arith.truncf %79 : vector<112x64xf32> to vector<112x64xbf16>
    %c9 = arith.constant 9 : index
    %c0_84 = arith.constant 0 : index
    %c0_85 = arith.constant 0 : index
    %81 = vector.load %arg3[%c9, %c0_84, %c0_85] : memref<16x64x128xbf16, #tpu.memory_space<vmem>>, vector<1x64x128xbf16>
    %82 = vector.shape_cast %81 : vector<1x64x128xbf16> to vector<64x128xbf16>
    %cst_86 = arith.constant dense<0.000000e+00> : vector<112x128xf32>
    %83 = tpu.matmul %80, %82, %cst_86 {dimension_numbers = #tpu.dot_dimension_numbers<[1], [0], [0], [1], [0, 0, 1, 1], [], []>} : vector<112x64xbf16>, vector<64x128xbf16>, vector<112x128xf32> -> vector<112x128xf32>
    %84 = arith.addf %77, %83 : vector<112x128xf32>
    %c0_87 = arith.constant 0 : index
    %c2_88 = arith.constant 2 : index
    %c2_89 = arith.constant 2 : index
    %c0_90 = arith.constant 0 : index
    %85 = tpu.strided_load %arg10[%c0_87, %c2_88, %c2_89, %c0_90] {strides = array<i32: 1, 2, 2, 1>} : memref<2x16x18x64xf32, #tpu.memory_space<vmem>>, vector<2x7x8x64xf32>
    %86 = vector.shape_cast %85 : vector<2x7x8x64xf32> to vector<112x64xf32>
    %87 = arith.truncf %86 : vector<112x64xf32> to vector<112x64xbf16>
    %c10 = arith.constant 10 : index
    %c0_91 = arith.constant 0 : index
    %c0_92 = arith.constant 0 : index
    %88 = vector.load %arg3[%c10, %c0_91, %c0_92] : memref<16x64x128xbf16, #tpu.memory_space<vmem>>, vector<1x64x128xbf16>
    %89 = vector.shape_cast %88 : vector<1x64x128xbf16> to vector<64x128xbf16>
    %cst_93 = arith.constant dense<0.000000e+00> : vector<112x128xf32>
    %90 = tpu.matmul %87, %89, %cst_93 {dimension_numbers = #tpu.dot_dimension_numbers<[1], [0], [0], [1], [0, 0, 1, 1], [], []>} : vector<112x64xbf16>, vector<64x128xbf16>, vector<112x128xf32> -> vector<112x128xf32>
    %91 = arith.addf %84, %90 : vector<112x128xf32>
    %c0_94 = arith.constant 0 : index
    %c2_95 = arith.constant 2 : index
    %c3_96 = arith.constant 3 : index
    %c0_97 = arith.constant 0 : index
    %92 = tpu.strided_load %arg10[%c0_94, %c2_95, %c3_96, %c0_97] {strides = array<i32: 1, 2, 2, 1>} : memref<2x16x18x64xf32, #tpu.memory_space<vmem>>, vector<2x7x8x64xf32>
    %93 = vector.shape_cast %92 : vector<2x7x8x64xf32> to vector<112x64xf32>
    %94 = arith.truncf %93 : vector<112x64xf32> to vector<112x64xbf16>
    %c11 = arith.constant 11 : index
    %c0_98 = arith.constant 0 : index
    %c0_99 = arith.constant 0 : index
    %95 = vector.load %arg3[%c11, %c0_98, %c0_99] : memref<16x64x128xbf16, #tpu.memory_space<vmem>>, vector<1x64x128xbf16>
    %96 = vector.shape_cast %95 : vector<1x64x128xbf16> to vector<64x128xbf16>
    %cst_100 = arith.constant dense<0.000000e+00> : vector<112x128xf32>
    %97 = tpu.matmul %94, %96, %cst_100 {dimension_numbers = #tpu.dot_dimension_numbers<[1], [0], [0], [1], [0, 0, 1, 1], [], []>} : vector<112x64xbf16>, vector<64x128xbf16>, vector<112x128xf32> -> vector<112x128xf32>
    %98 = arith.addf %91, %97 : vector<112x128xf32>
    %c0_101 = arith.constant 0 : index
    %c3_102 = arith.constant 3 : index
    %c0_103 = arith.constant 0 : index
    %c0_104 = arith.constant 0 : index
    %99 = tpu.strided_load %arg10[%c0_101, %c3_102, %c0_103, %c0_104] {strides = array<i32: 1, 2, 2, 1>} : memref<2x16x18x64xf32, #tpu.memory_space<vmem>>, vector<2x7x8x64xf32>
    %100 = vector.shape_cast %99 : vector<2x7x8x64xf32> to vector<112x64xf32>
    %101 = arith.truncf %100 : vector<112x64xf32> to vector<112x64xbf16>
    %c12 = arith.constant 12 : index
    %c0_105 = arith.constant 0 : index
    %c0_106 = arith.constant 0 : index
    %102 = vector.load %arg3[%c12, %c0_105, %c0_106] : memref<16x64x128xbf16, #tpu.memory_space<vmem>>, vector<1x64x128xbf16>
    %103 = vector.shape_cast %102 : vector<1x64x128xbf16> to vector<64x128xbf16>
    %cst_107 = arith.constant dense<0.000000e+00> : vector<112x128xf32>
    %104 = tpu.matmul %101, %103, %cst_107 {dimension_numbers = #tpu.dot_dimension_numbers<[1], [0], [0], [1], [0, 0, 1, 1], [], []>} : vector<112x64xbf16>, vector<64x128xbf16>, vector<112x128xf32> -> vector<112x128xf32>
    %105 = arith.addf %98, %104 : vector<112x128xf32>
    %c0_108 = arith.constant 0 : index
    %c3_109 = arith.constant 3 : index
    %c1_110 = arith.constant 1 : index
    %c0_111 = arith.constant 0 : index
    %106 = tpu.strided_load %arg10[%c0_108, %c3_109, %c1_110, %c0_111] {strides = array<i32: 1, 2, 2, 1>} : memref<2x16x18x64xf32, #tpu.memory_space<vmem>>, vector<2x7x8x64xf32>
    %107 = vector.shape_cast %106 : vector<2x7x8x64xf32> to vector<112x64xf32>
    %108 = arith.truncf %107 : vector<112x64xf32> to vector<112x64xbf16>
    %c13 = arith.constant 13 : index
    %c0_112 = arith.constant 0 : index
    %c0_113 = arith.constant 0 : index
    %109 = vector.load %arg3[%c13, %c0_112, %c0_113] : memref<16x64x128xbf16, #tpu.memory_space<vmem>>, vector<1x64x128xbf16>
    %110 = vector.shape_cast %109 : vector<1x64x128xbf16> to vector<64x128xbf16>
    %cst_114 = arith.constant dense<0.000000e+00> : vector<112x128xf32>
    %111 = tpu.matmul %108, %110, %cst_114 {dimension_numbers = #tpu.dot_dimension_numbers<[1], [0], [0], [1], [0, 0, 1, 1], [], []>} : vector<112x64xbf16>, vector<64x128xbf16>, vector<112x128xf32> -> vector<112x128xf32>
    %112 = arith.addf %105, %111 : vector<112x128xf32>
    %c0_115 = arith.constant 0 : index
    %c3_116 = arith.constant 3 : index
    %c2_117 = arith.constant 2 : index
    %c0_118 = arith.constant 0 : index
    %113 = tpu.strided_load %arg10[%c0_115, %c3_116, %c2_117, %c0_118] {strides = array<i32: 1, 2, 2, 1>} : memref<2x16x18x64xf32, #tpu.memory_space<vmem>>, vector<2x7x8x64xf32>
    %114 = vector.shape_cast %113 : vector<2x7x8x64xf32> to vector<112x64xf32>
    %115 = arith.truncf %114 : vector<112x64xf32> to vector<112x64xbf16>
    %c14 = arith.constant 14 : index
    %c0_119 = arith.constant 0 : index
    %c0_120 = arith.constant 0 : index
    %116 = vector.load %arg3[%c14, %c0_119, %c0_120] : memref<16x64x128xbf16, #tpu.memory_space<vmem>>, vector<1x64x128xbf16>
    %117 = vector.shape_cast %116 : vector<1x64x128xbf16> to vector<64x128xbf16>
    %cst_121 = arith.constant dense<0.000000e+00> : vector<112x128xf32>
    %118 = tpu.matmul %115, %117, %cst_121 {dimension_numbers = #tpu.dot_dimension_numbers<[1], [0], [0], [1], [0, 0, 1, 1], [], []>} : vector<112x64xbf16>, vector<64x128xbf16>, vector<112x128xf32> -> vector<112x128xf32>
    %119 = arith.addf %112, %118 : vector<112x128xf32>
    %c0_122 = arith.constant 0 : index
    %c3_123 = arith.constant 3 : index
    %c3_124 = arith.constant 3 : index
    %c0_125 = arith.constant 0 : index
    %120 = tpu.strided_load %arg10[%c0_122, %c3_123, %c3_124, %c0_125] {strides = array<i32: 1, 2, 2, 1>} : memref<2x16x18x64xf32, #tpu.memory_space<vmem>>, vector<2x7x8x64xf32>
    %121 = vector.shape_cast %120 : vector<2x7x8x64xf32> to vector<112x64xf32>
    %122 = arith.truncf %121 : vector<112x64xf32> to vector<112x64xbf16>
    %c15 = arith.constant 15 : index
    %c0_126 = arith.constant 0 : index
    %c0_127 = arith.constant 0 : index
    %123 = vector.load %arg3[%c15, %c0_126, %c0_127] : memref<16x64x128xbf16, #tpu.memory_space<vmem>>, vector<1x64x128xbf16>
    %124 = vector.shape_cast %123 : vector<1x64x128xbf16> to vector<64x128xbf16>
    %cst_128 = arith.constant dense<0.000000e+00> : vector<112x128xf32>
    %125 = tpu.matmul %122, %124, %cst_128 {dimension_numbers = #tpu.dot_dimension_numbers<[1], [0], [0], [1], [0, 0, 1, 1], [], []>} : vector<112x64xbf16>, vector<64x128xbf16>, vector<112x128xf32> -> vector<112x128xf32>
    %126 = arith.addf %119, %125 : vector<112x128xf32>
    %c0_129 = arith.constant 0 : index
    %c0_130 = arith.constant 0 : index
    %127 = vector.load %arg4[%c0_129, %c0_130] : memref<1x128xf32, #tpu.memory_space<vmem>>, vector<1x128xf32>
    %128 = vector.broadcast %127 : vector<1x128xf32> to vector<112x128xf32>
    %129 = arith.addf %126, %128 : vector<112x128xf32>
    %cst_131 = arith.constant 0.000000e+00 : f32
    %130 = vector.broadcast %cst_131 : f32 to vector<112x128xf32>
    %131 = arith.cmpf oge, %129, %130 : vector<112x128xf32>
    %cst_132 = arith.constant 0.00999999977 : f32
    %132 = vector.broadcast %cst_132 : f32 to vector<112x128xf32>
    %133 = arith.mulf %132, %129 : vector<112x128xf32>
    %134 = arith.select %131, %129, %133 : vector<112x128xi1>, vector<112x128xf32>
    %135 = vector.shape_cast %134 : vector<112x128xf32> to vector<2x7x8x128xf32>
    %cst_133 = arith.constant 0.000000e+00 : f32
    %136 = vector.broadcast %cst_133 : f32 to vector<2x9x18x128xf32>
    %c0_134 = arith.constant 0 : index
    %c0_135 = arith.constant 0 : index
    %c0_136 = arith.constant 0 : index
    %c0_137 = arith.constant 0 : index
    %137 = vector.load %arg11[%c0_134, %c0_135, %c0_136, %c0_137] : memref<2x9x18x128xf32, #tpu.memory_space<vmem>>, vector<2x9x18x128xf32>
    tpu.vector_store %arg11[%c0_134, %c0_135, %c0_136, %c0_137], %136 {strides = array<i32>} : memref<2x9x18x128xf32, #tpu.memory_space<vmem>>, vector<2x9x18x128xf32>,
    %138 = vector.extract_strided_slice %135 {offsets = [0, 0, 0, 0], sizes = [2, 7, 7, 128], strides = [1, 1, 1, 1]} : vector<2x7x8x128xf32> to vector<2x7x7x128xf32>
    %c0_138 = arith.constant 0 : index
    %c1_139 = arith.constant 1 : index
    %c1_140 = arith.constant 1 : index
    %c0_141 = arith.constant 0 : index
    %139 = vector.load %arg11[%c0_138, %c1_139, %c1_140, %c0_141] : memref<2x9x18x128xf32, #tpu.memory_space<vmem>>, vector<2x7x7x128xf32>
    tpu.vector_store %arg11[%c0_138, %c1_139, %c1_140, %c0_141], %138 {strides = array<i32>} : memref<2x9x18x128xf32, #tpu.memory_space<vmem>>, vector<2x7x7x128xf32>,
    %c0_142 = arith.constant 0 : index
    %c0_143 = arith.constant 0 : index
    %c0_144 = arith.constant 0 : index
    %c0_145 = arith.constant 0 : index
    %140 = tpu.strided_load %arg11[%c0_142, %c0_143, %c0_144, %c0_145] {strides = array<i32: 1, 2, 2, 1>} : memref<2x9x18x128xf32, #tpu.memory_space<vmem>>, vector<2x4x8x128xf32>
    %141 = vector.shape_cast %140 : vector<2x4x8x128xf32> to vector<64x128xf32>
    %142 = arith.truncf %141 : vector<64x128xf32> to vector<64x128xbf16>
    %c0_146 = arith.constant 0 : index
    %c0_147 = arith.constant 0 : index
    %c0_148 = arith.constant 0 : index
    %143 = vector.load %arg5[%c0_146, %c0_147, %c0_148] : memref<9x128x256xbf16, #tpu.memory_space<vmem>>, vector<1x128x256xbf16>
    %144 = vector.shape_cast %143 : vector<1x128x256xbf16> to vector<128x256xbf16>
    %cst_149 = arith.constant dense<0.000000e+00> : vector<64x256xf32>
    %145 = tpu.matmul %142, %144, %cst_149 {dimension_numbers = #tpu.dot_dimension_numbers<[1], [0], [0], [1], [0, 0, 1, 1], [], []>} : vector<64x128xbf16>, vector<128x256xbf16>, vector<64x256xf32> -> vector<64x256xf32>
    %c0_150 = arith.constant 0 : index
    %c0_151 = arith.constant 0 : index
    %c1_152 = arith.constant 1 : index
    %c0_153 = arith.constant 0 : index
    %146 = tpu.strided_load %arg11[%c0_150, %c0_151, %c1_152, %c0_153] {strides = array<i32: 1, 2, 2, 1>} : memref<2x9x18x128xf32, #tpu.memory_space<vmem>>, vector<2x4x8x128xf32>
    %147 = vector.shape_cast %146 : vector<2x4x8x128xf32> to vector<64x128xf32>
    %148 = arith.truncf %147 : vector<64x128xf32> to vector<64x128xbf16>
    %c1_154 = arith.constant 1 : index
    %c0_155 = arith.constant 0 : index
    %c0_156 = arith.constant 0 : index
    %149 = vector.load %arg5[%c1_154, %c0_155, %c0_156] : memref<9x128x256xbf16, #tpu.memory_space<vmem>>, vector<1x128x256xbf16>
    %150 = vector.shape_cast %149 : vector<1x128x256xbf16> to vector<128x256xbf16>
    %cst_157 = arith.constant dense<0.000000e+00> : vector<64x256xf32>
    %151 = tpu.matmul %148, %150, %cst_157 {dimension_numbers = #tpu.dot_dimension_numbers<[1], [0], [0], [1], [0, 0, 1, 1], [], []>} : vector<64x128xbf16>, vector<128x256xbf16>, vector<64x256xf32> -> vector<64x256xf32>
    %152 = arith.addf %145, %151 : vector<64x256xf32>
    %c0_158 = arith.constant 0 : index
    %c0_159 = arith.constant 0 : index
    %c2_160 = arith.constant 2 : index
    %c0_161 = arith.constant 0 : index
    %153 = tpu.strided_load %arg11[%c0_158, %c0_159, %c2_160, %c0_161] {strides = array<i32: 1, 2, 2, 1>} : memref<2x9x18x128xf32, #tpu.memory_space<vmem>>, vector<2x4x8x128xf32>
    %154 = vector.shape_cast %153 : vector<2x4x8x128xf32> to vector<64x128xf32>
    %155 = arith.truncf %154 : vector<64x128xf32> to vector<64x128xbf16>
    %c2_162 = arith.constant 2 : index
    %c0_163 = arith.constant 0 : index
    %c0_164 = arith.constant 0 : index
    %156 = vector.load %arg5[%c2_162, %c0_163, %c0_164] : memref<9x128x256xbf16, #tpu.memory_space<vmem>>, vector<1x128x256xbf16>
    %157 = vector.shape_cast %156 : vector<1x128x256xbf16> to vector<128x256xbf16>
    %cst_165 = arith.constant dense<0.000000e+00> : vector<64x256xf32>
    %158 = tpu.matmul %155, %157, %cst_165 {dimension_numbers = #tpu.dot_dimension_numbers<[1], [0], [0], [1], [0, 0, 1, 1], [], []>} : vector<64x128xbf16>, vector<128x256xbf16>, vector<64x256xf32> -> vector<64x256xf32>
    %159 = arith.addf %152, %158 : vector<64x256xf32>
    %c0_166 = arith.constant 0 : index
    %c1_167 = arith.constant 1 : index
    %c0_168 = arith.constant 0 : index
    %c0_169 = arith.constant 0 : index
    %160 = tpu.strided_load %arg11[%c0_166, %c1_167, %c0_168, %c0_169] {strides = array<i32: 1, 2, 2, 1>} : memref<2x9x18x128xf32, #tpu.memory_space<vmem>>, vector<2x4x8x128xf32>
    %161 = vector.shape_cast %160 : vector<2x4x8x128xf32> to vector<64x128xf32>
    %162 = arith.truncf %161 : vector<64x128xf32> to vector<64x128xbf16>
    %c3_170 = arith.constant 3 : index
    %c0_171 = arith.constant 0 : index
    %c0_172 = arith.constant 0 : index
    %163 = vector.load %arg5[%c3_170, %c0_171, %c0_172] : memref<9x128x256xbf16, #tpu.memory_space<vmem>>, vector<1x128x256xbf16>
    %164 = vector.shape_cast %163 : vector<1x128x256xbf16> to vector<128x256xbf16>
    %cst_173 = arith.constant dense<0.000000e+00> : vector<64x256xf32>
    %165 = tpu.matmul %162, %164, %cst_173 {dimension_numbers = #tpu.dot_dimension_numbers<[1], [0], [0], [1], [0, 0, 1, 1], [], []>} : vector<64x128xbf16>, vector<128x256xbf16>, vector<64x256xf32> -> vector<64x256xf32>
    %166 = arith.addf %159, %165 : vector<64x256xf32>
    %c0_174 = arith.constant 0 : index
    %c1_175 = arith.constant 1 : index
    %c1_176 = arith.constant 1 : index
    %c0_177 = arith.constant 0 : index
    %167 = tpu.strided_load %arg11[%c0_174, %c1_175, %c1_176, %c0_177] {strides = array<i32: 1, 2, 2, 1>} : memref<2x9x18x128xf32, #tpu.memory_space<vmem>>, vector<2x4x8x128xf32>
    %168 = vector.shape_cast %167 : vector<2x4x8x128xf32> to vector<64x128xf32>
    %169 = arith.truncf %168 : vector<64x128xf32> to vector<64x128xbf16>
    %c4_178 = arith.constant 4 : index
    %c0_179 = arith.constant 0 : index
    %c0_180 = arith.constant 0 : index
    %170 = vector.load %arg5[%c4_178, %c0_179, %c0_180] : memref<9x128x256xbf16, #tpu.memory_space<vmem>>, vector<1x128x256xbf16>
    %171 = vector.shape_cast %170 : vector<1x128x256xbf16> to vector<128x256xbf16>
    %cst_181 = arith.constant dense<0.000000e+00> : vector<64x256xf32>
    %172 = tpu.matmul %169, %171, %cst_181 {dimension_numbers = #tpu.dot_dimension_numbers<[1], [0], [0], [1], [0, 0, 1, 1], [], []>} : vector<64x128xbf16>, vector<128x256xbf16>, vector<64x256xf32> -> vector<64x256xf32>
    %173 = arith.addf %166, %172 : vector<64x256xf32>
    %c0_182 = arith.constant 0 : index
    %c1_183 = arith.constant 1 : index
    %c2_184 = arith.constant 2 : index
    %c0_185 = arith.constant 0 : index
    %174 = tpu.strided_load %arg11[%c0_182, %c1_183, %c2_184, %c0_185] {strides = array<i32: 1, 2, 2, 1>} : memref<2x9x18x128xf32, #tpu.memory_space<vmem>>, vector<2x4x8x128xf32>
    %175 = vector.shape_cast %174 : vector<2x4x8x128xf32> to vector<64x128xf32>
    %176 = arith.truncf %175 : vector<64x128xf32> to vector<64x128xbf16>
    %c5_186 = arith.constant 5 : index
    %c0_187 = arith.constant 0 : index
    %c0_188 = arith.constant 0 : index
    %177 = vector.load %arg5[%c5_186, %c0_187, %c0_188] : memref<9x128x256xbf16, #tpu.memory_space<vmem>>, vector<1x128x256xbf16>
    %178 = vector.shape_cast %177 : vector<1x128x256xbf16> to vector<128x256xbf16>
    %cst_189 = arith.constant dense<0.000000e+00> : vector<64x256xf32>
    %179 = tpu.matmul %176, %178, %cst_189 {dimension_numbers = #tpu.dot_dimension_numbers<[1], [0], [0], [1], [0, 0, 1, 1], [], []>} : vector<64x128xbf16>, vector<128x256xbf16>, vector<64x256xf32> -> vector<64x256xf32>
    %180 = arith.addf %173, %179 : vector<64x256xf32>
    %c0_190 = arith.constant 0 : index
    %c2_191 = arith.constant 2 : index
    %c0_192 = arith.constant 0 : index
    %c0_193 = arith.constant 0 : index
    %181 = tpu.strided_load %arg11[%c0_190, %c2_191, %c0_192, %c0_193] {strides = array<i32: 1, 2, 2, 1>} : memref<2x9x18x128xf32, #tpu.memory_space<vmem>>, vector<2x4x8x128xf32>
    %182 = vector.shape_cast %181 : vector<2x4x8x128xf32> to vector<64x128xf32>
    %183 = arith.truncf %182 : vector<64x128xf32> to vector<64x128xbf16>
    %c6_194 = arith.constant 6 : index
    %c0_195 = arith.constant 0 : index
    %c0_196 = arith.constant 0 : index
    %184 = vector.load %arg5[%c6_194, %c0_195, %c0_196] : memref<9x128x256xbf16, #tpu.memory_space<vmem>>, vector<1x128x256xbf16>
    %185 = vector.shape_cast %184 : vector<1x128x256xbf16> to vector<128x256xbf16>
    %cst_197 = arith.constant dense<0.000000e+00> : vector<64x256xf32>
    %186 = tpu.matmul %183, %185, %cst_197 {dimension_numbers = #tpu.dot_dimension_numbers<[1], [0], [0], [1], [0, 0, 1, 1], [], []>} : vector<64x128xbf16>, vector<128x256xbf16>, vector<64x256xf32> -> vector<64x256xf32>
    %187 = arith.addf %180, %186 : vector<64x256xf32>
    %c0_198 = arith.constant 0 : index
    %c2_199 = arith.constant 2 : index
    %c1_200 = arith.constant 1 : index
    %c0_201 = arith.constant 0 : index
    %188 = tpu.strided_load %arg11[%c0_198, %c2_199, %c1_200, %c0_201] {strides = array<i32: 1, 2, 2, 1>} : memref<2x9x18x128xf32, #tpu.memory_space<vmem>>, vector<2x4x8x128xf32>
    %189 = vector.shape_cast %188 : vector<2x4x8x128xf32> to vector<64x128xf32>
    %190 = arith.truncf %189 : vector<64x128xf32> to vector<64x128xbf16>
    %c7_202 = arith.constant 7 : index
    %c0_203 = arith.constant 0 : index
    %c0_204 = arith.constant 0 : index
    %191 = vector.load %arg5[%c7_202, %c0_203, %c0_204] : memref<9x128x256xbf16, #tpu.memory_space<vmem>>, vector<1x128x256xbf16>
    %192 = vector.shape_cast %191 : vector<1x128x256xbf16> to vector<128x256xbf16>
    %cst_205 = arith.constant dense<0.000000e+00> : vector<64x256xf32>
    %193 = tpu.matmul %190, %192, %cst_205 {dimension_numbers = #tpu.dot_dimension_numbers<[1], [0], [0], [1], [0, 0, 1, 1], [], []>} : vector<64x128xbf16>, vector<128x256xbf16>, vector<64x256xf32> -> vector<64x256xf32>
    %194 = arith.addf %187, %193 : vector<64x256xf32>
    %c0_206 = arith.constant 0 : index
    %c2_207 = arith.constant 2 : index
    %c2_208 = arith.constant 2 : index
    %c0_209 = arith.constant 0 : index
    %195 = tpu.strided_load %arg11[%c0_206, %c2_207, %c2_208, %c0_209] {strides = array<i32: 1, 2, 2, 1>} : memref<2x9x18x128xf32, #tpu.memory_space<vmem>>, vector<2x4x8x128xf32>
    %196 = vector.shape_cast %195 : vector<2x4x8x128xf32> to vector<64x128xf32>
    %197 = arith.truncf %196 : vector<64x128xf32> to vector<64x128xbf16>
    %c8_210 = arith.constant 8 : index
    %c0_211 = arith.constant 0 : index
    %c0_212 = arith.constant 0 : index
    %198 = vector.load %arg5[%c8_210, %c0_211, %c0_212] : memref<9x128x256xbf16, #tpu.memory_space<vmem>>, vector<1x128x256xbf16>
    %199 = vector.shape_cast %198 : vector<1x128x256xbf16> to vector<128x256xbf16>
    %cst_213 = arith.constant dense<0.000000e+00> : vector<64x256xf32>
    %200 = tpu.matmul %197, %199, %cst_213 {dimension_numbers = #tpu.dot_dimension_numbers<[1], [0], [0], [1], [0, 0, 1, 1], [], []>} : vector<64x128xbf16>, vector<128x256xbf16>, vector<64x256xf32> -> vector<64x256xf32>
    %201 = arith.addf %194, %200 : vector<64x256xf32>
    %c0_214 = arith.constant 0 : index
    %c0_215 = arith.constant 0 : index
    %202 = vector.load %arg6[%c0_214, %c0_215] : memref<1x256xf32, #tpu.memory_space<vmem>>, vector<1x256xf32>
    %203 = vector.broadcast %202 : vector<1x256xf32> to vector<64x256xf32>
    %204 = arith.addf %201, %203 : vector<64x256xf32>
    %cst_216 = arith.constant 0.000000e+00 : f32
    %205 = vector.broadcast %cst_216 : f32 to vector<64x256xf32>
    %206 = arith.cmpf oge, %204, %205 : vector<64x256xf32>
    %cst_217 = arith.constant 0.00999999977 : f32
    %207 = vector.broadcast %cst_217 : f32 to vector<64x256xf32>
    %208 = arith.mulf %207, %204 : vector<64x256xf32>
    %209 = arith.select %206, %204, %208 : vector<64x256xi1>, vector<64x256xf32>
    %210 = vector.shape_cast %209 : vector<64x256xf32> to vector<2x32x256xf32>
    %c0_218 = arith.constant 0 : index
    %c0_219 = arith.constant 0 : index
    %211 = vector.load %arg7[%c0_218, %c0_219] : memref<32x256xf32, #tpu.memory_space<vmem>>, vector<32x256xf32>
    %212 = vector.shape_cast %211 : vector<32x256xf32> to vector<1x32x256xf32>
    %213 = vector.broadcast %212 : vector<1x32x256xf32> to vector<2x32x256xf32>
    %214 = arith.mulf %210, %213 : vector<2x32x256xf32>
    %cst_220 = arith.constant dense<0.000000e+00> : vector<2x256xf32>
    %215 = vector.multi_reduction <add>, %214, %cst_220 [1] : vector<2x32x256xf32> to vector<2x256xf32>
    %cst_221 = arith.constant dense<0.000000e+00> : vector<2xf32>
    %216 = vector.multi_reduction <add>, %215, %cst_221 [1] : vector<2x256xf32> to vector<2xf32>
    %217 = vector.shape_cast %216 : vector<2xf32> to vector<2x1xf32>
    %c0_222 = arith.constant 0 : index
    %c0_223 = arith.constant 0 : index
    %218 = vector.load %arg8[%c0_222, %c0_223] : memref<1x1xf32, #tpu.memory_space<vmem>>, vector<1x1xf32>
    %219 = vector.broadcast %218 : vector<1x1xf32> to vector<2x1xf32>
    %220 = arith.addf %217, %219 : vector<2x1xf32>
    %cst_224 = arith.constant 0.000000e+00 : f32
    %221 = vector.broadcast %cst_224 : f32 to vector<2x1xf32>
    %222 = arith.subf %221, %220 : vector<2x1xf32>
    %223 = math.exp %222 : vector<2x1xf32>
    %cst_225 = arith.constant 1.000000e+00 : f32
    %224 = vector.broadcast %cst_225 : f32 to vector<2x1xf32>
    %225 = arith.addf %224, %223 : vector<2x1xf32>
    %cst_226 = arith.constant 1.000000e+00 : f32
    %226 = vector.broadcast %cst_226 : f32 to vector<2x1xf32>
    %227 = arith.divf %226, %225 : vector<2x1xf32>
    %c0_227 = arith.constant 0 : index
    %c0_228 = arith.constant 0 : index
    %228 = vector.load %arg9[%c0_227, %c0_228] : memref<2x1xf32, #tpu.memory_space<vmem>>, vector<2x1xf32>
    tpu.vector_store %arg9[%c0_227, %c0_228], %227 {strides = array<i32>} : memref<2x1xf32, #tpu.memory_space<vmem>>, vector<2x1xf32>,
    return
  }
}

</mosaic_0001>

<bundles_post_ra>
// kernel: discriminator_forward.1
= control target key start
LH: loop header
LB: loop body
LE: loop exit
PB: predicated region body
PF: predicated region fallthrough
CT: control target
= control target key end

     0   :  { %vm274_vm0 = vcmask 130048   ;;  %v8289_v1 = vmov 0.0   ;;  %vm820_vm1 = vcmask 523264   ;;  %vm823_vm2 = vcmask 517120   ;;  %s10657_s1 = inlined_call_operand.vmem [shape: bf16[16,64], index: 1, kind: input, shape index: {}]   ;;  %s10658_s0 = inlined_call_operand.vmem [shape: bf16[512,16], index: 0, kind: input, shape index: {}]   ;;  %s10659_s3 = inlined_call_operand.vmem [shape: bf16[16,64,128], index: 3, kind: input, shape index: {}]   ;;  %s10660_s2 = inlined_call_operand.vmem [shape: f32[1,64], index: 2, kind: input, shape index: {}]   ;;  %s10661_s5 = inlined_call_operand.vmem [shape: bf16[9,128,256], index: 5, kind: input, shape index: {}]   ;;  %s10662_s4 = inlined_call_operand.vmem [shape: f32[1,128], index: 4, kind: input, shape index: {}]   ;;  %s10663_s8 = inlined_call_operand.<no memory space> [shape: f32[1,1], index: 8, kind: input, shape index: {}]   ;;  %s10664_s6 = inlined_call_operand.vmem [shape: f32[1,256], index: 6, kind: input, shape index: {}]   ;;  %s10665_s7 = inlined_call_operand.vmem [shape: f32[32,256], index: 7, kind: input, shape index: {}]   ;;  %s10666_s9 = inlined_call_operand.vmem [shape: f32[2,1], index: 9, kind: output, shape index: {}]  }
   0x1   :  { %v7969_v0 = vld [vmem:[%s10657_s1] sm:$0xff]   ;;  %4081 = vst [vmem:[#allocation3] sm:$0xff] %v8289_v1  ;;  %4082 = vst [vmem:[#allocation3 + $0x8] sm:$0xff] %v8289_v1  ;;  %7334 = vmatprep.subr.bf16.mxu1 %v8289_v1  ;;  %v7971_v3 = vld [vmem:[%s10658_s0 + $0x8] sm:$0xff]   ;;  %vm8290_vm3 = vmmov 0   ;;  %vm919_vm5 = vcmask 523265  }
   0x2   :  { %4083 = vst [vmem:[#allocation3 + $0x10] sm:$0x3] %v8289_v1  ;;  %4084 = vst [vmem:[#allocation3 + $0x18] sm:$0xff] %v8289_v1  ;;  %v7970_v2 = vld [vmem:[%s10658_s0] sm:$0xff]   ;;  %7196 = vmatprep.subr.bf16.mxu0 %v7969_v0  ;;  %v7972_v4 = vld [vmem:[%s10658_s0 + $0x10] sm:$0xff]   ;;  %7342 = vmatprep.mubr.msk.bf16.mxu1 %vm8290_vm3, %v8289_v1  ;;  %vm921_vm7 = vcmask 522240  }
   0x3   :  { %4085 = vst [vmem:[#allocation3 + $0x20] sm:$0xff] %v8289_v1  ;;  %4086 = vst [vmem:[#allocation3 + $0x28] sm:$0x3] %v8289_v1  ;;  %7197 = vmatpush3.bf16.msra.mxu0 %v7969_v0  ;;  %7198 = vmatprep.mubr.msk.bf16.mxu0 %vm274_vm0, %v7970_v2  ;;  %v7973_v5 = vld [vmem:[%s10658_s0 + $0x18] sm:$0xff]   ;;  %v7974_v6 = vld [vmem:[%s10658_s0 + $0x20] sm:$0xff]  }
   0x4   :  { %4087 = vst [vmem:[#allocation3 + $0x30] sm:$0xff] %v8289_v1  ;;  %4088 = vst [vmem:[#allocation3 + $0x38] sm:$0xff] %v8289_v1  ;;  %7262 = vmatprep.subr.bf16.mxu0 %v8289_v1  ;;  %v7975_v7 = vld [vmem:[%s10658_s0 + $0x28] sm:$0xff]   ;;  %v7976_v8 = vld [vmem:[%s10658_s0 + $0x30] sm:$0xff]  }
   0x5   :  { %4089 = vst [vmem:[#allocation3 + $0x40] sm:$0x3] %v8289_v1  ;;  %4090 = vst [vmem:[#allocation3 + $0x48] sm:$0xff] %v8289_v1  ;;  %v7977_v9 = vld [vmem:[%s10658_s0 + $0x38] sm:$0xff]   ;;  %v7978_v10 = vld [vmem:[%s10658_s0 + $0x40] sm:$0xff]  }
   0x6   :  { %4091 = vst [vmem:[#allocation3 + $0x50] sm:$0xff] %v8289_v1  ;;  %4092 = vst [vmem:[#allocation3 + $0x58] sm:$0x3] %v8289_v1  ;;  %7199 = vmatmul.mubr.msk.bf16.vlgmr.msra.gmra.mrb[0].mxu0 %vm274_vm0, %v7971_v3  ;;  %v7979_v11 = vld [vmem:[%s10658_s0 + $0x48] sm:$0xff]   ;;  %v7980_v12 = vld [vmem:[%s10658_s0 + $0x50] sm:$0xff]  }
   0x7   :  { %4093 = vst [vmem:[#allocation3 + $0x60] sm:$0xff] %v8289_v1  ;;  %4094 = vst [vmem:[#allocation3 + $0x68] sm:$0xff] %v8289_v1  ;;  %7202 = vmatprep.mubr.msk.bf16.mxu0 %vm274_vm0, %v7972_v4  ;;  %v8002_v13 = vld [vmem:[%s10659_s3 + $0x20] sm:$0xff]   ;;  %v8003_v14 = vld [vmem:[%s10659_s3 + $0x28] sm:$0xff]  }
   0x8   :  { %4095 = vst [vmem:[#allocation3 + $0x70] sm:$0x3] %v8289_v1  ;;  %4096 = vst [vmem:[#allocation3 + $0x78] sm:$0xff] %v8289_v1  ;;  %7263 = vmatpush3.bf16.msra.mxu0 %v8002_v13  ;;  %v7981_v15 = vld [vmem:[%s10658_s0 + $0x58] sm:$0xff]   ;;  %v7982_v16 = vld [vmem:[%s10658_s0 + $0x60] sm:$0xff]  }
   0x9   :  { %4097 = vst [vmem:[#allocation3 + $0x80] sm:$0xff] %v8289_v1  ;;  %4098 = vst [vmem:[#allocation3 + $0x88] sm:$0x3] %v8289_v1  ;;  %7264 = vmatprep.subr.bf16.mxu0 %v8289_v1  ;;  %v7983_v17 = vld [vmem:[%s10658_s0 + $0x68] sm:$0xff]   ;;  %v7984_v18 = vld [vmem:[%s10658_s0 + $0x70] sm:$0xff]  }
   0xa   :  { %4099 = vst [vmem:[#allocation3 + $0x90] sm:$0xff] %v8289_v1  ;;  %4100 = vst [vmem:[#allocation3 + $0x98] sm:$0xff] %v8289_v1  ;;  %v7985_v19 = vld [vmem:[%s10658_s0 + $0x78] sm:$0xff]   ;;  %v7986_v20 = vld [vmem:[%s10658_s0 + $0x80] sm:$0xff]  }
   0xb   :  { %4101 = vst [vmem:[#allocation3 + $0xa0] sm:$0x3] %v8289_v1  ;;  %4102 = vst [vmem:[#allocation3 + $0xa8] sm:$0xff] %v8289_v1  ;;  %v7987_v21 = vld [vmem:[%s10658_s0 + $0x88] sm:$0xff]   ;;  %v7988_v22 = vld [vmem:[%s10658_s0 + $0x90] sm:$0xff]  }
   0xc   :  { %4103 = vst [vmem:[#allocation3 + $0xb0] sm:$0xff] %v8289_v1  ;;  %4104 = vst [vmem:[#allocation3 + $0xb8] sm:$0x3] %v8289_v1  ;;  %7265 = vmatpush3.bf16.msra.mxu0 %v8003_v14  ;;  %v7989_v23 = vld [vmem:[%s10658_s0 + $0x98] sm:$0xff]   ;;  %v7990_v24 = vld [vmem:[%s10658_s0 + $0xa0] sm:$0xff]  }
   0xd   :  { %4105 = vst [vmem:[#allocation3 + $0xc0] sm:$0xff] %v8289_v1  ;;  %4106 = vst [vmem:[#allocation3 + $0xc8] sm:$0xff] %v8289_v1  ;;  %7266 = vmatprep.subr.bf16.mxu0 %v8289_v1  ;;  %v7991_v25 = vld [vmem:[%s10658_s0 + $0xa8] sm:$0xff]   ;;  %v7992_v26 = vld [vmem:[%s10658_s0 + $0xb0] sm:$0xff]  }
   0xe   :  { %4107 = vst [vmem:[#allocation3 + $0xd0] sm:$0x3] %v8289_v1  ;;  %4108 = vst [vmem:[#allocation3 + $0xd8] sm:$0xff] %v8289_v1  ;;  %7203 = vmatmul.mubr.msk.bf16.gmra.mrb[4].mxu0 %vm274_vm0, %v7973_v5  ;;  %v7993_v27 = vld [vmem:[%s10658_s0 + $0xb8] sm:$0xff]   ;;  %v8507_v28 = vld [vmem:[%s10658_s0 + $0xc0] sm:$0xff]  }
   0xf   :  { %4109 = vst [vmem:[#allocation3 + $0xe0] sm:$0xff] %v8289_v1  ;;  %4110 = vst [vmem:[#allocation3 + $0xe8] sm:$0x3] %v8289_v1  ;;  %7206 = vmatprep.mubr.msk.bf16.mxu0 %vm274_vm0, %v7974_v6  ;;  %v7995_v29 = vld [vmem:[%s10658_s0 + $0xc8] sm:$0xff]   ;;  %v7996_v30 = vld [vmem:[%s10658_s0 + $0xd0] sm:$0xff]  }
  0x10   :  { %4111 = vst [vmem:[#allocation3 + $0xf0] sm:$0xff] %v8289_v1  ;;  %4112 = vst [vmem:[#allocation3 + $0xf8] sm:$0xff] %v8289_v1  ;;  %v8004_v31 = vld [vmem:[%s10659_s3 + $0x40] sm:$0xff]   ;;  %v8005_v32 = vld [vmem:[%s10659_s3 + $0x48] sm:$0xff]  }
  0x11   :  { %4113 = vst [vmem:[#allocation3 + $0x100] sm:$0x3] %v8289_v1  ;;  %4114 = vst [vmem:[#allocation3 + $0x108] sm:$0xff] %v8289_v1  ;;  %7335 = vmatpush3.bf16.msra.mxu1 %v8004_v31  ;;  %v7997_v33 = vld [vmem:[%s10658_s0 + $0xd8] sm:$0xff]   ;;  %v7998_v34 = vld [vmem:[%s10658_s0 + $0xe0] sm:$0xff]  }
  0x12   :  { %4115 = vst [vmem:[#allocation3 + $0x110] sm:$0xff] %v8289_v1  ;;  %4116 = vst [vmem:[#allocation3 + $0x118] sm:$0x3] %v8289_v1  ;;  %7336 = vmatprep.subr.bf16.mxu1 %v8289_v1  ;;  %v8006_v35 = vld [vmem:[%s10659_s3 + $0x30] sm:$0xff]   ;;  %v8008_v37 = vld [vmem:[%s10659_s3 + $0x38] sm:$0xff]  }
  0x13   :  { %4117 = vst [vmem:[#allocation3 + $0x120] sm:$0xff] %v8289_v1  ;;  %4118 = vst [vmem:[#allocation3 + $0x128] sm:$0xff] %v8289_v1  ;;  %v8007_v36 = vld [vmem:[%s10659_s3 + $0x50] sm:$0xff]   ;;  %7267 = vmatpush3.bf16.msra.mxu0 %v8006_v35  ;;  %v8009_v38 = vld [vmem:[%s10659_s3 + $0x58] sm:$0xff]  }
  0x14   :  { %4119 = vst [vmem:[#allocation3 + $0x130] sm:$0x3] %v8289_v1  ;;  %4120 = vst [vmem:[#allocation3 + $0x138] sm:$0xff] %v8289_v1  ;;  %7268 = vmatprep.subr.bf16.mxu0 %v8289_v1  ;;  %v7999_v39 = vld [vmem:[%s10658_s0 + $0xe8] sm:$0xff]   ;;  %v8000_v40 = vld [vmem:[%s10658_s0 + $0xf0] sm:$0xff]  }
  0x15   :  { %4121 = vst [vmem:[#allocation3 + $0x140] sm:$0xff] %v8289_v1  ;;  %4122 = vst [vmem:[#allocation3 + $0x148] sm:$0x3] %v8289_v1  ;;  %7337 = vmatpush3.bf16.msra.mxu1 %v8005_v32  ;;  %v8001_v41 = vld [vmem:[%s10658_s0 + $0xf8] sm:$0xff]   ;;  %v8763_v42 = vld [vmem:[%s10660_s2] ss:$0 sm:$0xff] }
  0x16   :  { %4123 = vst [vmem:[#allocation3 + $0x150] sm:$0xff] %v8289_v1  ;;  %4124 = vst [vmem:[#allocation3 + $0x158] sm:$0xff] %v8289_v1  ;;  %7207 = vmatmul.mubr.msk.bf16.gmra.mrb[8].mxu0 %vm274_vm0, %v7975_v7  ;;  %7338 = vmatprep.subr.bf16.mxu1 %v8289_v1  ;;  %v8013_v31 = vld [vmem:[%s10659_s3 + $0x80] sm:$0xff]  }
  0x17   :  { %4125 = vst [vmem:[#allocation3 + $0x160] sm:$0x3] %v8289_v1  ;;  %4126 = vst [vmem:[#allocation3 + $0x168] sm:$0xff] %v8289_v1  ;;  %7210 = vmatprep.mubr.msk.bf16.mxu0 %vm274_vm0, %v7976_v8  ;;  %7269 = vmatpush3.bf16.msra.mxu0 %v8008_v37 }
  0x18   :  { %4127 = vst [vmem:[#allocation3 + $0x170] sm:$0xff] %v8289_v1  ;;  %4128 = vst [vmem:[#allocation3 + $0x178] sm:$0x3] %v8289_v1  ;;  %7298 = vmatprep.subr.bf16.mxu0 %v8289_v1 }
  0x19   :  { %4129 = vst [vmem:[#allocation3 + $0x180] sm:$0xff] %v8289_v1  ;;  %4130 = vst [vmem:[#allocation3 + $0x188] sm:$0xff] %v8289_v1  ;;  %7339 = vmatpush3.bf16.msra.mxu1 %v8007_v36 }
  0x1a   :  { %4131 = vst [vmem:[#allocation3 + $0x190] sm:$0x3] %v8289_v1  ;;  %4132 = vst [vmem:[#allocation3 + $0x198] sm:$0xff] %v8289_v1  ;;  %7340 = vmatprep.subr.bf16.mxu1 %v8289_v1 }
  0x1b   :  { %4133 = vst [vmem:[#allocation3 + $0x1a0] sm:$0xff] %v8289_v1  ;;  %4134 = vst [vmem:[#allocation3 + $0x1a8] sm:$0x3] %v8289_v1 }
  0x1c   :  { %825 = vst.msk [vmem:[#allocation2 + $0x18] sm:$0xff] %vm820_vm1, %v8289_v1  ;;  %821 = vst.msk [vmem:[#allocation2] sm:$0xff] %vm820_vm1, %v8289_v1 }
  0x1d   :  { %822 = vst.msk [vmem:[#allocation2 + $0x8] sm:$0xff] %vm820_vm1, %v8289_v1  ;;  %826 = vst.msk [vmem:[#allocation2 + $0x20] sm:$0xff] %vm820_vm1, %v8289_v1  ;;  %7341 = vmatpush3.bf16.msra.mxu1 %v8009_v38 }
  0x1e   :  { %7211 = vmatmul.mubr.msk.bf16.gmra.mrb[12].mxu0 %vm274_vm0, %v7977_v9  ;;  %828 = vst.msk [vmem:[#allocation2 + $0x30] sm:$0xff] %vm820_vm1, %v8289_v1  ;;  %829 = vst.msk [vmem:[#allocation2 + $0x38] sm:$0xff] %vm820_vm1, %v8289_v1  ;;  %7406 = vmatprep.subr.bf16.mxu1 %v8289_v1 }
  0x1f   :  { %7214 = vmatprep.mubr.msk.bf16.mxu0 %vm274_vm0, %v7978_v10  ;;  %831 = vst.msk [vmem:[#allocation2 + $0x48] sm:$0xff] %vm820_vm1, %v8289_v1  ;;  %832 = vst.msk [vmem:[#allocation2 + $0x50] sm:$0xff] %vm820_vm1, %v8289_v1 }
  0x20   :  { %834 = vst.msk [vmem:[#allocation2 + $0x60] sm:$0xff] %vm820_vm1, %v8289_v1  ;;  %835 = vst.msk [vmem:[#allocation2 + $0x68] sm:$0xff] %vm820_vm1, %v8289_v1 }
  0x21   :  { %837 = vst.msk [vmem:[#allocation2 + $0x78] sm:$0xff] %vm820_vm1, %v8289_v1  ;;  %838 = vst.msk [vmem:[#allocation2 + $0x80] sm:$0xff] %vm820_vm1, %v8289_v1 }
  0x22   :  { %840 = vst.msk [vmem:[#allocation2 + $0x90] sm:$0xff] %vm820_vm1, %v8289_v1  ;;  %841 = vst.msk [vmem:[#allocation2 + $0x98] sm:$0xff] %vm820_vm1, %v8289_v1 }
  0x23   :  { %843 = vst.msk [vmem:[#allocation2 + $0xa8] sm:$0xff] %vm820_vm1, %v8289_v1  ;;  %844 = vst.msk [vmem:[#allocation2 + $0xb0] sm:$0xff] %vm820_vm1, %v8289_v1 }
  0x24   :  { %846 = vst.msk [vmem:[#allocation2 + $0xc0] sm:$0xff] %vm820_vm1, %v8289_v1  ;;  %847 = vst.msk [vmem:[#allocation2 + $0xc8] sm:$0xff] %vm820_vm1, %v8289_v1 }
  0x25   :  { %849 = vst.msk [vmem:[#allocation2 + $0xd8] sm:$0xff] %vm820_vm1, %v8289_v1  ;;  %850 = vst.msk [vmem:[#allocation2 + $0xe0] sm:$0xff] %vm820_vm1, %v8289_v1 }
  0x26   :  { %7215 = vmatmul.mubr.msk.bf16.gmra.mrb[16].mxu0 %vm274_vm0, %v7979_v11  ;;  %852 = vst.msk [vmem:[#allocation2 + $0xf0] sm:$0xff] %vm820_vm1, %v8289_v1  ;;  %853 = vst.msk [vmem:[#allocation2 + $0xf8] sm:$0xff] %vm820_vm1, %v8289_v1 }
  0x27   :  { %7218 = vmatprep.mubr.msk.bf16.mxu0 %vm274_vm0, %v7980_v12  ;;  %855 = vst.msk [vmem:[#allocation2 + $0x108] sm:$0xff] %vm820_vm1, %v8289_v1  ;;  %856 = vst.msk [vmem:[#allocation2 + $0x110] sm:$0xff] %vm820_vm1, %v8289_v1 }
  0x28   :  { %858 = vst.msk [vmem:[#allocation2 + $0x120] sm:$0xff] %vm820_vm1, %v8289_v1  ;;  %859 = vst.msk [vmem:[#allocation2 + $0x128] sm:$0xff] %vm820_vm1, %v8289_v1 }
  0x29   :  { %861 = vst.msk [vmem:[#allocation2 + $0x138] sm:$0xff] %vm820_vm1, %v8289_v1  ;;  %862 = vst.msk [vmem:[#allocation2 + $0x140] sm:$0xff] %vm820_vm1, %v8289_v1 }
  0x2a   :  { %864 = vst.msk [vmem:[#allocation2 + $0x150] sm:$0xff] %vm820_vm1, %v8289_v1  ;;  %865 = vst.msk [vmem:[#allocation2 + $0x158] sm:$0xff] %vm820_vm1, %v8289_v1 }
  0x2b   :  { %867 = vst.msk [vmem:[#allocation2 + $0x168] sm:$0xff] %vm820_vm1, %v8289_v1  ;;  %868 = vst.msk [vmem:[#allocation2 + $0x170] sm:$0xff] %vm820_vm1, %v8289_v1 }
  0x2c   :  { %870 = vst.msk [vmem:[#allocation2 + $0x180] sm:$0xff] %vm820_vm1, %v8289_v1  ;;  %871 = vst.msk [vmem:[#allocation2 + $0x188] sm:$0xff] %vm820_vm1, %v8289_v1 }
  0x2d   :  { %873 = vst.msk [vmem:[#allocation2 + $0x198] sm:$0xff] %vm820_vm1, %v8289_v1  ;;  %874 = vst.msk [vmem:[#allocation2 + $0x1a0] sm:$0xff] %vm820_vm1, %v8289_v1 }
  0x2e   :  { %7219 = vmatmul.mubr.msk.bf16.gmra.mrb[20].mxu0 %vm274_vm0, %v7981_v15  ;;  %876 = vst.msk [vmem:[#allocation2 + $0x1b0] sm:$0xff] %vm820_vm1, %v8289_v1  ;;  %877 = vst.msk [vmem:[#allocation2 + $0x1b8] sm:$0xff] %vm820_vm1, %v8289_v1 }
  0x2f   :  { %7222 = vmatprep.mubr.msk.bf16.mxu0 %vm274_vm0, %v7982_v16  ;;  %879 = vst.msk [vmem:[#allocation2 + $0x1c8] sm:$0xff] %vm820_vm1, %v8289_v1  ;;  %880 = vst.msk [vmem:[#allocation2 + $0x1d0] sm:$0xff] %vm820_vm1, %v8289_v1 }
  0x30   :  { %882 = vst.msk [vmem:[#allocation2 + $0x1e0] sm:$0xff] %vm820_vm1, %v8289_v1  ;;  %883 = vst.msk [vmem:[#allocation2 + $0x1e8] sm:$0xff] %vm820_vm1, %v8289_v1 }
  0x31   :  { %885 = vst.msk [vmem:[#allocation2 + $0x1f8] sm:$0xff] %vm820_vm1, %v8289_v1  ;;  %886 = vst.msk [vmem:[#allocation2 + $0x200] sm:$0xff] %vm820_vm1, %v8289_v1 }
  0x32   :  { %888 = vst.msk [vmem:[#allocation2 + $0x210] sm:$0xff] %vm820_vm1, %v8289_v1  ;;  %889 = vst.msk [vmem:[#allocation2 + $0x218] sm:$0xff] %vm820_vm1, %v8289_v1 }
  0x33   :  { %891 = vst.msk [vmem:[#allocation2 + $0x228] sm:$0xff] %vm820_vm1, %v8289_v1  ;;  %892 = vst.msk [vmem:[#allocation2 + $0x230] sm:$0xff] %vm820_vm1, %v8289_v1 }
  0x34   :  { %894 = vst.msk [vmem:[#allocation2 + $0x240] sm:$0xff] %vm820_vm1, %v8289_v1  ;;  %895 = vst.msk [vmem:[#allocation2 + $0x248] sm:$0xff] %vm820_vm1, %v8289_v1 }
  0x35   :  { %897 = vst.msk [vmem:[#allocation2 + $0x258] sm:$0xff] %vm820_vm1, %v8289_v1  ;;  %898 = vst.msk [vmem:[#allocation2 + $0x260] sm:$0xff] %vm820_vm1, %v8289_v1 }
  0x36   :  { %7223 = vmatmul.mubr.msk.bf16.gmra.mrb[24].mxu0 %vm274_vm0, %v7983_v17  ;;  %900 = vst.msk [vmem:[#allocation2 + $0x270] sm:$0xff] %vm820_vm1, %v8289_v1  ;;  %901 = vst.msk [vmem:[#allocation2 + $0x278] sm:$0xff] %vm820_vm1, %v8289_v1  ;;  %v1020_v17 = vld [vmem:[#allocation2 + $0x1] ss:$2 sm:$0xff] }
  0x37   :  { %7226 = vmatprep.mubr.msk.bf16.mxu0 %vm274_vm0, %v7984_v18  ;;  %903 = vst.msk [vmem:[#allocation2 + $0x288] sm:$0xff] %vm820_vm1, %v8289_v1  ;;  %904 = vst.msk [vmem:[#allocation2 + $0x290] sm:$0xff] %vm820_vm1, %v8289_v1 }
  0x38   :  { %906 = vst.msk [vmem:[#allocation2 + $0x2a0] sm:$0xff] %vm820_vm1, %v8289_v1  ;;  %907 = vst.msk [vmem:[#allocation2 + $0x2a8] sm:$0xff] %vm820_vm1, %v8289_v1 }
  0x39   :  { %909 = vst.msk [vmem:[#allocation2 + $0x2b8] sm:$0xff] %vm820_vm1, %v8289_v1  ;;  %910 = vst.msk [vmem:[#allocation2 + $0x2c0] sm:$0xff] %vm820_vm1, %v8289_v1 }
  0x3a   :  { %912 = vst.msk [vmem:[#allocation2 + $0x2d0] sm:$0xff] %vm820_vm1, %v8289_v1  ;;  %913 = vst.msk [vmem:[#allocation2 + $0x2d8] sm:$0xff] %vm820_vm1, %v8289_v1 }
  0x3b   :  { %915 = vst.msk [vmem:[#allocation2 + $0x2e8] sm:$0xff] %vm820_vm1, %v8289_v1  ;;  %916 = vst.msk [vmem:[#allocation2 + $0x2f0] sm:$0xff] %vm820_vm1, %v8289_v1 }
  0x3c   :  { %833 = vst.msk [vmem:[#allocation2 + $0x58] sm:$0x3] %vm823_vm2, %v8289_v1  ;;  %824 = vst.msk [vmem:[#allocation2 + $0x10] sm:$0x3] %vm823_vm2, %v8289_v1 }
  0x3d   :  { %827 = vst.msk [vmem:[#allocation2 + $0x28] sm:$0x3] %vm823_vm2, %v8289_v1  ;;  %830 = vst.msk [vmem:[#allocation2 + $0x40] sm:$0x3] %vm823_vm2, %v8289_v1 }
  0x3e   :  { %7227 = vmatmul.mubr.msk.bf16.gmra.mrb[28].mxu0 %vm274_vm0, %v7985_v19  ;;  %836 = vst.msk [vmem:[#allocation2 + $0x70] sm:$0x3] %vm823_vm2, %v8289_v1  ;;  %839 = vst.msk [vmem:[#allocation2 + $0x88] sm:$0x3] %vm823_vm2, %v8289_v1 }
  0x3f   :  { %7230 = vmatprep.mubr.msk.bf16.mxu0 %vm274_vm0, %v7986_v20  ;;  %842 = vst.msk [vmem:[#allocation2 + $0xa0] sm:$0x3] %vm823_vm2, %v8289_v1  ;;  %845 = vst.msk [vmem:[#allocation2 + $0xb8] sm:$0x3] %vm823_vm2, %v8289_v1 }
  0x40   :  { %848 = vst.msk [vmem:[#allocation2 + $0xd0] sm:$0x3] %vm823_vm2, %v8289_v1  ;;  %851 = vst.msk [vmem:[#allocation2 + $0xe8] sm:$0x3] %vm823_vm2, %v8289_v1 }
  0x41   :  { %854 = vst.msk [vmem:[#allocation2 + $0x100] sm:$0x3] %vm823_vm2, %v8289_v1  ;;  %857 = vst.msk [vmem:[#allocation2 + $0x118] sm:$0x3] %vm823_vm2, %v8289_v1 }
  0x42   :  { %860 = vst.msk [vmem:[#allocation2 + $0x130] sm:$0x3] %vm823_vm2, %v8289_v1  ;;  %863 = vst.msk [vmem:[#allocation2 + $0x148] sm:$0x3] %vm823_vm2, %v8289_v1 }
  0x43   :  { %866 = vst.msk [vmem:[#allocation2 + $0x160] sm:$0x3] %vm823_vm2, %v8289_v1  ;;  %869 = vst.msk [vmem:[#allocation2 + $0x178] sm:$0x3] %vm823_vm2, %v8289_v1  ;;  %v1332_v20 = vld [vmem:[#allocation2 + $0x2] ss:$2 sm:$0xff] }
  0x44   :  { %872 = vst.msk [vmem:[#allocation2 + $0x190] sm:$0x3] %vm823_vm2, %v8289_v1  ;;  %875 = vst.msk [vmem:[#allocation2 + $0x1a8] sm:$0x3] %vm823_vm2, %v8289_v1 }
  0x45   :  { %878 = vst.msk [vmem:[#allocation2 + $0x1c0] sm:$0x3] %vm823_vm2, %v8289_v1  ;;  %881 = vst.msk [vmem:[#allocation2 + $0x1d8] sm:$0x3] %vm823_vm2, %v8289_v1 }
  0x46   :  { %7231 = vmatmul.mubr.msk.bf16.gmra.mrb[32].mxu0 %vm274_vm0, %v7987_v21  ;;  %884 = vst.msk [vmem:[#allocation2 + $0x1f0] sm:$0x3] %vm823_vm2, %v8289_v1  ;;  %887 = vst.msk [vmem:[#allocation2 + $0x208] sm:$0x3] %vm823_vm2, %v8289_v1 }
  0x47   :  { %7234 = vmatprep.mubr.msk.bf16.mxu0 %vm274_vm0, %v7988_v22  ;;  %890 = vst.msk [vmem:[#allocation2 + $0x220] sm:$0x3] %vm823_vm2, %v8289_v1  ;;  %893 = vst.msk [vmem:[#allocation2 + $0x238] sm:$0x3] %vm823_vm2, %v8289_v1 }
  0x48   :  { %896 = vst.msk [vmem:[#allocation2 + $0x250] sm:$0x3] %vm823_vm2, %v8289_v1  ;;  %899 = vst.msk [vmem:[#allocation2 + $0x268] sm:$0x3] %vm823_vm2, %v8289_v1 }
  0x49   :  { %902 = vst.msk [vmem:[#allocation2 + $0x280] sm:$0x3] %vm823_vm2, %v8289_v1  ;;  %905 = vst.msk [vmem:[#allocation2 + $0x298] sm:$0x3] %vm823_vm2, %v8289_v1 }
  0x4a   :  { %908 = vst.msk [vmem:[#allocation2 + $0x2b0] sm:$0x3] %vm823_vm2, %v8289_v1  ;;  %911 = vst.msk [vmem:[#allocation2 + $0x2c8] sm:$0x3] %vm823_vm2, %v8289_v1 }
  0x4b   :  { %914 = vst.msk [vmem:[#allocation2 + $0x2e0] sm:$0x3] %vm823_vm2, %v8289_v1  ;;  %917 = vst.msk [vmem:[#allocation2 + $0x2f8] sm:$0x3] %vm823_vm2, %v8289_v1 }
  0x4e   :  { %7235 = vmatmul.mubr.msk.bf16.gmra.mrb[36].mxu0 %vm274_vm0, %v7989_v23 }
  0x4f   :  { %7238 = vmatprep.mubr.msk.bf16.mxu0 %vm274_vm0, %v7990_v24 }
  0x56   :  { %7239 = vmatmul.mubr.msk.bf16.gmra.mrb[40].mxu0 %vm274_vm0, %v7991_v25 }
  0x57   :  { %7242 = vmatprep.mubr.msk.bf16.mxu0 %vm274_vm0, %v7992_v26 }
  0x5e   :  { %7243 = vmatmul.mubr.msk.bf16.gmra.mrb[44].mxu0 %vm274_vm0, %v7993_v27 }
  0x5f   :  { %7246 = vmatprep.mubr.msk.bf16.mxu0 %vm274_vm0, %v8507_v28 }
  0x66   :  { %7247 = vmatmul.mubr.msk.bf16.gmra.mrb[48].mxu0 %vm274_vm0, %v7995_v29 }
  0x67   :  { %7250 = vmatprep.mubr.msk.bf16.mxu0 %vm274_vm0, %v7996_v30  ;;  %v8010_v30 = vld [vmem:[%s10659_s3] sm:$0xff]  }
  0x6e   :  { %7251 = vmatmul.mubr.msk.bf16.gmra.mrb[52].mxu0 %vm274_vm0, %v7997_v33 }
  0x6f   :  { %7254 = vmatprep.mubr.msk.bf16.mxu0 %vm274_vm0, %v7998_v34 }
  0x76   :  { %7255 = vmatmul.mubr.msk.bf16.gmra.mrb[56].mxu0 %vm274_vm0, %v7999_v39  ;;  %v8797_v39 = vld [vmem:[#allocation3] sm:$0xff] }
  0x77   :  { %7258 = vmatprep.mubr.msk.bf16.mxu0 %vm274_vm0, %v8000_v40 }
  0x7e   :  { %7259 = vmatmul.mubr.msk.bf16.gmra.mrb[60].mxu0 %vm274_vm0, %v8001_v41 }
  0x7f   :  { %7270 = vmatprep.mubr.msk.bf16.mxu0 %vm8290_vm3, %v8289_v1 }
  0xd9   :  { %v7200_v43 = vpop.f32.mrb[0].mxu0 }
  0xda   :  { %v412_v44 = vadd.f32 %v7200_v43, %v8763_v42  ;;  %v405_v45 = vpop.f32.mrb[1].mxu0  ;;  %v8011_v43 = vld [vmem:[%s10659_s3 + $0x8] sm:$0xff]  }
  0xdb   :  { %v7201_v46 = vpop.f32.mrb[2].mxu0 }
  0xdc   :  { %vm652_vm4 = vcmp.ge.f32.partialorder %v412_v44, 0.0  ;;  %v708_v47 = vmul.f32 0.01, %v412_v44  ;;  %v415_v48 = vadd.f32 %v7201_v46, %v8763_v42  ;;  %v407_v49 = vpop.f32.mrb[3].mxu0 }
  0xde   :  { %v764_v50 = vsel %vm652_vm4, %v412_v44, %v708_v47  ;;  %vm653_vm6 = vcmp.ge.f32.partialorder %v415_v48, 0.0  ;;  %v709_v51 = vmul.f32 0.01, %v415_v48  ;;  %v8015_v44 = vld [vmem:[%s10659_s3 + $0x88] sm:$0xff]  }
  0xdf   :  { %920 = vst.msk [vmem:[#allocation2 + $0x18] sm:$0xfe] %vm919_vm5, %v764_v50 }
  0xe0   :  { %v765_v52 = vsel %vm653_vm6, %v415_v48, %v709_v51 }
  0xe1   :  { %922 = vst.msk [vmem:[#allocation2 + $0x20] sm:$0x7f] %vm921_vm7, %v765_v52  ;;  %v7204_v53 = vpop.f32.mrb[4].mxu0  ;;  %v8012_v52 = vld [vmem:[%s10659_s3 + $0x10] sm:$0xff]  }
  0xe2   :  { %v428_v54 = vadd.f32 %v7204_v53, %v8763_v42  ;;  %v419_v55 = vpop.f32.mrb[5].mxu0  ;;  %v8016_v53 = vld [vmem:[%s10659_s3 + $0x90] sm:$0xff]  }
  0xe3   :  { %v420_v56 = vadd.f32 %v8763_v42, %v419_v55  ;;  %v7205_v57 = vpop.f32.mrb[6].mxu0 }
  0xe4   :  { %vm656_vm8 = vcmp.ge.f32.partialorder %v428_v54, 0.0  ;;  %v712_v58 = vmul.f32 0.01, %v428_v54  ;;  %v431_v59 = vadd.f32 %v7205_v57, %v8763_v42  ;;  %v422_v60 = vpop.f32.mrb[7].mxu0 }
  0xe5   :  { %vm654_vm9 = vcmp.ge.f32.partialorder %v420_v56, 0.0  ;;  %v710_v61 = vmul.f32 0.01, %v420_v56  ;;  %v423_v62 = vadd.f32 %v8763_v42, %v422_v60 }
  0xe6   :  { %v768_v63 = vsel %vm656_vm8, %v428_v54, %v712_v58  ;;  %vm657_vm10 = vcmp.ge.f32.partialorder %v431_v59, 0.0  ;;  %v713_v0 = vmul.f32 0.01, %v431_v59 }
  0xe7   :  { %925 = vst.msk [vmem:[#allocation2 + $0x48] sm:$0xfe] %vm919_vm5, %v768_v63  ;;  %v766_v1 = vsel %vm654_vm9, %v420_v56, %v710_v61  ;;  %vm655_vm11 = vcmp.ge.f32.partialorder %v423_v62, 0.0  ;;  %v711_v2 = vmul.f32 0.01, %v423_v62  ;;  %v8014_v63 = vld [vmem:[%s10659_s3 + $0x18] sm:$0xff]  }
  0xe8   :  { %923 = vst.msk [vmem:[#allocation2 + $0x30] sm:$0xfe] %vm919_vm5, %v766_v1  ;;  %v769_v3 = vsel %vm657_vm10, %v431_v59, %v713_v0  ;;  %v8017_v0 = vld [vmem:[%s10659_s3 + $0x98] sm:$0xff]  }
  0xe9   :  { %926 = vst.msk [vmem:[#allocation2 + $0x50] sm:$0x7f] %vm921_vm7, %v769_v3  ;;  %v767_v4 = vsel %vm655_vm11, %v423_v62, %v711_v2  ;;  %v7208_v5 = vpop.f32.mrb[8].mxu0 }
  0xea   :  { %924 = vst.msk [vmem:[#allocation2 + $0x38] sm:$0x7f] %vm921_vm7, %v767_v4  ;;  %v444_v6 = vadd.f32 %v7208_v5, %v8763_v42  ;;  %v435_v7 = vpop.f32.mrb[9].mxu0 }
  0xeb   :  { %v436_v8 = vadd.f32 %v8763_v42, %v435_v7  ;;  %v7209_v9 = vpop.f32.mrb[10].mxu0 }
  0xec   :  { %vm660_vm12 = vcmp.ge.f32.partialorder %v444_v6, 0.0  ;;  %v716_v10 = vmul.f32 0.01, %v444_v6  ;;  %v447_v11 = vadd.f32 %v7209_v9, %v8763_v42  ;;  %v438_v12 = vpop.f32.mrb[11].mxu0 }
  0xed   :  { %vm658_vm13 = vcmp.ge.f32.partialorder %v436_v8, 0.0  ;;  %v714_v13 = vmul.f32 0.01, %v436_v8  ;;  %v439_v14 = vadd.f32 %v8763_v42, %v438_v12 }
  0xee   :  { %v772_v15 = vsel %vm660_vm12, %v444_v6, %v716_v10  ;;  %vm661_vm14 = vcmp.ge.f32.partialorder %v447_v11, 0.0  ;;  %v717_v16 = vmul.f32 0.01, %v447_v11 }
  0xef   :  { %929 = vst.msk [vmem:[#allocation2 + $0x78] sm:$0xfe] %vm919_vm5, %v772_v15  ;;  %v770_v18 = vsel %vm658_vm13, %v436_v8, %v714_v13  ;;  %vm659_vm15 = vcmp.ge.f32.partialorder %v439_v14, 0.0  ;;  %v715_v19 = vmul.f32 0.01, %v439_v14 }
  0xf0   :  { %927 = vst.msk [vmem:[#allocation2 + $0x60] sm:$0xfe] %vm919_vm5, %v770_v18  ;;  %v773_v21 = vsel %vm661_vm14, %v447_v11, %v717_v16 }
  0xf1   :  { %930 = vst.msk [vmem:[#allocation2 + $0x80] sm:$0x7f] %vm921_vm7, %v773_v21  ;;  %v771_v22 = vsel %vm659_vm15, %v439_v14, %v715_v19  ;;  %v7212_v23 = vpop.f32.mrb[12].mxu0  ;;  %v1022_v24 = vld [vmem:[#allocation2 + $0x31] ss:$2 sm:$0xff] }
  0xf2   :  { %v1334_v25 = vld [vmem:[#allocation2 + $0x32] ss:$2 sm:$0xff]  ;;  %928 = vst.msk [vmem:[#allocation2 + $0x68] sm:$0x7f] %vm921_vm7, %v771_v22  ;;  %v460_v26 = vadd.f32 %v7212_v23, %v8763_v42  ;;  %v451_v27 = vpop.f32.mrb[13].mxu0  ;;  %v1047_v28 = vpack.c.bf16 %v1022_v24, %v1020_v17 }
  0xf3   :  { %v1359_v29 = vpack.c.bf16 %v1334_v25, %v1332_v20  ;;  %v452_v32 = vadd.f32 %v8763_v42, %v451_v27  ;;  %v7213_v33 = vpop.f32.mrb[14].mxu0 }
  0xf4   :  { %vm664_vm0 = vcmp.ge.f32.partialorder %v460_v26, 0.0  ;;  %v720_v34 = vmul.f32 0.01, %v460_v26  ;;  %v463_v35 = vadd.f32 %v7213_v33, %v8763_v42  ;;  %v454_v36 = vpop.f32.mrb[15].mxu0  ;;  %7271 = vmatmul.mubr.msk.bf16.vlgmr.msra.gmra.mrb[64].mxu0 %vm820_vm1, %v1047_v28 }
  0xf5   :  { %7343 = vmatmul.mubr.msk.bf16.vlgmr.msra.gmra.mrb[0].mxu1 %vm820_vm1, %v1359_v29  ;;  %vm662_vm2 = vcmp.ge.f32.partialorder %v452_v32, 0.0  ;;  %v718_v37 = vmul.f32 0.01, %v452_v32  ;;  %v455_v38 = vadd.f32 %v8763_v42, %v454_v36  ;;  %7274 = vmatprep.mubr.msk.bf16.mxu0 %vm8290_vm3, %v8797_v39 }
  0xf6   :  { %7346 = vmatprep.mubr.msk.bf16.mxu1 %vm8290_vm3, %v8797_v39  ;;  %v776_v40 = vsel %vm664_vm0, %v460_v26, %v720_v34  ;;  %vm665_vm4 = vcmp.ge.f32.partialorder %v463_v35, 0.0  ;;  %v721_v41 = vmul.f32 0.01, %v463_v35  ;;  %7299 = vmatpush3.bf16.msra.mxu0 %v8010_v30 }
  0xf7   :  { %7407 = vmatpush3.bf16.msra.mxu1 %v8013_v31  ;;  %933 = vst.msk [vmem:[#allocation2 + $0xa8] sm:$0xfe] %vm919_vm5, %v776_v40  ;;  %v774_v45 = vsel %vm662_vm2, %v452_v32, %v718_v37  ;;  %vm663_vm6 = vcmp.ge.f32.partialorder %v455_v38, 0.0  ;;  %v719_v46 = vmul.f32 0.01, %v455_v38  ;;  %7300 = vmatprep.subr.bf16.mxu0 %v8797_v39 }
  0xf8   :  { %7408 = vmatprep.subr.bf16.mxu1 %v8797_v39  ;;  %931 = vst.msk [vmem:[#allocation2 + $0x90] sm:$0xfe] %vm919_vm5, %v774_v45  ;;  %v777_v47 = vsel %vm665_vm4, %v463_v35, %v721_v41 }
  0xf9   :  { %934 = vst.msk [vmem:[#allocation2 + $0xb0] sm:$0x7f] %vm921_vm7, %v777_v47  ;;  %v775_v48 = vsel %vm663_vm6, %v455_v38, %v719_v46  ;;  %v7216_v49 = vpop.f32.mrb[16].mxu0  ;;  %v1024_v4 = vld [vmem:[#allocation2 + $0x61] ss:$2 sm:$0xff] }
  0xfa   :  { %932 = vst.msk [vmem:[#allocation2 + $0x98] sm:$0x7f] %vm921_vm7, %v775_v48  ;;  %v476_v50 = vadd.f32 %v7216_v49, %v8763_v42  ;;  %v467_v51 = vpop.f32.mrb[17].mxu0  ;;  %7301 = vmatpush3.bf16.msra.mxu0 %v8011_v43  ;;  %v1336_v5 = vld [vmem:[#allocation2 + $0x62] ss:$2 sm:$0xff] }
  0xfb   :  { %7409 = vmatpush3.bf16.msra.mxu1 %v8015_v44  ;;  %v468_v54 = vadd.f32 %v8763_v42, %v467_v51  ;;  %v7217_v55 = vpop.f32.mrb[18].mxu0  ;;  %7302 = vmatprep.subr.bf16.mxu0 %v8797_v39 }
  0xfc   :  { %7410 = vmatprep.subr.bf16.mxu1 %v8797_v39  ;;  %vm668_vm8 = vcmp.ge.f32.partialorder %v476_v50, 0.0  ;;  %v724_v56 = vmul.f32 0.01, %v476_v50  ;;  %v479_v57 = vadd.f32 %v7217_v55, %v8763_v42  ;;  %v470_v58 = vpop.f32.mrb[19].mxu0 }
  0xfd   :  { %vm666_vm9 = vcmp.ge.f32.partialorder %v468_v54, 0.0  ;;  %v722_v59 = vmul.f32 0.01, %v468_v54  ;;  %v471_v60 = vadd.f32 %v8763_v42, %v470_v58  ;;  %v1034_v58 = vld [vmem:[#allocation2 + $0x181] ss:$2 sm:$0xff] }
  0xfe   :  { %v780_v61 = vsel %vm668_vm8, %v476_v50, %v724_v56  ;;  %vm669_vm10 = vcmp.ge.f32.partialorder %v479_v57, 0.0  ;;  %v725_v62 = vmul.f32 0.01, %v479_v57  ;;  %7303 = vmatpush3.bf16.msra.mxu0 %v8012_v52 }
  0xff   :  { %7411 = vmatpush3.bf16.msra.mxu1 %v8016_v53  ;;  %937 = vst.msk [vmem:[#allocation2 + $0xd8] sm:$0xfe] %vm919_vm5, %v780_v61  ;;  %v778_v1 = vsel %vm666_vm9, %v468_v54, %v722_v59  ;;  %vm667_vm11 = vcmp.ge.f32.partialorder %v471_v60, 0.0  ;;  %v723_v2 = vmul.f32 0.01, %v471_v60  ;;  %7304 = vmatprep.subr.bf16.mxu0 %v8797_v39 }
 0x100   :  { %7412 = vmatprep.subr.bf16.mxu1 %v8797_v39  ;;  %935 = vst.msk [vmem:[#allocation2 + $0xc0] sm:$0xfe] %vm919_vm5, %v778_v1  ;;  %v781_v3 = vsel %vm669_vm10, %v479_v57, %v725_v62  ;;  %v1346_v61 = vld [vmem:[#allocation2 + $0x182] ss:$2 sm:$0xff] }
 0x101   :  { %938 = vst.msk [vmem:[#allocation2 + $0xe0] sm:$0x7f] %vm921_vm7, %v781_v3  ;;  %v779_v6 = vsel %vm667_vm11, %v471_v60, %v723_v2  ;;  %v7220_v7 = vpop.f32.mrb[20].mxu0  ;;  %v1026_v8 = vld [vmem:[#allocation2 + $0x91] ss:$2 sm:$0xff] }
 0x102   :  { %v1338_v9 = vld [vmem:[#allocation2 + $0x92] ss:$2 sm:$0xff]  ;;  %936 = vst.msk [vmem:[#allocation2 + $0xc8] sm:$0x7f] %vm921_vm7, %v779_v6  ;;  %v492_v10 = vadd.f32 %v7220_v7, %v8763_v42  ;;  %v483_v11 = vpop.f32.mrb[21].mxu0  ;;  %v1048_v12 = vpack.c.bf16 %v1026_v8, %v1024_v4  ;;  %7305 = vmatpush3.bf16.msra.mxu0 %v8014_v63 }
 0x103   :  { %v1360_v13 = vpack.c.bf16 %v1338_v9, %v1336_v5  ;;  %7413 = vmatpush3.bf16.msra.mxu1 %v8017_v0  ;;  %v484_v14 = vadd.f32 %v8763_v42, %v483_v11  ;;  %v7221_v15 = vpop.f32.mrb[22].mxu0  ;;  %7370 = vmatprep.subr.bf16.mxu0 %v8797_v39 }
 0x104   :  { %7478 = vmatprep.subr.bf16.mxu1 %v8797_v39  ;;  %vm672_vm12 = vcmp.ge.f32.partialorder %v492_v10, 0.0  ;;  %v728_v16 = vmul.f32 0.01, %v492_v10  ;;  %v495_v17 = vadd.f32 %v7221_v15, %v8763_v42  ;;  %v486_v18 = vpop.f32.mrb[23].mxu0  ;;  %7275 = vmatmul.mubr.msk.bf16.gmra.mrb[68].mxu0 %vm820_vm1, %v1048_v12 }
 0x105   :  { %7347 = vmatmul.mubr.msk.bf16.gmra.mrb[4].mxu1 %vm820_vm1, %v1360_v13  ;;  %vm670_vm13 = vcmp.ge.f32.partialorder %v484_v14, 0.0  ;;  %v726_v19 = vmul.f32 0.01, %v484_v14  ;;  %v487_v20 = vadd.f32 %v8763_v42, %v486_v18  ;;  %7278 = vmatprep.mubr.msk.bf16.mxu0 %vm8290_vm3, %v8797_v39 }
 0x106   :  { %7350 = vmatprep.mubr.msk.bf16.mxu1 %vm8290_vm3, %v8797_v39  ;;  %v784_v21 = vsel %vm672_vm12, %v492_v10, %v728_v16  ;;  %vm673_vm14 = vcmp.ge.f32.partialorder %v495_v17, 0.0  ;;  %v729_v22 = vmul.f32 0.01, %v495_v17 }
 0x107   :  { %941 = vst.msk [vmem:[#allocation2 + $0x108] sm:$0xfe] %vm919_vm5, %v784_v21  ;;  %v782_v23 = vsel %vm670_vm13, %v484_v14, %v726_v19  ;;  %vm671_vm15 = vcmp.ge.f32.partialorder %v487_v20, 0.0  ;;  %v727_v24 = vmul.f32 0.01, %v487_v20 }
 0x108   :  { %939 = vst.msk [vmem:[#allocation2 + $0xf0] sm:$0xfe] %vm919_vm5, %v782_v23  ;;  %v785_v25 = vsel %vm673_vm14, %v495_v17, %v729_v22 }
 0x109   :  { %942 = vst.msk [vmem:[#allocation2 + $0x110] sm:$0x7f] %vm921_vm7, %v785_v25  ;;  %v783_v26 = vsel %vm671_vm15, %v487_v20, %v727_v24  ;;  %v7224_v27 = vpop.f32.mrb[24].mxu0  ;;  %v1028_v44 = vld [vmem:[#allocation2 + $0xc1] ss:$2 sm:$0xff] }
 0x10a   :  { %940 = vst.msk [vmem:[#allocation2 + $0xf8] sm:$0x7f] %vm921_vm7, %v783_v26  ;;  %v508_v28 = vadd.f32 %v7224_v27, %v8763_v42  ;;  %v499_v29 = vpop.f32.mrb[25].mxu0  ;;  %v1340_v45 = vld [vmem:[#allocation2 + $0xc2] ss:$2 sm:$0xff] }
 0x10b   :  { %v500_v30 = vadd.f32 %v8763_v42, %v499_v29  ;;  %v7225_v31 = vpop.f32.mrb[26].mxu0 }
 0x10c   :  { %vm676_vm0 = vcmp.ge.f32.partialorder %v508_v28, 0.0  ;;  %v732_v32 = vmul.f32 0.01, %v508_v28  ;;  %v511_v33 = vadd.f32 %v7225_v31, %v8763_v42  ;;  %v502_v34 = vpop.f32.mrb[27].mxu0 }
 0x10d   :  { %vm674_vm2 = vcmp.ge.f32.partialorder %v500_v30, 0.0  ;;  %v730_v35 = vmul.f32 0.01, %v500_v30  ;;  %v503_v36 = vadd.f32 %v8763_v42, %v502_v34 }
 0x10e   :  { %v788_v37 = vsel %vm676_vm0, %v508_v28, %v732_v32  ;;  %vm677_vm4 = vcmp.ge.f32.partialorder %v511_v33, 0.0  ;;  %v733_v38 = vmul.f32 0.01, %v511_v33 }
 0x10f   :  { %945 = vst.msk [vmem:[#allocation2 + $0x138] sm:$0xfe] %vm919_vm5, %v788_v37  ;;  %v786_v40 = vsel %vm674_vm2, %v500_v30, %v730_v35  ;;  %vm675_vm6 = vcmp.ge.f32.partialorder %v503_v36, 0.0  ;;  %v731_v41 = vmul.f32 0.01, %v503_v36 }
 0x110   :  { %943 = vst.msk [vmem:[#allocation2 + $0x120] sm:$0xfe] %vm919_vm5, %v786_v40  ;;  %v789_v43 = vsel %vm677_vm4, %v511_v33, %v733_v38 }
 0x111   :  { %946 = vst.msk [vmem:[#allocation2 + $0x140] sm:$0x7f] %vm921_vm7, %v789_v43  ;;  %v787_v46 = vsel %vm675_vm6, %v503_v36, %v731_v41  ;;  %v7228_v47 = vpop.f32.mrb[28].mxu0  ;;  %v1030_v48 = vld [vmem:[#allocation2 + $0xf1] ss:$2 sm:$0xff] }
 0x112   :  { %v1342_v49 = vld [vmem:[#allocation2 + $0xf2] ss:$2 sm:$0xff]  ;;  %944 = vst.msk [vmem:[#allocation2 + $0x128] sm:$0x7f] %vm921_vm7, %v787_v46  ;;  %v515_v50 = vpop.f32.mrb[29].mxu0  ;;  %v1049_v51 = vpack.c.bf16 %v1030_v48, %v1028_v44 }
 0x113   :  { %v1361_v52 = vpack.c.bf16 %v1342_v49, %v1340_v45  ;;  %v516_v53 = vadd.f32 %v8763_v42, %v515_v50  ;;  %v7229_v54 = vpop.f32.mrb[30].mxu0 }
 0x114   :  { %v518_v55 = vpop.f32.mrb[31].mxu0  ;;  %7279 = vmatmul.mubr.msk.bf16.gmra.mrb[72].mxu0 %vm820_vm1, %v1049_v51 }
 0x115   :  { %7351 = vmatmul.mubr.msk.bf16.gmra.mrb[8].mxu1 %vm820_vm1, %v1361_v52  ;;  %vm678_vm8 = vcmp.ge.f32.partialorder %v516_v53, 0.0  ;;  %v734_v56 = vmul.f32 0.01, %v516_v53  ;;  %v519_v57 = vadd.f32 %v8763_v42, %v518_v55  ;;  %7282 = vmatprep.mubr.msk.bf16.mxu0 %vm8290_vm3, %v8797_v39 }
 0x116   :  { %7354 = vmatprep.mubr.msk.bf16.mxu1 %vm8290_vm3, %v8797_v39 }
 0x117   :  { %v790_v59 = vsel %vm678_vm8, %v516_v53, %v734_v56  ;;  %vm679_vm9 = vcmp.ge.f32.partialorder %v519_v57, 0.0  ;;  %v735_v60 = vmul.f32 0.01, %v519_v57 }
 0x118   :  { %947 = vst.msk [vmem:[#allocation2 + $0x150] sm:$0xfe] %vm919_vm5, %v790_v59 }
 0x119   :  { %v791_v62 = vsel %vm679_vm9, %v519_v57, %v735_v60  ;;  %v7232_v63 = vpop.f32.mrb[32].mxu0  ;;  %v1032_v0 = vld [vmem:[#allocation2 + $0x121] ss:$2 sm:$0xff]  ;;  %v1344_v1 = vld [vmem:[#allocation2 + $0x122] ss:$2 sm:$0xff] }
 0x11a   :  { %948 = vst.msk [vmem:[#allocation2 + $0x158] sm:$0x7f] %vm921_vm7, %v791_v62  ;;  %v536_v2 = vadd.f32 %v7232_v63, %v8763_v42  ;;  %v529_v3 = vpop.f32.mrb[33].mxu0  ;;  %v1050_v4 = vpack.c.bf16 %v1034_v58, %v1032_v0  ;;  %v1362_v5 = vpack.c.bf16 %v1346_v61, %v1344_v1 }
 0x11b   :  { %v7233_v6 = vpop.f32.mrb[34].mxu0 }
 0x11c   :  { %vm680_vm10 = vcmp.ge.f32.partialorder %v536_v2, 0.0  ;;  %v736_v7 = vmul.f32 0.01, %v536_v2  ;;  %v539_v8 = vadd.f32 %v7233_v6, %v8763_v42  ;;  %v531_v9 = vpop.f32.mrb[35].mxu0  ;;  %7283 = vmatmul.mubr.msk.bf16.gmra.mrb[76].mxu0 %vm820_vm1, %v1050_v4 }
 0x11d   :  { %7355 = vmatmul.mubr.msk.bf16.gmra.mrb[12].mxu1 %vm820_vm1, %v1362_v5  ;;  %7286 = vmatprep.mubr.msk.bf16.mxu0 %vm8290_vm3, %v8797_v39 }
 0x11e   :  { %7358 = vmatprep.mubr.msk.bf16.mxu1 %vm8290_vm3, %v8797_v39  ;;  %v792_v10 = vsel %vm680_vm10, %v536_v2, %v736_v7  ;;  %vm681_vm11 = vcmp.ge.f32.partialorder %v539_v8, 0.0  ;;  %v737_v11 = vmul.f32 0.01, %v539_v8 }
 0x11f   :  { %949 = vst.msk [vmem:[#allocation2 + $0x198] sm:$0xfe] %vm919_vm5, %v792_v10 }
 0x120   :  { %v793_v12 = vsel %vm681_vm11, %v539_v8, %v737_v11 }
 0x121   :  { %950 = vst.msk [vmem:[#allocation2 + $0x1a0] sm:$0x7f] %vm921_vm7, %v793_v12  ;;  %v7236_v13 = vpop.f32.mrb[36].mxu0 }
 0x122   :  { %v552_v14 = vadd.f32 %v7236_v13, %v8763_v42  ;;  %v543_v15 = vpop.f32.mrb[37].mxu0 }
 0x123   :  { %v544_v16 = vadd.f32 %v8763_v42, %v543_v15  ;;  %v7237_v17 = vpop.f32.mrb[38].mxu0 }
 0x124   :  { %vm684_vm12 = vcmp.ge.f32.partialorder %v552_v14, 0.0  ;;  %v740_v18 = vmul.f32 0.01, %v552_v14  ;;  %v555_v19 = vadd.f32 %v7237_v17, %v8763_v42  ;;  %v546_v20 = vpop.f32.mrb[39].mxu0 }
 0x125   :  { %vm682_vm13 = vcmp.ge.f32.partialorder %v544_v16, 0.0  ;;  %v738_v21 = vmul.f32 0.01, %v544_v16  ;;  %v547_v22 = vadd.f32 %v8763_v42, %v546_v20 }
 0x126   :  { %v796_v23 = vsel %vm684_vm12, %v552_v14, %v740_v18  ;;  %vm685_vm14 = vcmp.ge.f32.partialorder %v555_v19, 0.0  ;;  %v741_v24 = vmul.f32 0.01, %v555_v19 }
 0x127   :  { %953 = vst.msk [vmem:[#allocation2 + $0x1c8] sm:$0xfe] %vm919_vm5, %v796_v23  ;;  %v794_v25 = vsel %vm682_vm13, %v544_v16, %v738_v21  ;;  %vm683_vm15 = vcmp.ge.f32.partialorder %v547_v22, 0.0  ;;  %v739_v26 = vmul.f32 0.01, %v547_v22 }
 0x128   :  { %951 = vst.msk [vmem:[#allocation2 + $0x1b0] sm:$0xfe] %vm919_vm5, %v794_v25  ;;  %v797_v27 = vsel %vm685_vm14, %v555_v19, %v741_v24 }
 0x129   :  { %954 = vst.msk [vmem:[#allocation2 + $0x1d0] sm:$0x7f] %vm921_vm7, %v797_v27  ;;  %v795_v28 = vsel %vm683_vm15, %v547_v22, %v739_v26  ;;  %v7240_v29 = vpop.f32.mrb[40].mxu0 }
 0x12a   :  { %952 = vst.msk [vmem:[#allocation2 + $0x1b8] sm:$0x7f] %vm921_vm7, %v795_v28  ;;  %v568_v30 = vadd.f32 %v7240_v29, %v8763_v42  ;;  %v559_v31 = vpop.f32.mrb[41].mxu0 }
 0x12b   :  { %v560_v32 = vadd.f32 %v8763_v42, %v559_v31  ;;  %v7241_v33 = vpop.f32.mrb[42].mxu0 }
 0x12c   :  { %vm688_vm0 = vcmp.ge.f32.partialorder %v568_v30, 0.0  ;;  %v744_v34 = vmul.f32 0.01, %v568_v30  ;;  %v571_v35 = vadd.f32 %v7241_v33, %v8763_v42  ;;  %v562_v36 = vpop.f32.mrb[43].mxu0 }
 0x12d   :  { %vm686_vm2 = vcmp.ge.f32.partialorder %v560_v32, 0.0  ;;  %v742_v37 = vmul.f32 0.01, %v560_v32  ;;  %v563_v38 = vadd.f32 %v8763_v42, %v562_v36 }
 0x12e   :  { %v800_v40 = vsel %vm688_vm0, %v568_v30, %v744_v34  ;;  %vm689_vm4 = vcmp.ge.f32.partialorder %v571_v35, 0.0  ;;  %v745_v41 = vmul.f32 0.01, %v571_v35 }
 0x12f   :  { %957 = vst.msk [vmem:[#allocation2 + $0x1f8] sm:$0xfe] %vm919_vm5, %v800_v40  ;;  %v798_v43 = vsel %vm686_vm2, %v560_v32, %v742_v37  ;;  %vm687_vm6 = vcmp.ge.f32.partialorder %v563_v38, 0.0  ;;  %v743_v44 = vmul.f32 0.01, %v563_v38 }
 0x130   :  { %955 = vst.msk [vmem:[#allocation2 + $0x1e0] sm:$0xfe] %vm919_vm5, %v798_v43  ;;  %v801_v45 = vsel %vm689_vm4, %v571_v35, %v745_v41 }
 0x131   :  { %958 = vst.msk [vmem:[#allocation2 + $0x200] sm:$0x7f] %vm921_vm7, %v801_v45  ;;  %v799_v46 = vsel %vm687_vm6, %v563_v38, %v743_v44  ;;  %v7244_v47 = vpop.f32.mrb[44].mxu0  ;;  %v1036_v62 = vld [vmem:[#allocation2 + $0x1b1] ss:$2 sm:$0xff] }
 0x132   :  { %956 = vst.msk [vmem:[#allocation2 + $0x1e8] sm:$0x7f] %vm921_vm7, %v799_v46  ;;  %v584_v48 = vadd.f32 %v7244_v47, %v8763_v42  ;;  %v575_v49 = vpop.f32.mrb[45].mxu0  ;;  %v1348_v63 = vld [vmem:[#allocation2 + $0x1b2] ss:$2 sm:$0xff] }
 0x133   :  { %v576_v50 = vadd.f32 %v8763_v42, %v575_v49  ;;  %v7245_v51 = vpop.f32.mrb[46].mxu0 }
 0x134   :  { %vm692_vm8 = vcmp.ge.f32.partialorder %v584_v48, 0.0  ;;  %v748_v52 = vmul.f32 0.01, %v584_v48  ;;  %v587_v53 = vadd.f32 %v7245_v51, %v8763_v42  ;;  %v578_v54 = vpop.f32.mrb[47].mxu0 }
 0x135   :  { %vm690_vm9 = vcmp.ge.f32.partialorder %v576_v50, 0.0  ;;  %v746_v55 = vmul.f32 0.01, %v576_v50  ;;  %v579_v56 = vadd.f32 %v8763_v42, %v578_v54 }
 0x136   :  { %v804_v57 = vsel %vm692_vm8, %v584_v48, %v748_v52  ;;  %vm693_vm10 = vcmp.ge.f32.partialorder %v587_v53, 0.0  ;;  %v749_v58 = vmul.f32 0.01, %v587_v53 }
 0x137   :  { %961 = vst.msk [vmem:[#allocation2 + $0x228] sm:$0xfe] %vm919_vm5, %v804_v57  ;;  %v802_v59 = vsel %vm690_vm9, %v576_v50, %v746_v55  ;;  %vm691_vm11 = vcmp.ge.f32.partialorder %v579_v56, 0.0  ;;  %v747_v60 = vmul.f32 0.01, %v579_v56 }
 0x138   :  { %959 = vst.msk [vmem:[#allocation2 + $0x210] sm:$0xfe] %vm919_vm5, %v802_v59  ;;  %v805_v61 = vsel %vm693_vm10, %v587_v53, %v749_v58 }
 0x139   :  { %962 = vst.msk [vmem:[#allocation2 + $0x230] sm:$0x7f] %vm921_vm7, %v805_v61  ;;  %v803_v0 = vsel %vm691_vm11, %v579_v56, %v747_v60  ;;  %v7248_v1 = vpop.f32.mrb[48].mxu0  ;;  %v1038_v2 = vld [vmem:[#allocation2 + $0x1e1] ss:$2 sm:$0xff] }
 0x13a   :  { %v1350_v3 = vld [vmem:[#allocation2 + $0x1e2] ss:$2 sm:$0xff]  ;;  %960 = vst.msk [vmem:[#allocation2 + $0x218] sm:$0x7f] %vm921_vm7, %v803_v0  ;;  %v600_v4 = vadd.f32 %v7248_v1, %v8763_v42  ;;  %v591_v5 = vpop.f32.mrb[49].mxu0  ;;  %v1051_v6 = vpack.c.bf16 %v1038_v2, %v1036_v62 }
 0x13b   :  { %v1363_v7 = vpack.c.bf16 %v1350_v3, %v1348_v63  ;;  %v592_v8 = vadd.f32 %v8763_v42, %v591_v5  ;;  %v7249_v9 = vpop.f32.mrb[50].mxu0 }
 0x13c   :  { %vm696_vm12 = vcmp.ge.f32.partialorder %v600_v4, 0.0  ;;  %v752_v10 = vmul.f32 0.01, %v600_v4  ;;  %v603_v11 = vadd.f32 %v7249_v9, %v8763_v42  ;;  %v594_v12 = vpop.f32.mrb[51].mxu0  ;;  %7287 = vmatmul.mubr.msk.bf16.gmra.mrb[80].mxu0 %vm820_vm1, %v1051_v6 }
 0x13d   :  { %7359 = vmatmul.mubr.msk.bf16.gmra.mrb[16].mxu1 %vm820_vm1, %v1363_v7  ;;  %vm694_vm13 = vcmp.ge.f32.partialorder %v592_v8, 0.0  ;;  %v750_v13 = vmul.f32 0.01, %v592_v8  ;;  %v595_v14 = vadd.f32 %v8763_v42, %v594_v12  ;;  %7290 = vmatprep.mubr.msk.bf16.mxu0 %vm8290_vm3, %v8797_v39 }
 0x13e   :  { %7362 = vmatprep.mubr.msk.bf16.mxu1 %vm8290_vm3, %v8797_v39  ;;  %v808_v15 = vsel %vm696_vm12, %v600_v4, %v752_v10  ;;  %vm697_vm14 = vcmp.ge.f32.partialorder %v603_v11, 0.0  ;;  %v753_v16 = vmul.f32 0.01, %v603_v11 }
 0x13f   :  { %965 = vst.msk [vmem:[#allocation2 + $0x258] sm:$0xfe] %vm919_vm5, %v808_v15  ;;  %v806_v17 = vsel %vm694_vm13, %v592_v8, %v750_v13  ;;  %vm695_vm15 = vcmp.ge.f32.partialorder %v595_v14, 0.0  ;;  %v751_v18 = vmul.f32 0.01, %v595_v14  ;;  %v8018_v15 = vld [vmem:[%s10659_s3 + $0x60] sm:$0xff]  }
 0x140   :  { %963 = vst.msk [vmem:[#allocation2 + $0x240] sm:$0xfe] %vm919_vm5, %v806_v17  ;;  %v809_v19 = vsel %vm697_vm14, %v603_v11, %v753_v16  ;;  %v979_v13 = vld [vmem:[#allocation2 + $0x30] ss:$2 sm:$0xff] }
 0x141   :  { %966 = vst.msk [vmem:[#allocation2 + $0x260] sm:$0x7f] %vm921_vm7, %v809_v19  ;;  %v807_v20 = vsel %vm695_vm15, %v595_v14, %v751_v18  ;;  %v7252_v21 = vpop.f32.mrb[52].mxu0  ;;  %v1040_v36 = vld [vmem:[#allocation2 + $0x211] ss:$2 sm:$0xff]  ;;  %v8021_v19 = vld [vmem:[%s10659_s3 + $0xc0] sm:$0xff]  }
 0x142   :  { %964 = vst.msk [vmem:[#allocation2 + $0x248] sm:$0x7f] %vm921_vm7, %v807_v20  ;;  %v616_v22 = vadd.f32 %v7252_v21, %v8763_v42  ;;  %v607_v23 = vpop.f32.mrb[53].mxu0  ;;  %v1352_v37 = vld [vmem:[#allocation2 + $0x212] ss:$2 sm:$0xff]  ;;  %v8019_v20 = vld [vmem:[%s10659_s3 + $0x68] sm:$0xff]  }
 0x143   :  { %v608_v24 = vadd.f32 %v8763_v42, %v607_v23  ;;  %v7253_v25 = vpop.f32.mrb[54].mxu0  ;;  %v1717_v14 = vld [vmem:[#allocation2 + $0x48] ss:$2 sm:$0xff]  ;;  %v1715_v16 = vld [vmem:[#allocation2 + $0x18] ss:$2 sm:$0xff] }
 0x144   :  { %vm700_vm0 = vcmp.ge.f32.partialorder %v616_v22, 0.0  ;;  %v756_v26 = vmul.f32 0.01, %v616_v22  ;;  %v619_v27 = vadd.f32 %v7253_v25, %v8763_v42  ;;  %v610_v28 = vpop.f32.mrb[55].mxu0  ;;  %v1742_v18 = vpack.c.bf16 %v1717_v14, %v1715_v16  ;;  %v983_v21 = vld [vmem:[#allocation2 + $0x90] ss:$2 sm:$0xff] }
 0x145   :  { %vm698_vm2 = vcmp.ge.f32.partialorder %v608_v24, 0.0  ;;  %v754_v29 = vmul.f32 0.01, %v608_v24  ;;  %v611_v30 = vadd.f32 %v8763_v42, %v610_v28  ;;  %v8023_v23 = vld [vmem:[%s10659_s3 + $0xc8] sm:$0xff]   ;;  %v1719_v25 = vld [vmem:[#allocation2 + $0x78] ss:$2 sm:$0xff] }
 0x146   :  { %v812_v31 = vsel %vm700_vm0, %v616_v22, %v756_v26  ;;  %vm701_vm4 = vcmp.ge.f32.partialorder %v619_v27, 0.0  ;;  %v757_v32 = vmul.f32 0.01, %v619_v27  ;;  %v1721_v22 = vld [vmem:[#allocation2 + $0xa8] ss:$2 sm:$0xff] }
 0x147   :  { %969 = vst.msk [vmem:[#allocation2 + $0x288] sm:$0xfe] %vm919_vm5, %v812_v31  ;;  %v810_v33 = vsel %vm698_vm2, %v608_v24, %v754_v29  ;;  %vm699_vm6 = vcmp.ge.f32.partialorder %v611_v30, 0.0  ;;  %v755_v34 = vmul.f32 0.01, %v611_v30  ;;  %v8020_v28 = vld [vmem:[%s10659_s3 + $0x70] sm:$0xff]  }
 0x148   :  { %967 = vst.msk [vmem:[#allocation2 + $0x270] sm:$0xfe] %vm919_vm5, %v810_v33  ;;  %v813_v35 = vsel %vm701_vm4, %v619_v27, %v757_v32  ;;  %v981_v24 = vld [vmem:[#allocation2 + $0x60] ss:$2 sm:$0xff]  ;;  %v1743_v27 = vpack.c.bf16 %v1721_v22, %v1719_v25  ;;  %v8024_v29 = vld [vmem:[%s10659_s3 + $0xd0] sm:$0xff]   ;;  %v8025_v33 = vld [vmem:[%s10659_s3 + $0xd8] sm:$0xff]  }
 0x149   :  { %970 = vst.msk [vmem:[#allocation2 + $0x290] sm:$0x7f] %vm921_vm7, %v813_v35  ;;  %v811_v38 = vsel %vm699_vm6, %v611_v30, %v755_v34  ;;  %v7256_v40 = vpop.f32.mrb[56].mxu0  ;;  %v1042_v41 = vld [vmem:[#allocation2 + $0x241] ss:$2 sm:$0xff]  ;;  %v1005_v26 = vpack.c.bf16 %v983_v21, %v981_v24  ;;  %v8022_v30 = vld [vmem:[%s10659_s3 + $0x78] sm:$0xff]  }
 0x14a   :  { %v1354_v43 = vld [vmem:[#allocation2 + $0x242] ss:$2 sm:$0xff]  ;;  %968 = vst.msk [vmem:[#allocation2 + $0x278] sm:$0x7f] %vm921_vm7, %v811_v38  ;;  %v632_v44 = vadd.f32 %v7256_v40, %v8763_v42  ;;  %v623_v45 = vpop.f32.mrb[57].mxu0  ;;  %v1052_v46 = vpack.c.bf16 %v1042_v41, %v1040_v36 }
 0x14b   :  { %v1364_v47 = vpack.c.bf16 %v1354_v43, %v1352_v37  ;;  %v624_v48 = vadd.f32 %v8763_v42, %v623_v45  ;;  %v7257_v49 = vpop.f32.mrb[58].mxu0  ;;  %v987_v31 = vld [vmem:[#allocation2 + $0xf0] ss:$2 sm:$0xff]  ;;  %v985_v34 = vld [vmem:[#allocation2 + $0xc0] ss:$2 sm:$0xff] }
 0x14c   :  { %vm704_vm8 = vcmp.ge.f32.partialorder %v632_v44, 0.0  ;;  %v760_v50 = vmul.f32 0.01, %v632_v44  ;;  %v635_v51 = vadd.f32 %v7257_v49, %v8763_v42  ;;  %v626_v52 = vpop.f32.mrb[59].mxu0  ;;  %7291 = vmatmul.mubr.msk.bf16.gmra.mrb[84].mxu0 %vm820_vm1, %v1052_v46  ;;  %v1725_v32 = vld [vmem:[#allocation2 + $0x108] ss:$2 sm:$0xff]  ;;  %v1006_v36 = vpack.c.bf16 %v987_v31, %v985_v34 }
 0x14d   :  { %7363 = vmatmul.mubr.msk.bf16.gmra.mrb[20].mxu1 %vm820_vm1, %v1364_v47  ;;  %vm702_vm9 = vcmp.ge.f32.partialorder %v624_v48, 0.0  ;;  %v758_v53 = vmul.f32 0.01, %v624_v48  ;;  %v627_v54 = vadd.f32 %v8763_v42, %v626_v52  ;;  %7294 = vmatprep.mubr.msk.bf16.mxu0 %vm8290_vm3, %v8797_v39  ;;  %v1723_v35 = vld [vmem:[#allocation2 + $0xd8] ss:$2 sm:$0xff]  ;;  %v8032_v16 = vld [vmem:[%s10659_s3 + $0x110] sm:$0xff]  }
 0x14e   :  { %7366 = vmatprep.mubr.msk.bf16.mxu1 %vm8290_vm3, %v8797_v39  ;;  %v816_v55 = vsel %vm704_vm8, %v632_v44, %v760_v50  ;;  %vm705_vm10 = vcmp.ge.f32.partialorder %v635_v51, 0.0  ;;  %v761_v56 = vmul.f32 0.01, %v635_v51  ;;  %v1744_v37 = vpack.c.bf16 %v1725_v32, %v1723_v35  ;;  %v989_v38 = vld [vmem:[#allocation2 + $0x120] ss:$2 sm:$0xff] }
 0x14f   :  { %973 = vst.msk [vmem:[#allocation2 + $0x2b8] sm:$0xfe] %vm919_vm5, %v816_v55  ;;  %v814_v57 = vsel %vm702_vm9, %v624_v48, %v758_v53  ;;  %vm703_vm11 = vcmp.ge.f32.partialorder %v627_v54, 0.0  ;;  %v759_v58 = vmul.f32 0.01, %v627_v54 }
 0x150   :  { %971 = vst.msk [vmem:[#allocation2 + $0x2a0] sm:$0xfe] %vm919_vm5, %v814_v57  ;;  %v817_v59 = vsel %vm705_vm10, %v635_v51, %v761_v56  ;;  %v991_v40 = vld [vmem:[#allocation2 + $0x180] ss:$2 sm:$0xff]  ;;  %v993_v48 = vld [vmem:[#allocation2 + $0x1b0] ss:$2 sm:$0xff] }
 0x151   :  { %974 = vst.msk [vmem:[#allocation2 + $0x2c0] sm:$0x7f] %vm921_vm7, %v817_v59  ;;  %v815_v60 = vsel %vm703_vm11, %v627_v54, %v759_v58  ;;  %v7260_v61 = vpop.f32.mrb[60].mxu0  ;;  %v1044_v6 = vld [vmem:[#allocation2 + $0x271] ss:$2 sm:$0xff]  ;;  %v1007_v44 = vpack.c.bf16 %v991_v40, %v989_v38 }
 0x152   :  { %972 = vst.msk [vmem:[#allocation2 + $0x2a8] sm:$0x7f] %vm921_vm7, %v815_v60  ;;  %v639_v62 = vpop.f32.mrb[61].mxu0  ;;  %v1356_v9 = vld [vmem:[#allocation2 + $0x272] ss:$2 sm:$0xff] }
 0x153   :  { %v640_v63 = vadd.f32 %v8763_v42, %v639_v62  ;;  %v7261_v0 = vpop.f32.mrb[62].mxu0  ;;  %v1729_v41 = vld [vmem:[#allocation2 + $0x198] ss:$2 sm:$0xff]  ;;  %v1731_v49 = vld [vmem:[#allocation2 + $0x1c8] ss:$2 sm:$0xff] }
 0x154   :  { %v642_v1 = vpop.f32.mrb[63].mxu0  ;;  %v1727_v43 = vld [vmem:[#allocation2 + $0x138] ss:$2 sm:$0xff]  ;;  %v1735_v55 = vld [vmem:[#allocation2 + $0x228] ss:$2 sm:$0xff] }
 0x155   :  { %vm706_vm12 = vcmp.ge.f32.partialorder %v640_v63, 0.0  ;;  %v762_v2 = vmul.f32 0.01, %v640_v63  ;;  %v643_v3 = vadd.f32 %v8763_v42, %v642_v1  ;;  %v977_v42 = vld [vmem:[#allocation2] ss:$2 sm:$0xff]  ;;  %v1745_v45 = vpack.c.bf16 %v1729_v41, %v1727_v43 }
 0x156   :  { %v1004_v17 = vpack.c.bf16 %v979_v13, %v977_v42  ;;  %v995_v46 = vld [vmem:[#allocation2 + $0x1e0] ss:$2 sm:$0xff]  ;;  %v997_v54 = vld [vmem:[#allocation2 + $0x210] ss:$2 sm:$0xff]  ;;  %v1524_v0 = vld [vmem:[#allocation2 + $0x3] ss:$2 sm:$0xff] }
 0x157   :  { %v818_v4 = vsel %vm706_vm12, %v640_v63, %v762_v2  ;;  %vm707_vm13 = vcmp.ge.f32.partialorder %v643_v3, 0.0  ;;  %v763_v5 = vmul.f32 0.01, %v643_v3  ;;  %v1733_v47 = vld [vmem:[#allocation2 + $0x1f8] ss:$2 sm:$0xff]  ;;  %v1008_v50 = vpack.c.bf16 %v995_v46, %v993_v48 }
 0x158   :  { %975 = vst.msk [vmem:[#allocation2 + $0x2d0] sm:$0xfe] %vm919_vm5, %v818_v4  ;;  %v1746_v51 = vpack.c.bf16 %v1733_v47, %v1731_v49  ;;  %v999_v52 = vld [vmem:[#allocation2 + $0x240] ss:$2 sm:$0xff]  ;;  %v1001_v60 = vld [vmem:[#allocation2 + $0x270] ss:$2 sm:$0xff] }
 0x159   :  { %v819_v7 = vsel %vm707_vm13, %v643_v3, %v763_v5  ;;  %v1046_v8 = vld [vmem:[#allocation2 + $0x2a1] ss:$2 sm:$0xff]  ;;  %v1358_v10 = vld [vmem:[#allocation2 + $0x2a2] ss:$2 sm:$0xff]  ;;  %v1009_v56 = vpack.c.bf16 %v999_v52, %v997_v54 }
 0x15a   :  { %976 = vst.msk [vmem:[#allocation2 + $0x2d8] sm:$0x7f] %vm921_vm7, %v819_v7  ;;  %v1053_v11 = vpack.c.bf16 %v1046_v8, %v1044_v6  ;;  %v1365_v12 = vpack.c.bf16 %v1358_v10, %v1356_v9  ;;  %v1737_v53 = vld [vmem:[#allocation2 + $0x258] ss:$2 sm:$0xff]  ;;  %v1739_v61 = vld [vmem:[#allocation2 + $0x288] ss:$2 sm:$0xff] }
 0x15b   :  { %v1747_v57 = vpack.c.bf16 %v1737_v53, %v1735_v55  ;;  %v1003_v58 = vld [vmem:[#allocation2 + $0x2a0] ss:$2 sm:$0xff]  ;;  %v1526_v1 = vld [vmem:[#allocation2 + $0x33] ss:$2 sm:$0xff]  ;;  %v1532_v21 = vld [vmem:[#allocation2 + $0xc3] ss:$2 sm:$0xff] }
 0x15c   :  { %7295 = vmatmul.mubr.msk.bf16.gmra.mrb[88].mxu0 %vm820_vm1, %v1053_v11  ;;  %7367 = vmatmul.mubr.msk.bf16.gmra.mrb[24].mxu1 %vm820_vm1, %v1365_v12  ;;  %v1741_v59 = vld [vmem:[#allocation2 + $0x2b8] ss:$2 sm:$0xff]  ;;  %v1010_v62 = vpack.c.bf16 %v1003_v58, %v1001_v60  ;;  %v1551_v5 = vpack.c.bf16 %v1526_v1, %v1524_v0  ;;  %v8027_v8 = vld [vmem:[%s10659_s3 + $0xa8] sm:$0xff]   ;;  %v1530_v9 = vld [vmem:[#allocation2 + $0x93] ss:$2 sm:$0xff] }
 0x15d   :  { %7306 = vmatprep.mubr.msk.bf16.mxu0 %vm8290_vm3, %v8797_v39  ;;  %7414 = vmatprep.mubr.msk.bf16.mxu1 %vm8290_vm3, %v8797_v39  ;;  %v1748_v63 = vpack.c.bf16 %v1741_v59, %v1739_v61  ;;  %v2101_v2 = vld [vmem:[#allocation2 + $0x4a] ss:$2 sm:$0xff]  ;;  %v8026_v3 = vld [vmem:[%s10659_s3 + $0xa0] sm:$0xff]   ;;  %v1909_v59 = vld [vmem:[#allocation2 + $0x49] ss:$2 sm:$0xff] }
 0x15e   :  { %v2099_v4 = vld [vmem:[#allocation2 + $0x1a] ss:$2 sm:$0xff]  ;;  %v2105_v10 = vld [vmem:[#allocation2 + $0xaa] ss:$2 sm:$0xff]  ;;  %v1528_v12 = vld [vmem:[#allocation2 + $0x63] ss:$2 sm:$0xff] }
 0x15f   :  { %v2126_v6 = vpack.c.bf16 %v2101_v2, %v2099_v4  ;;  %v8029_v7 = vld [vmem:[%s10659_s3 + $0x100] sm:$0xff]   ;;  %v8031_v11 = vld [vmem:[%s10659_s3 + $0x108] sm:$0xff]   ;;  %v1552_v13 = vpack.c.bf16 %v1530_v9, %v1528_v12 }
 0x160   :  { %v2103_v42 = vld [vmem:[#allocation2 + $0x7a] ss:$2 sm:$0xff]  ;;  %v1536_v25 = vld [vmem:[#allocation2 + $0x123] ss:$2 sm:$0xff]  ;;  %v2115_v34 = vld [vmem:[#allocation2 + $0x1ca] ss:$2 sm:$0xff] }
 0x161   :  { %v2127_v14 = vpack.c.bf16 %v2105_v10, %v2103_v42  ;;  %v2107_v22 = vld [vmem:[#allocation2 + $0xda] ss:$2 sm:$0xff]  ;;  %v1542_v31 = vld [vmem:[#allocation2 + $0x1e3] ss:$2 sm:$0xff]  ;;  %v1544_v40 = vld [vmem:[#allocation2 + $0x213] ss:$2 sm:$0xff] }
 0x162   :  { %v2117_v32 = vld [vmem:[#allocation2 + $0x1fa] ss:$2 sm:$0xff]  ;;  %v1546_v38 = vld [vmem:[#allocation2 + $0x243] ss:$2 sm:$0xff]  ;;  %v2119_v41 = vld [vmem:[#allocation2 + $0x22a] ss:$2 sm:$0xff] }
 0x163   :  { %v1556_v43 = vpack.c.bf16 %v1546_v38, %v1544_v40  ;;  %v1550_v47 = vld [vmem:[#allocation2 + $0x2a3] ss:$2 sm:$0xff]  ;;  %v2125_v48 = vld [vmem:[#allocation2 + $0x2ba] ss:$2 sm:$0xff]  ;;  %v1548_v53 = vld [vmem:[#allocation2 + $0x273] ss:$2 sm:$0xff] }
 0x164   :  { %7307 = vmatmul.mubr.msk.bf16.vlgmr.msra.gmra.mrb[92].mxu0 %vm820_vm1, %v1004_v17  ;;  %7415 = vmatmul.mubr.msk.bf16.vlgmr.msra.gmra.mrb[28].mxu1 %vm820_vm1, %v1742_v18  ;;  %v8030_v17 = vld [vmem:[%s10659_s3 + $0xb8] sm:$0xff]   ;;  %v2485_v60 = vld [vmem:[#allocation2 + $0x60] ss:$2 sm:$0xff]  ;;  %v1913_v4 = vld [vmem:[#allocation2 + $0xa9] ss:$2 sm:$0xff] }
 0x165   :  { %7371 = vmatpush3.bf16.msra.mxu0 %v8018_v15  ;;  %7310 = vmatprep.mubr.msk.bf16.mxu0 %vm8290_vm3, %v8797_v39  ;;  %v8028_v15 = vld [vmem:[%s10659_s3 + $0xb0] sm:$0xff]   ;;  %v1907_v61 = vld [vmem:[#allocation2 + $0x19] ss:$2 sm:$0xff] }
 0x166   :  { %7418 = vmatprep.mubr.msk.bf16.mxu1 %vm8290_vm3, %v8797_v39  ;;  %7372 = vmatprep.subr.bf16.mxu0 %v8797_v39  ;;  %v1534_v18 = vld [vmem:[#allocation2 + $0xf3] ss:$2 sm:$0xff]  ;;  %v2123_v54 = vld [vmem:[#allocation2 + $0x28a] ss:$2 sm:$0xff]  ;;  %v1934_v0 = vpack.c.bf16 %v1909_v59, %v1907_v61 }
 0x167   :  { %7479 = vmatpush3.bf16.msra.mxu1 %v8021_v19  ;;  %v2109_v19 = vld [vmem:[#allocation2 + $0x10a] ss:$2 sm:$0xff]  ;;  %v2132_v58 = vpack.c.bf16 %v2125_v48, %v2123_v54  ;;  %v8037_v2 = vld [vmem:[%s10659_s3 + $0x140] sm:$0xff]  }
 0x168   :  { %7480 = vmatprep.subr.bf16.mxu1 %v8797_v39  ;;  %v2128_v24 = vpack.c.bf16 %v2109_v19, %v2107_v22  ;;  %v1911_v42 = vld [vmem:[#allocation2 + $0x79] ss:$2 sm:$0xff]  ;;  %v8040_v19 = vld [vmem:[%s10659_s3 + $0x150] sm:$0xff]   ;;  %v2493_v22 = vld [vmem:[#allocation2 + $0x120] ss:$2 sm:$0xff] }
 0x169   :  { %7373 = vmatpush3.bf16.msra.mxu0 %v8019_v20  ;;  %v8033_v20 = vld [vmem:[%s10659_s3 + $0x118] sm:$0xff]  }
 0x16a   :  { %7374 = vmatprep.subr.bf16.mxu0 %v8797_v39  ;;  %v2495_v38 = vld [vmem:[#allocation2 + $0x150] ss:$2 sm:$0xff]  ;;  %v1925_v48 = vld [vmem:[#allocation2 + $0x1f9] ss:$2 sm:$0xff] }
 0x16b   :  { %7481 = vmatpush3.bf16.msra.mxu1 %v8023_v23  ;;  %v1553_v23 = vpack.c.bf16 %v1534_v18, %v1532_v21  ;;  %v8036_v18 = vld [vmem:[%s10659_s3 + $0xf0] sm:$0xff]  }
 0x16c   :  { %7311 = vmatmul.mubr.msk.bf16.gmra.mrb[96].mxu0 %vm820_vm1, %v1005_v26  ;;  %7419 = vmatmul.mubr.msk.bf16.gmra.mrb[32].mxu1 %vm820_vm1, %v1743_v27  ;;  %v1538_v26 = vld [vmem:[#allocation2 + $0x183] ss:$2 sm:$0xff]  ;;  %v2113_v27 = vld [vmem:[#allocation2 + $0x19a] ss:$2 sm:$0xff] }
 0x16d   :  { %7314 = vmatprep.mubr.msk.bf16.mxu0 %vm8290_vm3, %v8797_v39  ;;  %7422 = vmatprep.mubr.msk.bf16.mxu1 %vm8290_vm3, %v8797_v39  ;;  %v1917_v21 = vld [vmem:[#allocation2 + $0x109] ss:$2 sm:$0xff] }
 0x16e   :  { %7375 = vmatpush3.bf16.msra.mxu0 %v8020_v28  ;;  %7482 = vmatprep.subr.bf16.mxu1 %v8797_v39  ;;  %v2111_v28 = vld [vmem:[#allocation2 + $0x13a] ss:$2 sm:$0xff] }
 0x16f   :  { %7376 = vmatprep.subr.bf16.mxu0 %v8797_v39  ;;  %7483 = vmatpush3.bf16.msra.mxu1 %v8024_v29  ;;  %v1554_v29 = vpack.c.bf16 %v1538_v26, %v1536_v25  ;;  %v2491_v25 = vld [vmem:[#allocation2 + $0xf0] ss:$2 sm:$0xff] }
 0x170   :  { %7484 = vmatprep.subr.bf16.mxu1 %v8797_v39 }
 0x172   :  { %7377 = vmatpush3.bf16.msra.mxu0 %v8022_v30  ;;  %v2129_v30 = vpack.c.bf16 %v2113_v27, %v2111_v28  ;;  %v2512_v27 = vpack.c.bf16 %v2493_v22, %v2491_v25  ;;  %v2297_v22 = vld [vmem:[#allocation2 + $0xab] ss:$2 sm:$0xff]  ;;  %v2873_v25 = vld [vmem:[#allocation2 + $0xc2] ss:$2 sm:$0xff] }
 0x173   :  { %7485 = vmatpush3.bf16.msra.mxu1 %v8025_v33  ;;  %7442 = vmatprep.subr.bf16.mxu0 %v8797_v39  ;;  %v1540_v33 = vld [vmem:[#allocation2 + $0x1b3] ss:$2 sm:$0xff] }
 0x174   :  { %7315 = vmatmul.mubr.msk.bf16.gmra.mrb[100].mxu0 %vm820_vm1, %v1006_v36  ;;  %7423 = vmatmul.mubr.msk.bf16.gmra.mrb[36].mxu1 %vm820_vm1, %v1744_v37  ;;  %v1555_v35 = vpack.c.bf16 %v1542_v31, %v1540_v33  ;;  %v2130_v36 = vpack.c.bf16 %v2117_v32, %v2115_v34  ;;  %v9085_v37 = vld [vmem:[#allocation3] sm:$0xff]  ;;  %v2497_v31 = vld [vmem:[#allocation2 + $0x1b0] ss:$2 sm:$0xff] }
 0x175   :  { %7318 = vmatprep.mubr.msk.bf16.mxu0 %vm8290_vm3, %v8797_v39  ;;  %7426 = vmatprep.mubr.msk.bf16.mxu1 %vm8290_vm3, %v8797_v39 }
 0x176   :  { %7550 = vmatprep.subr.bf16.mxu1 %v8797_v39 }
 0x17c   :  { %7319 = vmatmul.mubr.msk.bf16.gmra.mrb[104].mxu0 %vm820_vm1, %v1007_v44  ;;  %7427 = vmatmul.mubr.msk.bf16.gmra.mrb[40].mxu1 %vm820_vm1, %v1745_v45 }
 0x17d   :  { %7322 = vmatprep.mubr.msk.bf16.mxu0 %vm8290_vm3, %v8797_v39  ;;  %7430 = vmatprep.mubr.msk.bf16.mxu1 %vm8290_vm3, %v8797_v39 }
 0x184   :  { %7323 = vmatmul.mubr.msk.bf16.gmra.mrb[108].mxu0 %vm820_vm1, %v1008_v50  ;;  %7431 = vmatmul.mubr.msk.bf16.gmra.mrb[44].mxu1 %vm820_vm1, %v1746_v51 }
 0x185   :  { %7326 = vmatprep.mubr.msk.bf16.mxu0 %vm8290_vm3, %v8797_v39  ;;  %7434 = vmatprep.mubr.msk.bf16.mxu1 %vm8290_vm3, %v8797_v39 }
 0x18c   :  { %7327 = vmatmul.mubr.msk.bf16.gmra.mrb[112].mxu0 %vm820_vm1, %v1009_v56  ;;  %7435 = vmatmul.mubr.msk.bf16.gmra.mrb[48].mxu1 %vm820_vm1, %v1747_v57  ;;  %v1557_v57 = vpack.c.bf16 %v1550_v47, %v1548_v53 }
 0x18d   :  { %7330 = vmatprep.mubr.msk.bf16.mxu0 %vm8290_vm3, %v8797_v39  ;;  %7438 = vmatprep.mubr.msk.bf16.mxu1 %vm8290_vm3, %v8797_v39 }
 0x194   :  { %7331 = vmatmul.mubr.msk.bf16.gmra.mrb[116].mxu0 %vm820_vm1, %v1010_v62  ;;  %7439 = vmatmul.mubr.msk.bf16.gmra.mrb[52].mxu1 %vm820_vm1, %v1748_v63  ;;  %v8034_v62 = vld [vmem:[%s10659_s3 + $0xe0] sm:$0xff]   ;;  %v2483_v63 = vld [vmem:[#allocation2 + $0x30] ss:$2 sm:$0xff] }
 0x195   :  { %7378 = vmatprep.mubr.msk.bf16.mxu0 %vm8290_vm3, %v8797_v39  ;;  %7486 = vmatprep.mubr.msk.bf16.mxu1 %vm8290_vm3, %v8797_v39  ;;  %v2510_v1 = vpack.c.bf16 %v2485_v60, %v2483_v63  ;;  %v2505_v63 = vld [vmem:[#allocation2 + $0x270] ss:$2 sm:$0xff] }
 0x19c   :  { %7379 = vmatmul.mubr.msk.bf16.vlgmr.msra.gmra.mrb[120].mxu0 %vm820_vm1, %v1551_v5  ;;  %7487 = vmatmul.mubr.msk.bf16.vlgmr.msra.gmra.mrb[56].mxu1 %vm820_vm1, %v2126_v6 }
 0x19d   :  { %7443 = vmatpush3.bf16.msra.mxu0 %v8026_v3  ;;  %7382 = vmatprep.mubr.msk.bf16.mxu0 %vm8290_vm3, %v8797_v39  ;;  %v8035_v3 = vld [vmem:[%s10659_s3 + $0xe8] sm:$0xff]  }
 0x19e   :  { %7490 = vmatprep.mubr.msk.bf16.mxu1 %vm8290_vm3, %v8797_v39  ;;  %7444 = vmatprep.subr.bf16.mxu0 %v8797_v39 }
 0x19f   :  { %7551 = vmatpush3.bf16.msra.mxu1 %v8029_v7  ;;  %v2489_v7 = vld [vmem:[#allocation2 + $0xc0] ss:$2 sm:$0xff] }
 0x1a0   :  { %7552 = vmatprep.subr.bf16.mxu1 %v8797_v39 }
 0x1a1   :  { %7445 = vmatpush3.bf16.msra.mxu0 %v8027_v8  ;;  %v8039_v8 = vld [vmem:[%s10659_s3 + $0x148] sm:$0xff]  }
 0x1a2   :  { %7446 = vmatprep.subr.bf16.mxu0 %v8797_v39 }
 0x1a3   :  { %7553 = vmatpush3.bf16.msra.mxu1 %v8031_v11 }
 0x1a4   :  { %7383 = vmatmul.mubr.msk.bf16.gmra.mrb[124].mxu0 %vm820_vm1, %v1552_v13  ;;  %7491 = vmatmul.mubr.msk.bf16.gmra.mrb[60].mxu1 %vm820_vm1, %v2127_v14  ;;  %v2487_v13 = vld [vmem:[#allocation2 + $0x90] ss:$2 sm:$0xff] }
 0x1a5   :  { %7386 = vmatprep.mubr.msk.bf16.mxu0 %vm8290_vm3, %v8797_v39  ;;  %7494 = vmatprep.mubr.msk.bf16.mxu1 %vm8290_vm3, %v8797_v39 }
 0x1a6   :  { %7447 = vmatpush3.bf16.msra.mxu0 %v8028_v15  ;;  %7554 = vmatprep.subr.bf16.mxu1 %v8797_v39 }
 0x1a7   :  { %7448 = vmatprep.subr.bf16.mxu0 %v8797_v39  ;;  %7555 = vmatpush3.bf16.msra.mxu1 %v8032_v16  ;;  %v1935_v16 = vpack.c.bf16 %v1913_v4, %v1911_v42  ;;  %v1933_v4 = vld [vmem:[#allocation2 + $0x2b9] ss:$2 sm:$0xff] }
 0x1a8   :  { %7556 = vmatprep.subr.bf16.mxu1 %v8797_v39 }
 0x1aa   :  { %7449 = vmatpush3.bf16.msra.mxu0 %v8030_v17  ;;  %v2511_v17 = vpack.c.bf16 %v2489_v7, %v2487_v13  ;;  %v2509_v7 = vld [vmem:[#allocation2 + $0x2d0] ss:$2 sm:$0xff]  ;;  %v2293_v13 = vld [vmem:[#allocation2 + $0x4b] ss:$2 sm:$0xff] }
 0x1ab   :  { %7557 = vmatpush3.bf16.msra.mxu1 %v8033_v20  ;;  %7514 = vmatprep.subr.bf16.mxu0 %v8797_v39  ;;  %v8038_v20 = vld [vmem:[%s10659_s3 + $0xf8] sm:$0xff]  }
 0x1ac   :  { %7387 = vmatmul.mubr.msk.bf16.gmra.mrb[128].mxu0 %vm820_vm1, %v1553_v23  ;;  %7495 = vmatmul.mubr.msk.bf16.gmra.mrb[64].mxu1 %vm820_vm1, %v2128_v24  ;;  %v8041_v23 = vld [vmem:[%s10659_s3 + $0x158] sm:$0xff]  }
 0x1ad   :  { %7390 = vmatprep.mubr.msk.bf16.mxu0 %vm8290_vm3, %v8797_v39  ;;  %7498 = vmatprep.mubr.msk.bf16.mxu1 %vm8290_vm3, %v8797_v39  ;;  %v1915_v24 = vld [vmem:[#allocation2 + $0xd9] ss:$2 sm:$0xff] }
 0x1ae   :  { %7622 = vmatprep.subr.bf16.mxu1 %v8797_v39  ;;  %v1936_v26 = vpack.c.bf16 %v1917_v21, %v1915_v24  ;;  %v8043_v21 = vld [vmem:[%s10659_s3 + $0x128] sm:$0xff]  }
 0x1b4   :  { %7391 = vmatmul.mubr.msk.bf16.gmra.mrb[132].mxu0 %vm820_vm1, %v1554_v29  ;;  %7499 = vmatmul.mubr.msk.bf16.gmra.mrb[68].mxu1 %vm820_vm1, %v2129_v30  ;;  %v1921_v30 = vld [vmem:[#allocation2 + $0x199] ss:$2 sm:$0xff] }
 0x1b5   :  { %7394 = vmatprep.mubr.msk.bf16.mxu0 %vm8290_vm3, %v8797_v39  ;;  %7502 = vmatprep.mubr.msk.bf16.mxu1 %vm8290_vm3, %v8797_v39  ;;  %v2121_v39 = vld [vmem:[#allocation2 + $0x25a] ss:$2 sm:$0xff] }
 0x1b6   :  { %v2131_v44 = vpack.c.bf16 %v2121_v39, %v2119_v41 }
 0x1bc   :  { %7395 = vmatmul.mubr.msk.bf16.gmra.mrb[136].mxu0 %vm820_vm1, %v1555_v35  ;;  %7503 = vmatmul.mubr.msk.bf16.gmra.mrb[72].mxu1 %vm820_vm1, %v2130_v36  ;;  %v1919_v36 = vld [vmem:[#allocation2 + $0x139] ss:$2 sm:$0xff] }
 0x1bd   :  { %7398 = vmatprep.mubr.msk.bf16.mxu0 %vm8290_vm3, %v9085_v37  ;;  %7506 = vmatprep.mubr.msk.bf16.mxu1 %vm8290_vm3, %v9085_v37  ;;  %v1937_v41 = vpack.c.bf16 %v1921_v30, %v1919_v36  ;;  %v2871_v36 = vld [vmem:[#allocation2 + $0x92] ss:$2 sm:$0xff] }
 0x1c4   :  { %7399 = vmatmul.mubr.msk.bf16.gmra.mrb[140].mxu0 %vm820_vm1, %v1556_v43  ;;  %7507 = vmatmul.mubr.msk.bf16.gmra.mrb[76].mxu1 %vm820_vm1, %v2131_v44  ;;  %v2513_v43 = vpack.c.bf16 %v2497_v31, %v2495_v38 }
 0x1c5   :  { %7402 = vmatprep.mubr.msk.bf16.mxu0 %vm8290_vm3, %v9085_v37  ;;  %7510 = vmatprep.mubr.msk.bf16.mxu1 %vm8290_vm3, %v9085_v37 }
 0x1c7   :  { %v9097_v45 = vpop.f32.mrb[64].mxu0 }
 0x1c8   :  { %v9099_v46 = vpop.f32.mrb[0].mxu1  ;;  %v7272_v49 = vpop.f32.mrb[65].mxu0 }
 0x1c9   :  { %v7344_v50 = vpop.f32.mrb[1].mxu1  ;;  %v9101_v51 = vpop.f32.mrb[66].mxu0  ;;  %v2501_v49 = vld [vmem:[#allocation2 + $0x210] ss:$2 sm:$0xff] }
 0x1ca   :  { %v9103_v52 = vpop.f32.mrb[2].mxu1  ;;  %v7273_v55 = vpop.f32.mrb[67].mxu0 }
 0x1cb   :  { %v7345_v56 = vpop.f32.mrb[3].mxu1 }
 0x1cc   :  { %7403 = vmatmul.mubr.msk.bf16.gmra.mrb[144].mxu0 %vm820_vm1, %v1557_v57  ;;  %7511 = vmatmul.mubr.msk.bf16.gmra.mrb[80].mxu1 %vm820_vm1, %v2132_v58  ;;  %v1923_v56 = vld [vmem:[#allocation2 + $0x1c9] ss:$2 sm:$0xff]  ;;  %v2499_v57 = vld [vmem:[#allocation2 + $0x1e0] ss:$2 sm:$0xff] }
 0x1cd   :  { %7450 = vmatprep.mubr.msk.bf16.mxu0 %vm8290_vm3, %v9085_v37  ;;  %7558 = vmatprep.mubr.msk.bf16.mxu1 %vm8290_vm3, %v9085_v37  ;;  %v1938_v60 = vpack.c.bf16 %v1925_v48, %v1923_v56  ;;  %v2514_v61 = vpack.c.bf16 %v2501_v49, %v2499_v57  ;;  %v8048_v48 = vld [vmem:[%s10659_s3 + $0x190] sm:$0xff]   ;;  %v8046_v49 = vld [vmem:[%s10659_s3 + $0x138] sm:$0xff]  }
 0x1ce   :  { %v8049_v56 = vld [vmem:[%s10659_s3 + $0x198] sm:$0xff]  }
 0x1cf   :  { %v2299_v57 = vld [vmem:[#allocation2 + $0xdb] ss:$2 sm:$0xff] }
 0x1d4   :  { %7451 = vmatmul.mubr.msk.bf16.vlgmr.msra.gmra.mrb[148].mxu0 %vm820_vm1, %v1934_v0  ;;  %7559 = vmatmul.mubr.msk.bf16.vlgmr.msra.gmra.mrb[84].mxu1 %vm820_vm1, %v2510_v1  ;;  %v1927_v0 = vld [vmem:[#allocation2 + $0x229] ss:$2 sm:$0xff]  ;;  %v2503_v1 = vld [vmem:[#allocation2 + $0x240] ss:$2 sm:$0xff] }
 0x1d5   :  { %7515 = vmatpush3.bf16.msra.mxu0 %v8034_v62  ;;  %7454 = vmatprep.mubr.msk.bf16.mxu0 %vm8290_vm3, %v9085_v37  ;;  %v1929_v62 = vld [vmem:[#allocation2 + $0x259] ss:$2 sm:$0xff] }
 0x1d6   :  { %7562 = vmatprep.mubr.msk.bf16.mxu1 %vm8290_vm3, %v9085_v37  ;;  %7516 = vmatprep.subr.bf16.mxu0 %v9085_v37 }
 0x1d7   :  { %v9127_v5 = vpop.f32.mrb[68].mxu0  ;;  %7623 = vmatpush3.bf16.msra.mxu1 %v8037_v2  ;;  %v1939_v2 = vpack.c.bf16 %v1929_v62, %v1927_v0  ;;  %v2881_v0 = vld [vmem:[#allocation2 + $0x1b2] ss:$2 sm:$0xff] }
 0x1d8   :  { %v9129_v6 = vpop.f32.mrb[4].mxu1  ;;  %v7276_v9 = vpop.f32.mrb[69].mxu0  ;;  %7624 = vmatprep.subr.bf16.mxu1 %v9085_v37 }
 0x1d9   :  { %v7348_v10 = vpop.f32.mrb[5].mxu1  ;;  %v9135_v11 = vpop.f32.mrb[70].mxu0  ;;  %7517 = vmatpush3.bf16.msra.mxu0 %v8035_v3  ;;  %v2515_v3 = vpack.c.bf16 %v2505_v63, %v2503_v1  ;;  %v2507_v9 = vld [vmem:[#allocation2 + $0x2a0] ss:$2 sm:$0xff]  ;;  %v2305_v63 = vld [vmem:[#allocation2 + $0x19b] ss:$2 sm:$0xff] }
 0x1da   :  { %v9137_v12 = vpop.f32.mrb[6].mxu1  ;;  %v7277_v14 = vpop.f32.mrb[71].mxu0  ;;  %7518 = vmatprep.subr.bf16.mxu0 %v9085_v37  ;;  %v2516_v42 = vpack.c.bf16 %v2509_v7, %v2507_v9  ;;  %v2303_v7 = vld [vmem:[#allocation2 + $0x13b] ss:$2 sm:$0xff] }
 0x1db   :  { %v7349_v15 = vpop.f32.mrb[7].mxu1  ;;  %7625 = vmatpush3.bf16.msra.mxu1 %v8039_v8  ;;  %v1931_v8 = vld [vmem:[#allocation2 + $0x289] ss:$2 sm:$0xff]  ;;  %v2869_v14 = vld [vmem:[#allocation2 + $0x62] ss:$2 sm:$0xff] }
 0x1dc   :  { %7455 = vmatmul.mubr.msk.bf16.gmra.mrb[152].mxu0 %vm820_vm1, %v1935_v16  ;;  %7563 = vmatmul.mubr.msk.bf16.gmra.mrb[88].mxu1 %vm820_vm1, %v2511_v17  ;;  %v1940_v10 = vpack.c.bf16 %v1933_v4, %v1931_v8  ;;  %v2291_v15 = vld [vmem:[#allocation2 + $0x1b] ss:$2 sm:$0xff]  ;;  %v2867_v17 = vld [vmem:[#allocation2 + $0x32] ss:$2 sm:$0xff] }
 0x1dd   :  { %7458 = vmatprep.mubr.msk.bf16.mxu0 %vm8290_vm3, %v9085_v37  ;;  %7566 = vmatprep.mubr.msk.bf16.mxu1 %vm8290_vm3, %v9085_v37  ;;  %v8042_v16 = vld [vmem:[%s10659_s3 + $0x120] sm:$0xff]  }
 0x1de   :  { %7519 = vmatpush3.bf16.msra.mxu0 %v8036_v18  ;;  %7626 = vmatprep.subr.bf16.mxu1 %v9085_v37  ;;  %v2318_v18 = vpack.c.bf16 %v2293_v13, %v2291_v15  ;;  %v2879_v8 = vld [vmem:[#allocation2 + $0x152] ss:$2 sm:$0xff] }
 0x1df   :  { %7520 = vmatprep.subr.bf16.mxu0 %v9085_v37  ;;  %7627 = vmatpush3.bf16.msra.mxu1 %v8040_v19  ;;  %v2894_v19 = vpack.c.bf16 %v2869_v14, %v2867_v17  ;;  %v2897_v13 = vpack.c.bf16 %v2881_v0, %v2879_v8  ;;  %v2309_v14 = vld [vmem:[#allocation2 + $0x1fb] ss:$2 sm:$0xff]  ;;  %v2885_v15 = vld [vmem:[#allocation2 + $0x212] ss:$2 sm:$0xff]  ;;  %v2883_v17 = vld [vmem:[#allocation2 + $0x1e2] ss:$2 sm:$0xff] }
 0x1e0   :  { %7628 = vmatprep.subr.bf16.mxu1 %v9085_v37  ;;  %v2891_v0 = vld [vmem:[#allocation2 + $0x2a2] ss:$2 sm:$0xff] }
 0x1e2   :  { %7521 = vmatpush3.bf16.msra.mxu0 %v8038_v20  ;;  %v8045_v20 = vld [vmem:[%s10659_s3 + $0x180] sm:$0xff]  }
 0x1e3   :  { %7629 = vmatpush3.bf16.msra.mxu1 %v8041_v23  ;;  %7586 = vmatprep.subr.bf16.mxu0 %v9085_v37 }
 0x1e4   :  { %7459 = vmatmul.mubr.msk.bf16.gmra.mrb[156].mxu0 %vm820_vm1, %v1936_v26  ;;  %7567 = vmatmul.mubr.msk.bf16.gmra.mrb[92].mxu1 %vm820_vm1, %v2512_v27  ;;  %v8047_v26 = vld [vmem:[%s10659_s3 + $0x188] sm:$0xff]  }
 0x1e5   :  { %7462 = vmatprep.mubr.msk.bf16.mxu0 %vm8290_vm3, %v9085_v37  ;;  %7570 = vmatprep.mubr.msk.bf16.mxu1 %vm8290_vm3, %v9085_v37 }
 0x1e6   :  { %7694 = vmatprep.subr.bf16.mxu1 %v9085_v37 }
 0x1e7   :  { %v9169_v28 = vpop.f32.mrb[72].mxu0 }
 0x1e8   :  { %v9171_v29 = vpop.f32.mrb[8].mxu1  ;;  %v7280_v32 = vpop.f32.mrb[73].mxu0 }
 0x1e9   :  { %v7352_v33 = vpop.f32.mrb[9].mxu1  ;;  %v9173_v34 = vpop.f32.mrb[74].mxu0 }
 0x1ea   :  { %v9175_v35 = vpop.f32.mrb[10].mxu1  ;;  %v7281_v39 = vpop.f32.mrb[75].mxu0  ;;  %v2295_v33 = vld [vmem:[#allocation2 + $0x7b] ss:$2 sm:$0xff] }
 0x1eb   :  { %v7353_v40 = vpop.f32.mrb[11].mxu1 }
 0x1ec   :  { %7463 = vmatmul.mubr.msk.bf16.gmra.mrb[160].mxu0 %vm820_vm1, %v1937_v41  ;;  %7571 = vmatmul.mubr.msk.bf16.gmra.mrb[96].mxu1 %vm820_vm1, %v2513_v43  ;;  %v2319_v40 = vpack.c.bf16 %v2297_v22, %v2295_v33  ;;  %v2895_v41 = vpack.c.bf16 %v2873_v25, %v2871_v36  ;;  %v8044_v43 = vld [vmem:[%s10659_s3 + $0x130] sm:$0xff]   ;;  %v2313_v22 = vld [vmem:[#allocation2 + $0x25b] ss:$2 sm:$0xff] }
 0x1ed   :  { %7466 = vmatprep.mubr.msk.bf16.mxu0 %vm8290_vm3, %v9085_v37  ;;  %7574 = vmatprep.mubr.msk.bf16.mxu1 %vm8290_vm3, %v9085_v37  ;;  %v2889_v25 = vld [vmem:[#allocation2 + $0x272] ss:$2 sm:$0xff]  ;;  %v2311_v36 = vld [vmem:[#allocation2 + $0x22b] ss:$2 sm:$0xff] }
 0x1ef   :  { %v9183_v44 = vpop.f32.mrb[76].mxu0 }
 0x1f0   :  { %v9185_v47 = vpop.f32.mrb[12].mxu1  ;;  %v7284_v50 = vpop.f32.mrb[77].mxu0 }
 0x1f1   :  { %v7356_v53 = vpop.f32.mrb[13].mxu1  ;;  %v9187_v54 = vpop.f32.mrb[78].mxu0  ;;  %v2301_v50 = vld [vmem:[#allocation2 + $0x10b] ss:$2 sm:$0xff] }
 0x1f2   :  { %v9189_v55 = vpop.f32.mrb[14].mxu1  ;;  %v7285_v58 = vpop.f32.mrb[79].mxu0  ;;  %v2877_v53 = vld [vmem:[#allocation2 + $0x122] ss:$2 sm:$0xff] }
 0x1f3   :  { %v7357_v59 = vpop.f32.mrb[15].mxu1  ;;  %v2875_v58 = vld [vmem:[#allocation2 + $0xf2] ss:$2 sm:$0xff] }
 0x1f4   :  { %7467 = vmatmul.mubr.msk.bf16.gmra.mrb[164].mxu0 %vm820_vm1, %v1938_v60  ;;  %7575 = vmatmul.mubr.msk.bf16.gmra.mrb[100].mxu1 %vm820_vm1, %v2514_v61  ;;  %v2320_v59 = vpack.c.bf16 %v2301_v50, %v2299_v57  ;;  %v2896_v60 = vpack.c.bf16 %v2877_v53, %v2875_v58  ;;  %v2317_v50 = vld [vmem:[#allocation2 + $0x2bb] ss:$2 sm:$0xff]  ;;  %v2893_v53 = vld [vmem:[#allocation2 + $0x2d2] ss:$2 sm:$0xff] }
 0x1f5   :  { %7470 = vmatprep.mubr.msk.bf16.mxu0 %vm8290_vm3, %v9085_v37  ;;  %7578 = vmatprep.mubr.msk.bf16.mxu1 %vm8290_vm3, %v9085_v37 }
 0x1fc   :  { %7471 = vmatmul.mubr.msk.bf16.gmra.mrb[168].mxu0 %vm820_vm1, %v1939_v2  ;;  %7579 = vmatmul.mubr.msk.bf16.gmra.mrb[104].mxu1 %vm820_vm1, %v2515_v3 }
 0x1fd   :  { %7474 = vmatprep.mubr.msk.bf16.mxu0 %vm8290_vm3, %v9085_v37  ;;  %7582 = vmatprep.mubr.msk.bf16.mxu1 %vm8290_vm3, %v9085_v37 }
 0x204   :  { %7475 = vmatmul.mubr.msk.bf16.gmra.mrb[172].mxu0 %vm820_vm1, %v1940_v10  ;;  %7583 = vmatmul.mubr.msk.bf16.gmra.mrb[108].mxu1 %vm820_vm1, %v2516_v42  ;;  %v2321_v42 = vpack.c.bf16 %v2305_v63, %v2303_v7  ;;  %v2315_v63 = vld [vmem:[#allocation2 + $0x28b] ss:$2 sm:$0xff] }
 0x205   :  { %7522 = vmatprep.mubr.msk.bf16.mxu0 %vm8290_vm3, %v9085_v37  ;;  %7630 = vmatprep.mubr.msk.bf16.mxu1 %vm8290_vm3, %v9085_v37  ;;  %v2324_v8 = vpack.c.bf16 %v2317_v50, %v2315_v63  ;;  %v3255_v63 = vld [vmem:[#allocation2 + $0xa8] ss:$2 sm:$0xff] }
 0x20c   :  { %7523 = vmatmul.mubr.msk.bf16.vlgmr.msra.gmra.mrb[176].mxu0 %vm820_vm1, %v2318_v18  ;;  %7631 = vmatmul.mubr.msk.bf16.vlgmr.msra.gmra.mrb[112].mxu1 %vm820_vm1, %v2894_v19  ;;  %v2898_v19 = vpack.c.bf16 %v2885_v15, %v2883_v17  ;;  %v2675_v17 = vld [vmem:[#allocation2 + $0x31] ss:$2 sm:$0xff] }
 0x20d   :  { %7587 = vmatpush3.bf16.msra.mxu0 %v8042_v16  ;;  %7526 = vmatprep.mubr.msk.bf16.mxu0 %vm8290_vm3, %v9085_v37  ;;  %v2307_v16 = vld [vmem:[#allocation2 + $0x1cb] ss:$2 sm:$0xff] }
 0x20e   :  { %7634 = vmatprep.mubr.msk.bf16.mxu1 %vm8290_vm3, %v9085_v37  ;;  %7588 = vmatprep.subr.bf16.mxu0 %v9085_v37  ;;  %v2322_v18 = vpack.c.bf16 %v2309_v14, %v2307_v16  ;;  %v3253_v14 = vld [vmem:[#allocation2 + $0x78] ss:$2 sm:$0xff] }
 0x20f   :  { %v9225_v23 = vpop.f32.mrb[80].mxu0  ;;  %7695 = vmatpush3.bf16.msra.mxu1 %v8045_v20 }
 0x210   :  { %v9227_v24 = vpop.f32.mrb[16].mxu1  ;;  %v7288_v27 = vpop.f32.mrb[81].mxu0  ;;  %7696 = vmatprep.subr.bf16.mxu1 %v9085_v37 }
 0x211   :  { %v7360_v30 = vpop.f32.mrb[17].mxu1  ;;  %v9233_v31 = vpop.f32.mrb[82].mxu0  ;;  %7589 = vmatpush3.bf16.msra.mxu0 %v8043_v21 }
 0x212   :  { %v9235_v32 = vpop.f32.mrb[18].mxu1  ;;  %v7289_v38 = vpop.f32.mrb[83].mxu0  ;;  %7590 = vmatprep.subr.bf16.mxu0 %v9085_v37 }
 0x213   :  { %v7361_v39 = vpop.f32.mrb[19].mxu1  ;;  %7697 = vmatpush3.bf16.msra.mxu1 %v8047_v26  ;;  %v2887_v38 = vld [vmem:[#allocation2 + $0x242] ss:$2 sm:$0xff] }
 0x214   :  { %7527 = vmatmul.mubr.msk.bf16.gmra.mrb[180].mxu0 %vm820_vm1, %v2319_v40  ;;  %7635 = vmatmul.mubr.msk.bf16.gmra.mrb[116].mxu1 %vm820_vm1, %v2895_v41  ;;  %v2323_v41 = vpack.c.bf16 %v2313_v22, %v2311_v36  ;;  %v3251_v22 = vld [vmem:[#allocation2 + $0x48] ss:$2 sm:$0xff] }
 0x215   :  { %7530 = vmatprep.mubr.msk.bf16.mxu0 %vm8290_vm3, %v9085_v37  ;;  %7638 = vmatprep.mubr.msk.bf16.mxu1 %vm8290_vm3, %v9085_v37 }
 0x216   :  { %7591 = vmatpush3.bf16.msra.mxu0 %v8044_v43  ;;  %7698 = vmatprep.subr.bf16.mxu1 %v9085_v37  ;;  %v2899_v43 = vpack.c.bf16 %v2889_v25, %v2887_v38  ;;  %v3278_v38 = vpack.c.bf16 %v3253_v14, %v3251_v22 }
 0x217   :  { %7592 = vmatprep.subr.bf16.mxu0 %v9085_v37  ;;  %7699 = vmatpush3.bf16.msra.mxu1 %v8048_v48 }
 0x218   :  { %7700 = vmatprep.subr.bf16.mxu1 %v9085_v37 }
 0x21a   :  { %7593 = vmatpush3.bf16.msra.mxu0 %v8046_v49 }
 0x21b   :  { %7701 = vmatpush3.bf16.msra.mxu1 %v8049_v56  ;;  %7658 = vmatprep.subr.bf16.mxu0 %v9085_v37 }
 0x21c   :  { %7531 = vmatmul.mubr.msk.bf16.gmra.mrb[184].mxu0 %vm820_vm1, %v2320_v59  ;;  %7639 = vmatmul.mubr.msk.bf16.gmra.mrb[120].mxu1 %vm820_vm1, %v2896_v60 }
 0x21d   :  { %7534 = vmatprep.mubr.msk.bf16.mxu0 %vm8290_vm3, %v9085_v37  ;;  %7642 = vmatprep.mubr.msk.bf16.mxu1 %vm8290_vm3, %v9085_v37 }
 0x21e   :  { %7766 = vmatprep.subr.bf16.mxu1 %v9085_v37 }
 0x21f   :  { %v9267_v61 = vpop.f32.mrb[84].mxu0 }
 0x220   :  { %v9269_v62 = vpop.f32.mrb[20].mxu1  ;;  %v7292_v1 = vpop.f32.mrb[85].mxu0 }
 0x221   :  { %v7364_v2 = vpop.f32.mrb[21].mxu1  ;;  %v9271_v3 = vpop.f32.mrb[86].mxu0 }
 0x222   :  { %v9273_v4 = vpop.f32.mrb[22].mxu1  ;;  %v7293_v9 = vpop.f32.mrb[87].mxu0 }
 0x223   :  { %v7365_v10 = vpop.f32.mrb[23].mxu1  ;;  %v2900_v9 = vpack.c.bf16 %v2893_v53, %v2891_v0 }
 0x224   :  { %7535 = vmatmul.mubr.msk.bf16.gmra.mrb[188].mxu0 %vm820_vm1, %v2321_v42  ;;  %7643 = vmatmul.mubr.msk.bf16.gmra.mrb[124].mxu1 %vm820_vm1, %v2897_v13  ;;  %v2677_v13 = vld [vmem:[#allocation2 + $0x61] ss:$2 sm:$0xff] }
 0x225   :  { %7538 = vmatprep.mubr.msk.bf16.mxu0 %vm8290_vm3, %v9085_v37  ;;  %7646 = vmatprep.mubr.msk.bf16.mxu1 %vm8290_vm3, %v9085_v37  ;;  %v2702_v36 = vpack.c.bf16 %v2677_v13, %v2675_v17  ;;  %v8054_v13 = vld [vmem:[%s10659_s3 + $0x178] sm:$0xff]  }
 0x22c   :  { %7539 = vmatmul.mubr.msk.bf16.gmra.mrb[192].mxu0 %vm820_vm1, %v2322_v18  ;;  %7647 = vmatmul.mubr.msk.bf16.gmra.mrb[128].mxu1 %vm820_vm1, %v2898_v19 }
 0x22d   :  { %7542 = vmatprep.mubr.msk.bf16.mxu0 %vm8290_vm3, %v9085_v37  ;;  %7650 = vmatprep.mubr.msk.bf16.mxu1 %vm8290_vm3, %v9085_v37 }
 0x22f   :  { %v9287_v20 = vpop.f32.mrb[88].mxu0  ;;  %v9289_v21 = vpop.f32.mrb[24].mxu1 }
 0x230   :  { %v7296_v26 = vpop.f32.mrb[89].mxu0  ;;  %v7368_v27 = vpop.f32.mrb[25].mxu1 }
 0x231   :  { %v9291_v30 = vpop.f32.mrb[90].mxu0  ;;  %v9293_v33 = vpop.f32.mrb[26].mxu1 }
 0x232   :  { %v7297_v39 = vpop.f32.mrb[91].mxu0  ;;  %v7369_v40 = vpop.f32.mrb[27].mxu1 }
 0x234   :  { %7543 = vmatmul.mubr.msk.bf16.gmra.mrb[196].mxu0 %vm820_vm1, %v2323_v41  ;;  %7651 = vmatmul.mubr.msk.bf16.gmra.mrb[132].mxu1 %vm820_vm1, %v2899_v43 }
 0x235   :  { %7546 = vmatprep.mubr.msk.bf16.mxu0 %vm8290_vm3, %v9085_v37  ;;  %7654 = vmatprep.mubr.msk.bf16.mxu1 %vm8290_vm3, %v9085_v37 }
 0x237   :  { %v1276_v48 = vpop.f32.mrb[92].mxu0  ;;  %v9301_v49 = vpop.f32.mrb[28].mxu1 }
 0x238   :  { %v1277_v56 = vadd.f32 %v1276_v48, %v9097_v45  ;;  %v7308_v57 = vpop.f32.mrb[93].mxu0  ;;  %v7416_v58 = vpop.f32.mrb[29].mxu1  ;;  %v3257_v48 = vld [vmem:[#allocation2 + $0xd8] ss:$2 sm:$0xff] }
 0x239   :  { %v1279_v59 = vpop.f32.mrb[94].mxu0  ;;  %v9304_v60 = vpop.f32.mrb[30].mxu1 }
 0x23a   :  { %v1280_v1 = vadd.f32 %v1279_v59, %v9101_v51  ;;  %v7309_v2 = vpop.f32.mrb[95].mxu0  ;;  %v7417_v7 = vpop.f32.mrb[31].mxu1  ;;  %v9308_v10 = vadd.f32 %v9099_v46, %v1277_v56  ;;  %v2679_v59 = vld [vmem:[#allocation2 + $0x91] ss:$2 sm:$0xff] }
 0x23c   :  { %7547 = vmatmul.mubr.msk.bf16.gmra.mrb[200].mxu0 %vm820_vm1, %v2324_v8  ;;  %7655 = vmatmul.mubr.msk.bf16.gmra.mrb[136].mxu1 %vm820_vm1, %v2900_v9  ;;  %v9313_v45 = vadd.f32 %v9103_v52, %v1280_v1  ;;  %v8050_v52 = vld [vmem:[%s10659_s3 + $0x160] sm:$0xff]   ;;  %v3279_v8 = vpack.c.bf16 %v3257_v48, %v3255_v63  ;;  %v2689_v48 = vld [vmem:[#allocation2 + $0x1b1] ss:$2 sm:$0xff] }
 0x23d   :  { %7594 = vmatprep.mubr.msk.bf16.mxu0 %vm8290_vm3, %v9085_v37  ;;  %7702 = vmatprep.mubr.msk.bf16.mxu1 %vm8290_vm3, %v9085_v37 }
 0x23f   :  { %v1284_v51 = vpop.f32.mrb[96].mxu0  ;;  %v9319_v42 = vpop.f32.mrb[32].mxu1 }
 0x240   :  { %v1285_v46 = vadd.f32 %v1284_v51, %v9127_v5  ;;  %v7312_v15 = vpop.f32.mrb[97].mxu0  ;;  %v7420_v16 = vpop.f32.mrb[33].mxu1  ;;  %v8053_v5 = vld [vmem:[%s10659_s3 + $0x1c0] sm:$0xff]   ;;  %v8056_v51 = vld [vmem:[%s10659_s3 + $0x1d0] sm:$0xff]  }
 0x241   :  { %v1287_v18 = vpop.f32.mrb[98].mxu0  ;;  %v9322_v19 = vpop.f32.mrb[34].mxu1  ;;  %v3261_v15 = vld [vmem:[#allocation2 + $0x138] ss:$2 sm:$0xff] }
 0x242   :  { %v1288_v25 = vadd.f32 %v1287_v18, %v9135_v11  ;;  %v7313_v26 = vpop.f32.mrb[99].mxu0  ;;  %v7421_v27 = vpop.f32.mrb[35].mxu1  ;;  %v9329_v39 = vadd.f32 %v9129_v6, %v1285_v46  ;;  %v8051_v6 = vld [vmem:[%s10659_s3 + $0x168] sm:$0xff]  }
 0x243   :  { %v2681_v11 = vld [vmem:[#allocation2 + $0xc1] ss:$2 sm:$0xff]  ;;  %v3259_v26 = vld [vmem:[#allocation2 + $0x108] ss:$2 sm:$0xff] }
 0x244   :  { %7595 = vmatmul.mubr.msk.bf16.vlgmr.msra.gmra.mrb[204].mxu0 %vm820_vm1, %v2702_v36  ;;  %7703 = vmatmul.mubr.msk.bf16.vlgmr.msra.gmra.mrb[140].mxu1 %vm820_vm1, %v3278_v38  ;;  %v9337_v40 = vadd.f32 %v9137_v12, %v1288_v25  ;;  %v8055_v12 = vld [vmem:[%s10659_s3 + $0x1c8] sm:$0xff]   ;;  %v2703_v7 = vpack.c.bf16 %v2681_v11, %v2679_v59  ;;  %v2683_v25 = vld [vmem:[#allocation2 + $0xf1] ss:$2 sm:$0xff] }
 0x245   :  { %7659 = vmatpush3.bf16.msra.mxu0 %v8050_v52  ;;  %7598 = vmatprep.mubr.msk.bf16.mxu0 %vm8290_vm3, %v9085_v37 }
 0x246   :  { %7706 = vmatprep.mubr.msk.bf16.mxu1 %vm8290_vm3, %v9085_v37  ;;  %7660 = vmatprep.subr.bf16.mxu0 %v9085_v37 }
 0x247   :  { %v1292_v41 = vpop.f32.mrb[100].mxu0  ;;  %v9347_v43 = vpop.f32.mrb[36].mxu1  ;;  %7767 = vmatpush3.bf16.msra.mxu1 %v8053_v5 }
 0x248   :  { %v1293_v50 = vadd.f32 %v1292_v41, %v9169_v28  ;;  %v7316_v53 = vpop.f32.mrb[101].mxu0  ;;  %v7424_v56 = vpop.f32.mrb[37].mxu1  ;;  %7768 = vmatprep.subr.bf16.mxu1 %v9085_v37  ;;  %v8052_v28 = vld [vmem:[%s10659_s3 + $0x170] sm:$0xff]  }
 0x249   :  { %v1295_v57 = vpop.f32.mrb[102].mxu0  ;;  %v9354_v58 = vpop.f32.mrb[38].mxu1  ;;  %7661 = vmatpush3.bf16.msra.mxu0 %v8051_v6  ;;  %v3280_v6 = vpack.c.bf16 %v3261_v15, %v3259_v26 }
 0x24a   :  { %v1296_v0 = vadd.f32 %v1295_v57, %v9173_v34  ;;  %v7317_v1 = vpop.f32.mrb[103].mxu0  ;;  %v7425_v2 = vpop.f32.mrb[39].mxu1  ;;  %7662 = vmatprep.subr.bf16.mxu0 %v9085_v37  ;;  %v9362_v9 = vadd.f32 %v9171_v29, %v1293_v50  ;;  %v2685_v29 = vld [vmem:[#allocation2 + $0x121] ss:$2 sm:$0xff] }
 0x24b   :  { %7769 = vmatpush3.bf16.msra.mxu1 %v8055_v12  ;;  %v2704_v5 = vpack.c.bf16 %v2685_v29, %v2683_v25  ;;  %v3265_v12 = vld [vmem:[#allocation2 + $0x1c8] ss:$2 sm:$0xff] }
 0x24c   :  { %7599 = vmatmul.mubr.msk.bf16.gmra.mrb[208].mxu0 %vm820_vm1, %v2703_v7  ;;  %7707 = vmatmul.mubr.msk.bf16.gmra.mrb[144].mxu1 %vm820_vm1, %v3279_v8  ;;  %v9370_v34 = vadd.f32 %v9175_v35, %v1296_v0  ;;  %v8057_v35 = vld [vmem:[%s10659_s3 + $0x1d8] sm:$0xff]   ;;  %v3269_v29 = vld [vmem:[#allocation2 + $0x228] ss:$2 sm:$0xff] }
 0x24d   :  { %7602 = vmatprep.mubr.msk.bf16.mxu0 %vm8290_vm3, %v9085_v37  ;;  %7710 = vmatprep.mubr.msk.bf16.mxu1 %vm8290_vm3, %v9085_v37 }
 0x24e   :  { %7663 = vmatpush3.bf16.msra.mxu0 %v8052_v28  ;;  %7770 = vmatprep.subr.bf16.mxu1 %v9085_v37 }
 0x24f   :  { %v1300_v14 = vpop.f32.mrb[104].mxu0  ;;  %v9380_v46 = vpop.f32.mrb[40].mxu1  ;;  %7664 = vmatprep.subr.bf16.mxu0 %v9085_v37  ;;  %7771 = vmatpush3.bf16.msra.mxu1 %v8056_v51  ;;  %v2693_v51 = vld [vmem:[#allocation2 + $0x211] ss:$2 sm:$0xff] }
 0x250   :  { %v1301_v16 = vadd.f32 %v1300_v14, %v9183_v44  ;;  %v7320_v17 = vpop.f32.mrb[105].mxu0  ;;  %v7428_v18 = vpop.f32.mrb[41].mxu1  ;;  %7772 = vmatprep.subr.bf16.mxu1 %v9085_v37 }
 0x251   :  { %v1303_v52 = vpop.f32.mrb[106].mxu0  ;;  %v9388_v22 = vpop.f32.mrb[42].mxu1 }
 0x252   :  { %v1304_v27 = vadd.f32 %v1303_v52, %v9187_v54  ;;  %v7321_v36 = vpop.f32.mrb[107].mxu0  ;;  %v7429_v38 = vpop.f32.mrb[43].mxu1  ;;  %7665 = vmatpush3.bf16.msra.mxu0 %v8054_v13  ;;  %v9392_v11 = vadd.f32 %v9185_v47, %v1301_v16  ;;  %v3263_v54 = vld [vmem:[#allocation2 + $0x168] ss:$2 sm:$0xff]  ;;  %v3267_v16 = vld [vmem:[#allocation2 + $0x1f8] ss:$2 sm:$0xff] }
 0x253   :  { %7773 = vmatpush3.bf16.msra.mxu1 %v8057_v35  ;;  %7730 = vmatprep.subr.bf16.mxu0 %v9085_v37  ;;  %v3281_v7 = vpack.c.bf16 %v3265_v12, %v3263_v54  ;;  %v3282_v26 = vpack.c.bf16 %v3269_v29, %v3267_v16  ;;  %v2697_v38 = vld [vmem:[#allocation2 + $0x271] ss:$2 sm:$0xff]  ;;  %v3271_v12 = vld [vmem:[#allocation2 + $0x258] ss:$2 sm:$0xff] }
 0x254   :  { %7603 = vmatmul.mubr.msk.bf16.gmra.mrb[212].mxu0 %vm820_vm1, %v2704_v5  ;;  %7711 = vmatmul.mubr.msk.bf16.gmra.mrb[148].mxu1 %vm820_vm1, %v3280_v6  ;;  %v9398_v44 = vadd.f32 %v9189_v55, %v1304_v27  ;;  %v2687_v55 = vld [vmem:[#allocation2 + $0x151] ss:$2 sm:$0xff]  ;;  %v3273_v5 = vld [vmem:[#allocation2 + $0x288] ss:$2 sm:$0xff] }
 0x255   :  { %7606 = vmatprep.mubr.msk.bf16.mxu0 %vm8290_vm3, %v9085_v37  ;;  %7714 = vmatprep.mubr.msk.bf16.mxu1 %vm8290_vm3, %v9085_v37  ;;  %v2705_v2 = vpack.c.bf16 %v2689_v48, %v2687_v55  ;;  %v3283_v55 = vpack.c.bf16 %v3273_v5, %v3271_v12 }
 0x257   :  { %v1308_v41 = vpop.f32.mrb[108].mxu0  ;;  %v9404_v47 = vpop.f32.mrb[44].mxu1 }
 0x258   :  { %v1309_v50 = vadd.f32 %v1308_v41, %v9225_v23  ;;  %v7324_v53 = vpop.f32.mrb[109].mxu0  ;;  %v7432_v56 = vpop.f32.mrb[45].mxu1 }
 0x259   :  { %v1311_v57 = vpop.f32.mrb[110].mxu0  ;;  %v9407_v59 = vpop.f32.mrb[46].mxu1 }
 0x25a   :  { %v1312_v63 = vadd.f32 %v1311_v57, %v9233_v31  ;;  %v7325_v0 = vpop.f32.mrb[111].mxu0  ;;  %v7433_v1 = vpop.f32.mrb[47].mxu1  ;;  %v9411_v8 = vadd.f32 %v9227_v24, %v1309_v50 }
 0x25c   :  { %7607 = vmatmul.mubr.msk.bf16.gmra.mrb[216].mxu0 %vm820_vm1, %v2705_v2  ;;  %7715 = vmatmul.mubr.msk.bf16.gmra.mrb[152].mxu1 %vm820_vm1, %v3281_v7  ;;  %v9416_v23 = vadd.f32 %v9235_v32, %v1312_v63  ;;  %v2691_v32 = vld [vmem:[#allocation2 + $0x1e1] ss:$2 sm:$0xff]  ;;  %v2701_v2 = vld [vmem:[#allocation2 + $0x2d1] ss:$2 sm:$0xff] }
 0x25d   :  { %7610 = vmatprep.mubr.msk.bf16.mxu0 %vm8290_vm3, %v9085_v37  ;;  %7718 = vmatprep.mubr.msk.bf16.mxu1 %vm8290_vm3, %v9085_v37  ;;  %v2706_v25 = vpack.c.bf16 %v2693_v51, %v2691_v32 }
 0x25f   :  { %v1316_v31 = vpop.f32.mrb[112].mxu0  ;;  %v9422_v28 = vpop.f32.mrb[48].mxu1 }
 0x260   :  { %v1317_v24 = vadd.f32 %v1316_v31, %v9267_v61  ;;  %v7328_v13 = vpop.f32.mrb[113].mxu0  ;;  %v7436_v14 = vpop.f32.mrb[49].mxu1 }
 0x261   :  { %v1319_v15 = vpop.f32.mrb[114].mxu0  ;;  %v9425_v35 = vpop.f32.mrb[50].mxu1 }
 0x262   :  { %v1320_v17 = vadd.f32 %v1319_v15, %v9271_v3  ;;  %v7329_v18 = vpop.f32.mrb[115].mxu0  ;;  %v7437_v52 = vpop.f32.mrb[51].mxu1  ;;  %v9429_v27 = vadd.f32 %v9269_v62, %v1317_v24 }
 0x263   :  { %v3061_v52 = vld [vmem:[#allocation2 + $0x63] ss:$2 sm:$0xff] }
 0x264   :  { %7611 = vmatmul.mubr.msk.bf16.gmra.mrb[220].mxu0 %vm820_vm1, %v2706_v25  ;;  %7719 = vmatmul.mubr.msk.bf16.gmra.mrb[156].mxu1 %vm820_vm1, %v3282_v26  ;;  %v9434_v61 = vadd.f32 %v9273_v4, %v1320_v17  ;;  %v2695_v4 = vld [vmem:[#allocation2 + $0x241] ss:$2 sm:$0xff]  ;;  %v3637_v25 = vld [vmem:[#allocation2 + $0x7a] ss:$2 sm:$0xff] }
 0x265   :  { %7614 = vmatprep.mubr.msk.bf16.mxu0 %vm8290_vm3, %v9085_v37  ;;  %7722 = vmatprep.mubr.msk.bf16.mxu1 %vm8290_vm3, %v9085_v37  ;;  %v2707_v57 = vpack.c.bf16 %v2697_v38, %v2695_v4  ;;  %v3059_v38 = vld [vmem:[#allocation2 + $0x33] ss:$2 sm:$0xff] }
 0x266   :  { %v3086_v12 = vpack.c.bf16 %v3061_v52, %v3059_v38  ;;  %v3645_v52 = vld [vmem:[#allocation2 + $0x13a] ss:$2 sm:$0xff]  ;;  %v3067_v38 = vld [vmem:[#allocation2 + $0xf3] ss:$2 sm:$0xff] }
 0x267   :  { %v1324_v3 = vpop.f32.mrb[116].mxu0  ;;  %v9440_v36 = vpop.f32.mrb[52].mxu1 }
 0x268   :  { %v1325_v62 = vadd.f32 %v1324_v3, %v9287_v20  ;;  %v7332_v6 = vpop.f32.mrb[117].mxu0  ;;  %v7440_v54 = vpop.f32.mrb[53].mxu1 }
 0x269   :  { %v1327_v41 = vpop.f32.mrb[118].mxu0  ;;  %v9443_v48 = vpop.f32.mrb[54].mxu1  ;;  %v3635_v6 = vld [vmem:[#allocation2 + $0x4a] ss:$2 sm:$0xff] }
 0x26a   :  { %v1328_v50 = vadd.f32 %v1327_v41, %v9291_v30  ;;  %v7333_v53 = vpop.f32.mrb[119].mxu0  ;;  %v7441_v56 = vpop.f32.mrb[55].mxu1  ;;  %v9447_v63 = vadd.f32 %v9289_v21, %v1325_v62  ;;  %v3277_v30 = vld [vmem:[#allocation2 + $0x2e8] ss:$2 sm:$0xff]  ;;  %v3275_v21 = vld [vmem:[#allocation2 + $0x2b8] ss:$2 sm:$0xff] }
 0x26b   :  { %v3284_v16 = vpack.c.bf16 %v3277_v30, %v3275_v21 }
 0x26c   :  { %7615 = vmatmul.mubr.msk.bf16.gmra.mrb[224].mxu0 %vm820_vm1, %v2707_v57  ;;  %7723 = vmatmul.mubr.msk.bf16.gmra.mrb[160].mxu1 %vm820_vm1, %v3283_v55  ;;  %v9452_v20 = vadd.f32 %v9293_v33, %v1328_v50  ;;  %v2699_v33 = vld [vmem:[#allocation2 + $0x2a1] ss:$2 sm:$0xff]  ;;  %v3662_v50 = vpack.c.bf16 %v3637_v25, %v3635_v6  ;;  %v3641_v55 = vld [vmem:[#allocation2 + $0xda] ss:$2 sm:$0xff] }
 0x26d   :  { %7618 = vmatprep.mubr.msk.bf16.mxu0 %vm8290_vm3, %v9085_v37  ;;  %7726 = vmatprep.mubr.msk.bf16.mxu1 %vm8290_vm3, %v9085_v37  ;;  %v2708_v32 = vpack.c.bf16 %v2701_v2, %v2699_v33  ;;  %v3065_v57 = vld [vmem:[#allocation2 + $0xc3] ss:$2 sm:$0xff] }
 0x26e   :  { %v9528_v25 = vld [vmem:[#allocation3] sm:$0xff] }
 0x26f   :  { %v1646_v0 = vpop.f32.mrb[120].mxu0  ;;  %v9458_v1 = vpop.f32.mrb[56].mxu1 }
 0x270   :  { %v1701_v7 = vadd.f32 %v1646_v0, %v9308_v10  ;;  %v7380_v31 = vpop.f32.mrb[121].mxu0  ;;  %v7488_v51 = vpop.f32.mrb[57].mxu1 }
 0x271   :  { %v1649_v29 = vpop.f32.mrb[122].mxu0  ;;  %v9461_v24 = vpop.f32.mrb[58].mxu1  ;;  %v3639_v31 = vld [vmem:[#allocation2 + $0xaa] ss:$2 sm:$0xff] }
 0x272   :  { %v1702_v13 = vadd.f32 %v1649_v29, %v9313_v45  ;;  %v7381_v14 = vpop.f32.mrb[123].mxu0  ;;  %v7489_v15 = vpop.f32.mrb[59].mxu1  ;;  %v9465_v17 = vadd.f32 %v9301_v49, %v1701_v7  ;;  %v3063_v7 = vld [vmem:[#allocation2 + $0x93] ss:$2 sm:$0xff] }
 0x273   :  { %v3663_v14 = vpack.c.bf16 %v3641_v55, %v3639_v31 }
 0x274   :  { %7619 = vmatmul.mubr.msk.bf16.gmra.mrb[228].mxu0 %vm820_vm1, %v2708_v32  ;;  %7727 = vmatmul.mubr.msk.bf16.gmra.mrb[164].mxu1 %vm820_vm1, %v3284_v16  ;;  %v9470_v10 = vadd.f32 %v9304_v60, %v1702_v13  ;;  %v8058_v60 = vld [vmem:[%s10659_s3 + $0x1a0] sm:$0xff]   ;;  %v3087_v13 = vpack.c.bf16 %v3065_v57, %v3063_v7 }
 0x275   :  { %7666 = vmatprep.mubr.msk.bf16.mxu0 %vm8290_vm3, %v9085_v37  ;;  %7774 = vmatprep.mubr.msk.bf16.mxu1 %vm8290_vm3, %v9085_v37 }
 0x277   :  { %v1654_v45 = vpop.f32.mrb[124].mxu0  ;;  %v9476_v18 = vpop.f32.mrb[60].mxu1 }
 0x278   :  { %v1703_v49 = vadd.f32 %v1654_v45, %v9329_v39  ;;  %v7384_v26 = vpop.f32.mrb[125].mxu0  ;;  %v7492_v3 = vpop.f32.mrb[61].mxu1  ;;  %v3069_v45 = vld [vmem:[#allocation2 + $0x123] ss:$2 sm:$0xff] }
 0x279   :  { %v1657_v5 = vpop.f32.mrb[126].mxu0  ;;  %v9479_v62 = vpop.f32.mrb[62].mxu1 }
 0x27a   :  { %v1704_v54 = vadd.f32 %v1657_v5, %v9337_v40  ;;  %v7385_v41 = vpop.f32.mrb[127].mxu0  ;;  %v7493_v4 = vpop.f32.mrb[63].mxu1  ;;  %v9486_v53 = vadd.f32 %v9319_v42, %v1703_v49  ;;  %v8059_v40 = vld [vmem:[%s10659_s3 + $0x1a8] sm:$0xff]  }
 0x27b   :  { %v3643_v5 = vld [vmem:[#allocation2 + $0x10a] ss:$2 sm:$0xff]  ;;  %v3088_v41 = vpack.c.bf16 %v3069_v45, %v3067_v38 }
 0x27c   :  { %7667 = vmatmul.mubr.msk.bf16.vlgmr.msra.gmra.mrb[232].mxu0 %vm820_vm1, %v3086_v12  ;;  %7775 = vmatmul.mubr.msk.bf16.vlgmr.msra.gmra.mrb[168].mxu1 %vm820_vm1, %v3662_v50  ;;  %v9491_v39 = vadd.f32 %v9322_v19, %v1704_v54  ;;  %v3664_v4 = vpack.c.bf16 %v3645_v52, %v3643_v5 }
 0x27d   :  { %7731 = vmatpush3.bf16.msra.mxu0 %v8058_v60  ;;  %7670 = vmatprep.mubr.msk.bf16.mxu0 %vm8290_vm3, %v9085_v37 }
 0x27e   :  { %7778 = vmatprep.mubr.msk.bf16.mxu1 %vm8290_vm3, %v9085_v37  ;;  %7732 = vmatprep.subr.bf16.mxu0 %v9085_v37 }
 0x27f   :  { %v1662_v42 = vpop.f32.mrb[128].mxu0  ;;  %v9501_v56 = vpop.f32.mrb[64].mxu1 }
 0x280   :  { %v1705_v19 = vadd.f32 %v1662_v42, %v9362_v9  ;;  %v7388_v30 = vpop.f32.mrb[129].mxu0  ;;  %v7496_v0 = vpop.f32.mrb[65].mxu1  ;;  %v8060_v9 = vld [vmem:[%s10659_s3 + $0x1b0] sm:$0xff]  }
 0x281   :  { %v1665_v2 = vpop.f32.mrb[130].mxu0  ;;  %v9504_v21 = vpop.f32.mrb[66].mxu1  ;;  %7733 = vmatpush3.bf16.msra.mxu0 %v8059_v40  ;;  %v3649_v42 = vld [vmem:[#allocation2 + $0x1ca] ss:$2 sm:$0xff] }
 0x282   :  { %v1706_v51 = vadd.f32 %v1665_v2, %v9370_v34  ;;  %v7389_v29 = vpop.f32.mrb[131].mxu0  ;;  %v7497_v33 = vpop.f32.mrb[67].mxu1  ;;  %7734 = vmatprep.subr.bf16.mxu0 %v9085_v37  ;;  %v9512_v15 = vadd.f32 %v9347_v43, %v1705_v19  ;;  %v8061_v34 = vld [vmem:[%s10659_s3 + $0x1b8] sm:$0xff]  }
 0x284   :  { %7671 = vmatmul.mubr.msk.bf16.gmra.mrb[236].mxu0 %vm820_vm1, %v3087_v13  ;;  %7779 = vmatmul.mubr.msk.bf16.gmra.mrb[172].mxu1 %vm820_vm1, %v3663_v14  ;;  %v9517_v32 = vadd.f32 %v9354_v58, %v1706_v51  ;;  %v3077_v14 = vld [vmem:[#allocation2 + $0x213] ss:$2 sm:$0xff] }
 0x285   :  { %7674 = vmatprep.mubr.msk.bf16.mxu0 %vm8290_vm3, %v9085_v37  ;;  %7782 = vmatprep.mubr.msk.bf16.mxu1 %vm8290_vm3, %v9085_v37 }
 0x286   :  { %7735 = vmatpush3.bf16.msra.mxu0 %v8060_v9  ;;  %v3653_v9 = vld [vmem:[#allocation2 + $0x22a] ss:$2 sm:$0xff] }
 0x287   :  { %v1670_v43 = vpop.f32.mrb[132].mxu0  ;;  %v9526_v16 = vpop.f32.mrb[68].mxu1  ;;  %7736 = vmatprep.subr.bf16.mxu0 %v9528_v25 }
 0x288   :  { %v1707_v58 = vadd.f32 %v1670_v43, %v9392_v11  ;;  %v7392_v49 = vpop.f32.mrb[133].mxu0  ;;  %v7500_v26 = vpop.f32.mrb[69].mxu1 }
 0x289   :  { %v1673_v3 = vpop.f32.mrb[134].mxu0  ;;  %v9532_v37 = vpop.f32.mrb[70].mxu1 }
 0x28a   :  { %v1708_v60 = vadd.f32 %v1673_v3, %v9398_v44  ;;  %v7393_v6 = vpop.f32.mrb[135].mxu0  ;;  %v7501_v54 = vpop.f32.mrb[71].mxu1  ;;  %7737 = vmatpush3.bf16.msra.mxu0 %v8061_v34  ;;  %v9536_v12 = vadd.f32 %v9380_v46, %v1707_v58  ;;  %v3647_v44 = vld [vmem:[#allocation2 + $0x16a] ss:$2 sm:$0xff]  ;;  %v3073_v46 = vld [vmem:[#allocation2 + $0x1b3] ss:$2 sm:$0xff] }
 0x28b   :  { %7802 = vmatprep.subr.bf16.mxu0 %v9528_v25  ;;  %v3665_v29 = vpack.c.bf16 %v3649_v42, %v3647_v44  ;;  %v3651_v58 = vld [vmem:[#allocation2 + $0x1fa] ss:$2 sm:$0xff]  ;;  %v3081_v54 = vld [vmem:[#allocation2 + $0x273] ss:$2 sm:$0xff] }
 0x28c   :  { %7675 = vmatmul.mubr.msk.bf16.gmra.mrb[240].mxu0 %vm820_vm1, %v3088_v41  ;;  %7783 = vmatmul.mubr.msk.bf16.gmra.mrb[176].mxu1 %vm820_vm1, %v3664_v4  ;;  %v9542_v11 = vadd.f32 %v9388_v22, %v1708_v60  ;;  %v3071_v22 = vld [vmem:[#allocation2 + $0x153] ss:$2 sm:$0xff]  ;;  %v3666_v5 = vpack.c.bf16 %v3653_v9, %v3651_v58  ;;  %v3657_v41 = vld [vmem:[#allocation2 + $0x28a] ss:$2 sm:$0xff]  ;;  %v3655_v42 = vld [vmem:[#allocation2 + $0x25a] ss:$2 sm:$0xff] }
 0x28d   :  { %7678 = vmatprep.mubr.msk.bf16.mxu0 %vm8290_vm3, %v9528_v25  ;;  %7786 = vmatprep.mubr.msk.bf16.mxu1 %vm8290_vm3, %v9528_v25  ;;  %v3089_v51 = vpack.c.bf16 %v3073_v46, %v3071_v22  ;;  %v3667_v22 = vpack.c.bf16 %v3657_v41, %v3655_v42  ;;  %v8063_v42 = vld [vmem:[%s10659_s3 + $0x1e8] sm:$0xff]  }
 0x28f   :  { %v1678_v50 = vpop.f32.mrb[136].mxu0  ;;  %v9548_v40 = vpop.f32.mrb[72].mxu1 }
 0x290   :  { %v1709_v57 = vadd.f32 %v1678_v50, %v9411_v8  ;;  %v7396_v55 = vpop.f32.mrb[137].mxu0  ;;  %v7504_v19 = vpop.f32.mrb[73].mxu1 }
 0x291   :  { %v1681_v30 = vpop.f32.mrb[138].mxu0  ;;  %v9551_v0 = vpop.f32.mrb[74].mxu1 }
 0x292   :  { %v1710_v2 = vadd.f32 %v1681_v30, %v9416_v23  ;;  %v7397_v7 = vpop.f32.mrb[139].mxu0  ;;  %v7505_v31 = vpop.f32.mrb[75].mxu1  ;;  %v9555_v33 = vadd.f32 %v9404_v47, %v1709_v57 }
 0x294   :  { %7679 = vmatmul.mubr.msk.bf16.gmra.mrb[244].mxu0 %vm820_vm1, %v3089_v51  ;;  %7787 = vmatmul.mubr.msk.bf16.gmra.mrb[180].mxu1 %vm820_vm1, %v3665_v29  ;;  %v9560_v8 = vadd.f32 %v9407_v59, %v1710_v2  ;;  %v3075_v59 = vld [vmem:[#allocation2 + $0x1e3] ss:$2 sm:$0xff]  ;;  %v3085_v51 = vld [vmem:[#allocation2 + $0x2d3] ss:$2 sm:$0xff] }
 0x295   :  { %7682 = vmatprep.mubr.msk.bf16.mxu0 %vm8290_vm3, %v9528_v25  ;;  %7790 = vmatprep.mubr.msk.bf16.mxu1 %vm8290_vm3, %v9528_v25  ;;  %v3090_v38 = vpack.c.bf16 %v3077_v14, %v3075_v59 }
 0x297   :  { %v1686_v23 = vpop.f32.mrb[140].mxu0  ;;  %v9566_v13 = vpop.f32.mrb[76].mxu1 }
 0x298   :  { %v1711_v47 = vadd.f32 %v1686_v23, %v9429_v27  ;;  %v7400_v34 = vpop.f32.mrb[141].mxu0  ;;  %v7508_v43 = vpop.f32.mrb[77].mxu1 }
 0x299   :  { %v1689_v45 = vpop.f32.mrb[142].mxu0  ;;  %v9569_v52 = vpop.f32.mrb[78].mxu1 }
 0x29a   :  { %v1712_v49 = vadd.f32 %v1689_v45, %v9434_v61  ;;  %v7401_v26 = vpop.f32.mrb[143].mxu0  ;;  %v7509_v3 = vpop.f32.mrb[79].mxu1  ;;  %v9573_v60 = vadd.f32 %v9422_v28, %v1711_v47 }
 0x29b   :  { %v3445_v26 = vld [vmem:[#allocation2 + $0x79] ss:$2 sm:$0xff] }
 0x29c   :  { %7683 = vmatmul.mubr.msk.bf16.gmra.mrb[248].mxu0 %vm820_vm1, %v3090_v38  ;;  %7791 = vmatmul.mubr.msk.bf16.gmra.mrb[184].mxu1 %vm820_vm1, %v3666_v5  ;;  %v9578_v27 = vadd.f32 %v9425_v35, %v1712_v49  ;;  %v3079_v35 = vld [vmem:[#allocation2 + $0x243] ss:$2 sm:$0xff] }
 0x29d   :  { %7686 = vmatprep.mubr.msk.bf16.mxu0 %vm8290_vm3, %v9528_v25  ;;  %7794 = vmatprep.mubr.msk.bf16.mxu1 %vm8290_vm3, %v9528_v25  ;;  %v3091_v30 = vpack.c.bf16 %v3081_v54, %v3079_v35 }
 0x29f   :  { %v1694_v61 = vpop.f32.mrb[144].mxu0  ;;  %v9584_v6 = vpop.f32.mrb[80].mxu1 }
 0x2a0   :  { %v1713_v28 = vadd.f32 %v1694_v61, %v9447_v63  ;;  %v7404_v4 = vpop.f32.mrb[145].mxu0  ;;  %v7512_v44 = vpop.f32.mrb[81].mxu1 }
 0x2a1   :  { %v1697_v50 = vpop.f32.mrb[146].mxu0  ;;  %v9587_v46 = vpop.f32.mrb[82].mxu1 }
 0x2a2   :  { %v1714_v57 = vadd.f32 %v1697_v50, %v9452_v20  ;;  %v7405_v55 = vpop.f32.mrb[147].mxu0  ;;  %v7513_v19 = vpop.f32.mrb[83].mxu1  ;;  %v9591_v2 = vadd.f32 %v9440_v36, %v1713_v28  ;;  %v3661_v20 = vld [vmem:[#allocation2 + $0x2ea] ss:$2 sm:$0xff]  ;;  %v3659_v36 = vld [vmem:[#allocation2 + $0x2ba] ss:$2 sm:$0xff] }
 0x2a3   :  { %v3668_v58 = vpack.c.bf16 %v3661_v20, %v3659_v36  ;;  %v3447_v20 = vld [vmem:[#allocation2 + $0xa9] ss:$2 sm:$0xff] }
 0x2a4   :  { %7687 = vmatmul.mubr.msk.bf16.gmra.mrb[252].mxu0 %vm820_vm1, %v3091_v30  ;;  %7795 = vmatmul.mubr.msk.bf16.gmra.mrb[188].mxu1 %vm820_vm1, %v3667_v22  ;;  %v9596_v63 = vadd.f32 %v9443_v48, %v1714_v57  ;;  %v3083_v48 = vld [vmem:[#allocation2 + $0x2a3] ss:$2 sm:$0xff] }
 0x2a5   :  { %7690 = vmatprep.mubr.msk.bf16.mxu0 %vm8290_vm3, %v9528_v25  ;;  %7798 = vmatprep.mubr.msk.bf16.mxu1 %vm8290_vm3, %v9528_v25  ;;  %v3092_v59 = vpack.c.bf16 %v3085_v51, %v3083_v48 }
 0x2a7   :  { %v2029_v7 = vpop.f32.mrb[148].mxu0  ;;  %v9602_v31 = vpop.f32.mrb[84].mxu1 }
 0x2a8   :  { %v2084_v29 = vadd.f32 %v2029_v7, %v9465_v17  ;;  %v7452_v23 = vpop.f32.mrb[149].mxu0  ;;  %v7560_v14 = vpop.f32.mrb[85].mxu1  ;;  %v8064_v7 = vld [vmem:[%s10659_s3 + $0x1f0] sm:$0xff]  }
 0x2a9   :  { %v2032_v9 = vpop.f32.mrb[150].mxu0  ;;  %v9605_v47 = vpop.f32.mrb[86].mxu1 }
 0x2aa   :  { %v2085_v34 = vadd.f32 %v2032_v9, %v9470_v10  ;;  %v7453_v43 = vpop.f32.mrb[151].mxu0  ;;  %v7561_v45 = vpop.f32.mrb[87].mxu1  ;;  %v9609_v49 = vadd.f32 %v9458_v1, %v2084_v29  ;;  %v3443_v1 = vld [vmem:[#allocation2 + $0x49] ss:$2 sm:$0xff] }
 0x2ab   :  { %v3470_v28 = vpack.c.bf16 %v3445_v26, %v3443_v1 }
 0x2ac   :  { %7691 = vmatmul.mubr.msk.bf16.gmra.mrb[0].mxu0 %vm820_vm1, %v3092_v59  ;;  %7799 = vmatmul.mubr.msk.bf16.gmra.mrb[192].mxu1 %vm820_vm1, %v3668_v58  ;;  %v9614_v17 = vadd.f32 %v9461_v24, %v2085_v34  ;;  %v8062_v24 = vld [vmem:[%s10659_s3 + $0x1e0] sm:$0xff]   ;;  %v3451_v58 = vld [vmem:[#allocation2 + $0x109] ss:$2 sm:$0xff] }
 0x2ad   :  { %7738 = vmatprep.mubr.msk.bf16.mxu0 %vm8290_vm3, %v9528_v25 }
 0x2af   :  { %v2037_v3 = vpop.f32.mrb[152].mxu0  ;;  %v9618_v10 = vpop.f32.mrb[88].mxu1 }
 0x2b0   :  { %v2086_v38 = vadd.f32 %v2037_v3, %v9486_v53  ;;  %v7456_v5 = vpop.f32.mrb[153].mxu0  ;;  %v7564_v61 = vpop.f32.mrb[89].mxu1 }
 0x2b1   :  { %v2040_v54 = vpop.f32.mrb[154].mxu0  ;;  %v9621_v41 = vpop.f32.mrb[90].mxu1 }
 0x2b2   :  { %v2087_v4 = vadd.f32 %v2040_v54, %v9491_v39  ;;  %v7457_v44 = vpop.f32.mrb[155].mxu0  ;;  %v7565_v50 = vpop.f32.mrb[91].mxu1  ;;  %v9628_v35 = vadd.f32 %v9476_v18, %v2086_v38  ;;  %v3449_v18 = vld [vmem:[#allocation2 + $0xd9] ss:$2 sm:$0xff] }
 0x2b3   :  { %v3471_v23 = vpack.c.bf16 %v3449_v18, %v3447_v20 }
 0x2b4   :  { %7739 = vmatmul.mubr.msk.bf16.vlgmr.msra.gmra.mrb[4].mxu0 %vm820_vm1, %v3470_v28  ;;  %v9632_v53 = vadd.f32 %v9479_v62, %v2087_v4  ;;  %v3457_v28 = vld [vmem:[#allocation2 + $0x1c9] ss:$2 sm:$0xff] }
 0x2b5   :  { %7803 = vmatpush3.bf16.msra.mxu0 %v8062_v24  ;;  %7742 = vmatprep.mubr.msk.bf16.mxu0 %vm8290_vm3, %v9528_v25  ;;  %v3455_v24 = vld [vmem:[#allocation2 + $0x169] ss:$2 sm:$0xff] }
 0x2b6   :  { %7804 = vmatprep.subr.bf16.mxu0 %v9528_v25  ;;  %v3473_v18 = vpack.c.bf16 %v3457_v28, %v3455_v24 }
 0x2b7   :  { %v2045_v39 = vpop.f32.mrb[156].mxu0  ;;  %v9640_v57 = vpop.f32.mrb[92].mxu1 }
 0x2b8   :  { %v2088_v55 = vadd.f32 %v2045_v39, %v9512_v15  ;;  %v7460_v19 = vpop.f32.mrb[157].mxu0  ;;  %v7568_v30 = vpop.f32.mrb[93].mxu1 }
 0x2b9   :  { %v2048_v62 = vpop.f32.mrb[158].mxu0  ;;  %v9643_v22 = vpop.f32.mrb[94].mxu1  ;;  %7805 = vmatpush3.bf16.msra.mxu0 %v8063_v42 }
 0x2ba   :  { %v2089_v51 = vadd.f32 %v2048_v62, %v9517_v32  ;;  %v7461_v36 = vpop.f32.mrb[159].mxu0  ;;  %v7569_v29 = vpop.f32.mrb[95].mxu1  ;;  %7806 = vmatprep.subr.bf16.mxu0 %v9528_v25  ;;  %v9651_v15 = vadd.f32 %v9501_v56, %v2088_v55  ;;  %v8065_v32 = vld [vmem:[%s10659_s3 + $0x1f8] sm:$0xff]   ;;  %v3461_v62 = vld [vmem:[#allocation2 + $0x229] ss:$2 sm:$0xff] }
 0x2bb   :  { %v3453_v56 = vld [vmem:[#allocation2 + $0x139] ss:$2 sm:$0xff] }
 0x2bc   :  { %7743 = vmatmul.mubr.msk.bf16.gmra.mrb[8].mxu0 %vm820_vm1, %v3471_v23  ;;  %v9655_v14 = vadd.f32 %v9504_v21, %v2089_v51  ;;  %v3472_v5 = vpack.c.bf16 %v3453_v56, %v3451_v58 }
 0x2bd   :  { %7746 = vmatprep.mubr.msk.bf16.mxu0 %vm8290_vm3, %v9528_v25  ;;  %7807 = vmatpush3.bf16.msra.mxu0 %v8064_v7 }
 0x2be   :  { %7808 = vmatprep.subr.bf16.mxu0 %v9528_v25 }
 0x2bf   :  { %v2053_v9 = vpop.f32.mrb[160].mxu0  ;;  %v9663_v48 = vpop.f32.mrb[96].mxu1 }
 0x2c0   :  { %v2090_v34 = vadd.f32 %v2053_v9, %v9536_v12  ;;  %v7464_v43 = vpop.f32.mrb[161].mxu0  ;;  %v7572_v45 = vpop.f32.mrb[97].mxu1 }
 0x2c1   :  { %v2056_v21 = vpop.f32.mrb[162].mxu0  ;;  %v9666_v59 = vpop.f32.mrb[98].mxu1  ;;  %7809 = vmatpush3.bf16.msra.mxu0 %v8065_v32  ;;  %v3465_v43 = vld [vmem:[#allocation2 + $0x289] ss:$2 sm:$0xff] }
 0x2c2   :  { %v2091_v26 = vadd.f32 %v2056_v21, %v9542_v11  ;;  %v7465_v3 = vpop.f32.mrb[163].mxu0  ;;  %v7573_v38 = vpop.f32.mrb[99].mxu1  ;;  %v9670_v61 = vadd.f32 %v9526_v16, %v2090_v34 }
 0x2c4   :  { %7747 = vmatmul.mubr.msk.bf16.gmra.mrb[12].mxu0 %vm820_vm1, %v3472_v5  ;;  %v9674_v1 = vadd.f32 %v9532_v37, %v2091_v26 }
 0x2c5   :  { %7750 = vmatprep.mubr.msk.bf16.mxu0 %vm8290_vm3, %v9528_v25 }
 0x2c7   :  { %v2061_v12 = vpop.f32.mrb[164].mxu0  ;;  %v9678_v54 = vpop.f32.mrb[100].mxu1 }
 0x2c8   :  { %v2092_v11 = vadd.f32 %v2061_v12, %v9555_v33  ;;  %v7468_v4 = vpop.f32.mrb[165].mxu0  ;;  %v7576_v44 = vpop.f32.mrb[101].mxu1 }
 0x2c9   :  { %v2064_v50 = vpop.f32.mrb[166].mxu0  ;;  %v9681_v16 = vpop.f32.mrb[102].mxu1  ;;  %v3469_v4 = vld [vmem:[#allocation2 + $0x2e9] ss:$2 sm:$0xff] }
 0x2ca   :  { %v2093_v42 = vadd.f32 %v2064_v50, %v9560_v8  ;;  %v7469_v39 = vpop.f32.mrb[167].mxu0  ;;  %v7577_v37 = vpop.f32.mrb[103].mxu1  ;;  %v9685_v55 = vadd.f32 %v9548_v40, %v2092_v11  ;;  %v3459_v40 = vld [vmem:[#allocation2 + $0x1f9] ss:$2 sm:$0xff] }
 0x2cb   :  { %v3474_v32 = vpack.c.bf16 %v3461_v62, %v3459_v40  ;;  %v3467_v11 = vld [vmem:[#allocation2 + $0x2b9] ss:$2 sm:$0xff] }
 0x2cc   :  { %7751 = vmatmul.mubr.msk.bf16.gmra.mrb[16].mxu0 %vm820_vm1, %v3473_v18  ;;  %v9689_v19 = vadd.f32 %v9551_v0, %v2093_v42  ;;  %v3476_v18 = vpack.c.bf16 %v3469_v4, %v3467_v11  ;;  %v3827_v40 = vld [vmem:[#allocation2 + $0x4b] ss:$2 sm:$0xff] }
 0x2cd   :  { %7754 = vmatprep.mubr.msk.bf16.mxu0 %vm8290_vm3, %v9528_v25 }
 0x2cf   :  { %v2069_v33 = vpop.f32.mrb[168].mxu0  ;;  %v9693_v30 = vpop.f32.mrb[104].mxu1 }
 0x2d0   :  { %v2094_v8 = vadd.f32 %v2069_v33, %v9573_v60  ;;  %v7472_v20 = vpop.f32.mrb[169].mxu0  ;;  %v7580_v7 = vpop.f32.mrb[105].mxu1 }
 0x2d1   :  { %v2072_v51 = vpop.f32.mrb[170].mxu0  ;;  %v9696_v36 = vpop.f32.mrb[106].mxu1  ;;  %v3829_v20 = vld [vmem:[#allocation2 + $0x7b] ss:$2 sm:$0xff] }
 0x2d2   :  { %v2095_v29 = vadd.f32 %v2072_v51, %v9578_v27  ;;  %v7473_v23 = vpop.f32.mrb[171].mxu0  ;;  %v7581_v0 = vpop.f32.mrb[107].mxu1  ;;  %v9700_v9 = vadd.f32 %v9566_v13, %v2094_v8  ;;  %v3463_v13 = vld [vmem:[#allocation2 + $0x259] ss:$2 sm:$0xff] }
 0x2d3   :  { %v3475_v5 = vpack.c.bf16 %v3465_v43, %v3463_v13 }
 0x2d4   :  { %7755 = vmatmul.mubr.msk.bf16.gmra.mrb[20].mxu0 %vm820_vm1, %v3474_v32  ;;  %v9704_v56 = vadd.f32 %v9569_v52, %v2095_v29  ;;  %v3854_v32 = vpack.c.bf16 %v3829_v20, %v3827_v40 }
 0x2d5   :  { %7758 = vmatprep.mubr.msk.bf16.mxu0 %vm8290_vm3, %v9528_v25 }
 0x2d7   :  { %v2077_v60 = vpop.f32.mrb[172].mxu0  ;;  %v9708_v34 = vpop.f32.mrb[108].mxu1 }
 0x2d8   :  { %v2096_v27 = vadd.f32 %v2077_v60, %v9591_v2  ;;  %v7476_v45 = vpop.f32.mrb[173].mxu0  ;;  %v7584_v21 = vpop.f32.mrb[109].mxu1 }
 0x2d9   :  { %v2080_v58 = vpop.f32.mrb[174].mxu0  ;;  %v9711_v26 = vpop.f32.mrb[110].mxu1  ;;  %v3833_v45 = vld [vmem:[#allocation2 + $0xdb] ss:$2 sm:$0xff] }
 0x2da   :  { %v2097_v3 = vadd.f32 %v2080_v58, %v9596_v63  ;;  %v7477_v38 = vpop.f32.mrb[175].mxu0  ;;  %v7585_v52 = vpop.f32.mrb[111].mxu1  ;;  %v9715_v12 = vadd.f32 %v9584_v6, %v2096_v27 }
 0x2dc   :  { %7759 = vmatmul.mubr.msk.bf16.gmra.mrb[24].mxu0 %vm820_vm1, %v3475_v5  ;;  %v9719_v24 = vadd.f32 %v9587_v46, %v2097_v3 }
 0x2dd   :  { %7762 = vmatprep.mubr.msk.bf16.mxu0 %vm8290_vm3, %v9528_v25 }
 0x2df   :  { %v2413_v2 = vpop.f32.mrb[176].mxu0  ;;  %v9723_v28 = vpop.f32.mrb[112].mxu1 }
 0x2e0   :  { %v2468_v63 = vadd.f32 %v2413_v2, %v9609_v49  ;;  %v7524_v44 = vpop.f32.mrb[177].mxu0  ;;  %v7632_v50 = vpop.f32.mrb[113].mxu1 }
 0x2e1   :  { %v2416_v42 = vpop.f32.mrb[178].mxu0  ;;  %v9726_v6 = vpop.f32.mrb[114].mxu1 }
 0x2e2   :  { %v2469_v39 = vadd.f32 %v2416_v42, %v9614_v17  ;;  %v7525_v37 = vpop.f32.mrb[179].mxu0  ;;  %v7633_v46 = vpop.f32.mrb[115].mxu1  ;;  %v9730_v33 = vadd.f32 %v9602_v31, %v2468_v63  ;;  %v3837_v63 = vld [vmem:[#allocation2 + $0x13b] ss:$2 sm:$0xff] }
 0x2e4   :  { %7763 = vmatmul.mubr.msk.bf16.gmra.mrb[28].mxu0 %vm820_vm1, %v3476_v18  ;;  %v9734_v62 = vadd.f32 %v9605_v47, %v2469_v39 }
 0x2e5   :  { %7810 = vmatprep.mubr.msk.bf16.mxu0 %vm8290_vm3, %v9528_v25 }
 0x2e7   :  { %v2421_v49 = vpop.f32.mrb[180].mxu0  ;;  %v9738_v8 = vpop.f32.mrb[116].mxu1 }
 0x2e8   :  { %v2470_v17 = vadd.f32 %v2421_v49, %v9628_v35  ;;  %v7528_v7 = vpop.f32.mrb[181].mxu0  ;;  %v7636_v51 = vpop.f32.mrb[117].mxu1 }
 0x2e9   :  { %v2424_v29 = vpop.f32.mrb[182].mxu0  ;;  %v9741_v31 = vpop.f32.mrb[118].mxu1  ;;  %v3839_v7 = vld [vmem:[#allocation2 + $0x16b] ss:$2 sm:$0xff] }
 0x2ea   :  { %v2471_v23 = vadd.f32 %v2424_v29, %v9632_v53  ;;  %v7529_v0 = vpop.f32.mrb[183].mxu0  ;;  %v7637_v47 = vpop.f32.mrb[119].mxu1  ;;  %v9745_v60 = vadd.f32 %v9618_v10, %v2470_v17  ;;  %v3831_v10 = vld [vmem:[#allocation2 + $0xab] ss:$2 sm:$0xff] }
 0x2eb   :  { %v3855_v5 = vpack.c.bf16 %v3833_v45, %v3831_v10  ;;  %v3841_v51 = vld [vmem:[#allocation2 + $0x1cb] ss:$2 sm:$0xff] }
 0x2ec   :  { %7811 = vmatmul.mubr.msk.bf16.vlgmr.msra.gmra.mrb[32].mxu0 %vm820_vm1, %v3854_v32  ;;  %v9749_v43 = vadd.f32 %v9621_v41, %v2471_v23  ;;  %v3857_v32 = vpack.c.bf16 %v3841_v51, %v3839_v7 }
 0x2ed   :  { %7814 = vmatprep.mubr.msk.bf16.mxu0 %vm8290_vm3, %v9528_v25 }
 0x2ef   :  { %v2429_v35 = vpop.f32.mrb[184].mxu0  ;;  %v9753_v27 = vpop.f32.mrb[120].mxu1 }
 0x2f0   :  { %v2472_v53 = vadd.f32 %v2429_v35, %v9651_v15  ;;  %v7532_v21 = vpop.f32.mrb[185].mxu0  ;;  %v7640_v58 = vpop.f32.mrb[121].mxu1 }
 0x2f1   :  { %v2432_v13 = vpop.f32.mrb[186].mxu0  ;;  %v9756_v3 = vpop.f32.mrb[122].mxu1  ;;  %v3845_v21 = vld [vmem:[#allocation2 + $0x22b] ss:$2 sm:$0xff] }
 0x2f2   :  { %v2473_v38 = vadd.f32 %v2432_v13, %v9655_v14  ;;  %v7533_v52 = vpop.f32.mrb[187].mxu0  ;;  %v7641_v41 = vpop.f32.mrb[123].mxu1  ;;  %v9760_v2 = vadd.f32 %v9640_v57, %v2472_v53  ;;  %v3835_v57 = vld [vmem:[#allocation2 + $0x10b] ss:$2 sm:$0xff] }
 0x2f3   :  { %v3856_v18 = vpack.c.bf16 %v3837_v63, %v3835_v57 }
 0x2f4   :  { %7815 = vmatmul.mubr.msk.bf16.gmra.mrb[36].mxu0 %vm820_vm1, %v3855_v5  ;;  %v9764_v11 = vadd.f32 %v9643_v22, %v2473_v38 }
 0x2f5   :  { %7818 = vmatprep.mubr.msk.bf16.mxu0 %vm8290_vm3, %v9528_v25 }
 0x2f7   :  { %v2437_v15 = vpop.f32.mrb[188].mxu0  ;;  %v9768_v4 = vpop.f32.mrb[124].mxu1 }
 0x2f8   :  { %v2474_v14 = vadd.f32 %v2437_v15, %v9670_v61  ;;  %v7536_v44 = vpop.f32.mrb[189].mxu0  ;;  %v7644_v50 = vpop.f32.mrb[125].mxu1 }
 0x2f9   :  { %v2440_v42 = vpop.f32.mrb[190].mxu0  ;;  %v9771_v39 = vpop.f32.mrb[126].mxu1  ;;  %v3849_v44 = vld [vmem:[#allocation2 + $0x28b] ss:$2 sm:$0xff] }
 0x2fa   :  { %v2475_v37 = vadd.f32 %v2440_v42, %v9674_v1  ;;  %v7537_v46 = vpop.f32.mrb[191].mxu0  ;;  %v7645_v22 = vpop.f32.mrb[127].mxu1  ;;  %v9775_v49 = vadd.f32 %v9663_v48, %v2474_v14 }
 0x2fc   :  { %7819 = vmatmul.mubr.msk.bf16.gmra.mrb[40].mxu0 %vm820_vm1, %v3856_v18  ;;  %v9779_v20 = vadd.f32 %v9666_v59, %v2475_v37 }
 0x2fd   :  { %7822 = vmatprep.mubr.msk.bf16.mxu0 %vm8290_vm3, %v9528_v25 }
 0x2ff   :  { %v2445_v61 = vpop.f32.mrb[192].mxu0  ;;  %v9783_v17 = vpop.f32.mrb[128].mxu1 }
 0x300   :  { %v2476_v1 = vadd.f32 %v2445_v61, %v9685_v55  ;;  %v7540_v40 = vpop.f32.mrb[193].mxu0  ;;  %v7648_v29 = vpop.f32.mrb[129].mxu1 }
 0x301   :  { %v2448_v23 = vpop.f32.mrb[194].mxu0  ;;  %v9786_v48 = vpop.f32.mrb[130].mxu1  ;;  %v3853_v40 = vld [vmem:[#allocation2 + $0x2eb] ss:$2 sm:$0xff] }
 0x302   :  { %v2477_v0 = vadd.f32 %v2448_v23, %v9689_v19  ;;  %v7541_v47 = vpop.f32.mrb[195].mxu0  ;;  %v7649_v59 = vpop.f32.mrb[131].mxu1  ;;  %v9790_v35 = vadd.f32 %v9678_v54, %v2476_v1  ;;  %v3843_v54 = vld [vmem:[#allocation2 + $0x1fb] ss:$2 sm:$0xff] }
 0x303   :  { %v3858_v5 = vpack.c.bf16 %v3845_v21, %v3843_v54  ;;  %v3851_v1 = vld [vmem:[#allocation2 + $0x2bb] ss:$2 sm:$0xff] }
 0x304   :  { %7823 = vmatmul.mubr.msk.bf16.gmra.mrb[44].mxu0 %vm820_vm1, %v3857_v32  ;;  %v9794_v45 = vadd.f32 %v9681_v16, %v2477_v0  ;;  %v3860_v32 = vpack.c.bf16 %v3853_v40, %v3851_v1 }
 0x305   :  { %7826 = vmatprep.mubr.msk.bf16.mxu0 %vm8290_vm3, %v9528_v25 }
 0x307   :  { %v2453_v55 = vpop.f32.mrb[196].mxu0  ;;  %v9798_v53 = vpop.f32.mrb[132].mxu1 }
 0x308   :  { %v2478_v19 = vadd.f32 %v2453_v55, %v9700_v9  ;;  %v7544_v58 = vpop.f32.mrb[197].mxu0  ;;  %v7652_v13 = vpop.f32.mrb[133].mxu1 }
 0x309   :  { %v2456_v10 = vpop.f32.mrb[198].mxu0  ;;  %v9801_v38 = vpop.f32.mrb[134].mxu1 }
 0x30a   :  { %v2479_v52 = vadd.f32 %v2456_v10, %v9704_v56  ;;  %v7545_v41 = vpop.f32.mrb[199].mxu0  ;;  %v7653_v16 = vpop.f32.mrb[135].mxu1  ;;  %v9805_v15 = vadd.f32 %v9693_v30, %v2478_v19  ;;  %v3847_v30 = vld [vmem:[#allocation2 + $0x25b] ss:$2 sm:$0xff] }
 0x30b   :  { %v3859_v18 = vpack.c.bf16 %v3849_v44, %v3847_v30 }
 0x30c   :  { %7827 = vmatmul.mubr.msk.bf16.gmra.mrb[48].mxu0 %vm820_vm1, %v3858_v5  ;;  %v9809_v63 = vadd.f32 %v9696_v36, %v2479_v52 }
 0x30d   :  { %7830 = vmatprep.mubr.msk.bf16.mxu0 %vm8290_vm3, %v9528_v25 }
 0x30f   :  { %v2461_v9 = vpop.f32.mrb[200].mxu0  ;;  %v9813_v14 = vpop.f32.mrb[136].mxu1 }
 0x310   :  { %v2480_v56 = vadd.f32 %v2461_v9, %v9715_v12  ;;  %v7548_v50 = vpop.f32.mrb[201].mxu0  ;;  %v7656_v42 = vpop.f32.mrb[137].mxu1 }
 0x311   :  { %v2464_v57 = vpop.f32.mrb[202].mxu0  ;;  %v9816_v37 = vpop.f32.mrb[138].mxu1 }
 0x312   :  { %v2481_v46 = vadd.f32 %v2464_v57, %v9719_v24  ;;  %v7549_v22 = vpop.f32.mrb[203].mxu0  ;;  %v7657_v36 = vpop.f32.mrb[139].mxu1  ;;  %v9820_v61 = vadd.f32 %v9708_v34, %v2480_v56 }
 0x314   :  { %7831 = vmatmul.mubr.msk.bf16.gmra.mrb[52].mxu0 %vm820_vm1, %v3859_v18  ;;  %v9824_v7 = vadd.f32 %v9711_v26, %v2481_v46 }
 0x315   :  { %7834 = vmatprep.mubr.msk.bf16.mxu0 %vm8290_vm3, %v9528_v25 }
 0x317   :  { %v2797_v12 = vpop.f32.mrb[204].mxu0  ;;  %v9828_v51 = vpop.f32.mrb[140].mxu1 }
 0x318   :  { %v2852_v24 = vadd.f32 %v2797_v12, %v9730_v33  ;;  %v7596_v29 = vpop.f32.mrb[205].mxu0  ;;  %v7704_v23 = vpop.f32.mrb[141].mxu1 }
 0x319   :  { %v2800_v0 = vpop.f32.mrb[206].mxu0  ;;  %v9831_v34 = vpop.f32.mrb[142].mxu1  ;;  %v8071_v29 = vld [vmem:[%s10661_s5 + $0x84] ss:$8 sps:$4 sm:$0xff]  }
 0x31a   :  { %v2853_v47 = vadd.f32 %v2800_v0, %v9734_v62  ;;  %v7597_v59 = vpop.f32.mrb[207].mxu0  ;;  %v7705_v26 = vpop.f32.mrb[143].mxu1  ;;  %v9835_v55 = vadd.f32 %v9723_v28, %v2852_v24  ;;  %v8069_v24 = vld [vmem:[%s10661_s5 + $0x80] ss:$8 sps:$4 sm:$0xff]   ;;  %4302 = vmatprep.subr.bf16.mxu0 %v8071_v29 }
 0x31b   :  { %4303 = vmatpush1.bf16.msra.mxu0 %v8069_v24  ;;  %v8072_v26 = vld [vmem:[%s10661_s5 + $0x90] ss:$8 sps:$4 sm:$0xff]  }
 0x31c   :  { %7835 = vmatmul.mubr.msk.bf16.gmra.mrb[56].mxu0 %vm820_vm1, %v3860_v32  ;;  %v9839_v25 = vadd.f32 %v9726_v6, %v2853_v47 }
 0x31f   :  { %v2805_v21 = vpop.f32.mrb[208].mxu0  ;;  %v9841_v33 = vpop.f32.mrb[144].mxu1 }
 0x320   :  { %v2854_v19 = vadd.f32 %v2805_v21, %v9745_v60  ;;  %v7600_v58 = vpop.f32.mrb[209].mxu0  ;;  %v7708_v13 = vpop.f32.mrb[145].mxu1 }
 0x321   :  { %v2808_v10 = vpop.f32.mrb[210].mxu0  ;;  %v9844_v62 = vpop.f32.mrb[146].mxu1 }
 0x322   :  { %v2855_v54 = vadd.f32 %v2808_v10, %v9749_v43  ;;  %v7601_v52 = vpop.f32.mrb[211].mxu0  ;;  %v7709_v28 = vpop.f32.mrb[147].mxu1  ;;  %v9848_v41 = vadd.f32 %v9738_v8, %v2854_v19  ;;  %v8075_v19 = vld [vmem:[%s10661_s5 + $0x10] ss:$8 sps:$4 sm:$0xff]  }
 0x323   :  { %v8078_v52 = vld [vmem:[%s10661_s5 + $0xa0] ss:$8 sps:$4 sm:$0xff]   ;;  %v8080_v28 = vld [vmem:[%s10661_s5 + $0xa4] ss:$8 sps:$4 sm:$0xff]  }
 0x324   :  { %v9851_v6 = vadd.f32 %v9741_v31, %v2855_v54 }
 0x327   :  { %v2813_v16 = vpop.f32.mrb[212].mxu0  ;;  %v9853_v5 = vpop.f32.mrb[148].mxu1 }
 0x328   :  { %v2856_v60 = vadd.f32 %v2813_v16, %v9760_v2  ;;  %v7604_v9 = vpop.f32.mrb[213].mxu0  ;;  %v7712_v44 = vpop.f32.mrb[149].mxu1 }
 0x329   :  { %v2816_v56 = vpop.f32.mrb[214].mxu0  ;;  %v9856_v50 = vpop.f32.mrb[150].mxu1 }
 0x32a   :  { %v2857_v43 = vadd.f32 %v2816_v56, %v9764_v11  ;;  %v7605_v42 = vpop.f32.mrb[215].mxu0  ;;  %v7713_v57 = vpop.f32.mrb[151].mxu1  ;;  %v9860_v8 = vadd.f32 %v9753_v27, %v2856_v60  ;;  %v8066_v11 = vld [vmem:[%s10661_s5] ss:$8 sps:$4 sm:$0xff]  }
 0x32c   :  { %v9863_v31 = vadd.f32 %v9756_v3, %v2857_v43 }
 0x32f   :  { %v2821_v30 = vpop.f32.mrb[216].mxu0  ;;  %v9865_v46 = vpop.f32.mrb[152].mxu1 }
 0x330   :  { %v2858_v2 = vadd.f32 %v2821_v30, %v9775_v49  ;;  %v7608_v22 = vpop.f32.mrb[217].mxu0  ;;  %v7716_v36 = vpop.f32.mrb[153].mxu1  ;;  %v8068_v49 = vld [vmem:[%s10661_s5 + $0x4] ss:$8 sps:$4 sm:$0xff]  }
 0x331   :  { %v2824_v18 = vpop.f32.mrb[218].mxu0  ;;  %v9868_v12 = vpop.f32.mrb[154].mxu1  ;;  %4455 = vmatprep.subr.bf16.mxu1 %v8068_v49 }
 0x332   :  { %v2859_v27 = vadd.f32 %v2824_v18, %v9779_v20  ;;  %v7609_v1 = vpop.f32.mrb[219].mxu0  ;;  %v7717_v40 = vpop.f32.mrb[155].mxu1  ;;  %v9875_v3 = vadd.f32 %v9768_v4, %v2858_v2  ;;  %4456 = vmatpush1.bf16.msra.mxu1 %v8066_v11 }
 0x334   :  { %v9887_v23 = vadd.f32 %v9771_v39, %v2859_v27  ;;  %v8074_v39 = vld [vmem:[%s10661_s5 + $0x94] ss:$8 sps:$4 sm:$0xff]  }
 0x335   :  { %4304 = vmatprep.subr.bf16.mxu0 %v8074_v39  ;;  %v8086_v27 = vld [vmem:[%s10661_s5 + $0xb4] ss:$8 sps:$4 sm:$0xff]  }
 0x336   :  { %4305 = vmatpush1.bf16.msra.mxu0 %v8072_v26 }
 0x337   :  { %v2829_v4 = vpop.f32.mrb[220].mxu0  ;;  %v9889_v20 = vpop.f32.mrb[156].mxu1  ;;  %4306 = vmatprep.subr.bf16.mxu0 %v8080_v28 }
 0x338   :  { %v2860_v0 = vadd.f32 %v2829_v4, %v9790_v35  ;;  %v7612_v47 = vpop.f32.mrb[221].mxu0  ;;  %v7720_v59 = vpop.f32.mrb[157].mxu1  ;;  %v8077_v35 = vld [vmem:[%s10661_s5 + $0x14] ss:$8 sps:$4 sm:$0xff]  }
 0x339   :  { %v2832_v32 = vpop.f32.mrb[222].mxu0  ;;  %v9898_v21 = vpop.f32.mrb[158].mxu1  ;;  %4457 = vmatprep.subr.bf16.mxu1 %v8077_v35 }
 0x33a   :  { %v2861_v58 = vadd.f32 %v2832_v32, %v9794_v45  ;;  %v7613_v13 = vpop.f32.mrb[223].mxu0  ;;  %v7721_v10 = vpop.f32.mrb[159].mxu1  ;;  %v9908_v54 = vadd.f32 %v9783_v17, %v2860_v0  ;;  %v8081_v45 = vld [vmem:[%s10661_s5 + $0x20] ss:$8 sps:$4 sm:$0xff]   ;;  %v8083_v17 = vld [vmem:[%s10661_s5 + $0x24] ss:$8 sps:$4 sm:$0xff]   ;;  %4458 = vmatpush1.bf16.msra.mxu1 %v8075_v19  ;;  %4307 = vmatpush1.bf16.msra.mxu0 %v8078_v52 }
 0x33b   :  { %4459 = vmatprep.subr.bf16.mxu1 %v8083_v17  ;;  %4308 = vmatprep.subr.bf16.mxu0 %v8086_v27  ;;  %v8096_v17 = vld [vmem:[%s10661_s5 + $0xd0] ss:$8 sps:$4 sm:$0xff]  }
 0x33c   :  { %v9923_v16 = vadd.f32 %v9786_v48, %v2861_v58 }
 0x33e   :  { %4460 = vmatpush1.bf16.msra.mxu1 %v8081_v45  ;;  %v8098_v45 = vld [vmem:[%s10661_s5 + $0xd4] ss:$8 sps:$4 sm:$0xff]  }
 0x33f   :  { %v2837_v60 = vpop.f32.mrb[224].mxu0  ;;  %v9925_v9 = vpop.f32.mrb[160].mxu1 }
 0x340   :  { %v2862_v44 = vadd.f32 %v2837_v60, %v9805_v15  ;;  %v7616_v56 = vpop.f32.mrb[225].mxu0  ;;  %v7724_v43 = vpop.f32.mrb[161].mxu1  ;;  %v8084_v15 = vld [vmem:[%s10661_s5 + $0xb0] ss:$8 sps:$4 sm:$0xff]  }
 0x341   :  { %v2840_v42 = vpop.f32.mrb[226].mxu0  ;;  %v9928_v57 = vpop.f32.mrb[162].mxu1  ;;  %4309 = vmatpush1.bf16.msra.mxu0 %v8084_v15  ;;  %v8107_v56 = vld [vmem:[%s10661_s5 + $0x64] ss:$8 sps:$4 sm:$0xff]   ;;  %v8110_v15 = vld [vmem:[%s10661_s5 + $0xf4] ss:$8 sps:$4 sm:$0xff]  }
 0x342   :  { %v2863_v30 = vadd.f32 %v2840_v42, %v9809_v63  ;;  %v7617_v2 = vpop.f32.mrb[227].mxu0  ;;  %v7725_v48 = vpop.f32.mrb[163].mxu1  ;;  %v9932_v22 = vadd.f32 %v9798_v53, %v2862_v44  ;;  %v8087_v53 = vld [vmem:[%s10661_s5 + $0x30] ss:$8 sps:$4 sm:$0xff]   ;;  %v8104_v44 = vld [vmem:[%s10661_s5 + $0xe4] ss:$8 sps:$4 sm:$0xff]  }
 0x344   :  { %v9935_v36 = vadd.f32 %v9801_v38, %v2863_v30  ;;  %v8089_v38 = vld [vmem:[%s10661_s5 + $0x34] ss:$8 sps:$4 sm:$0xff]  }
 0x345   :  { %4461 = vmatprep.subr.bf16.mxu1 %v8089_v38 }
 0x346   :  { %4462 = vmatpush1.bf16.msra.mxu1 %v8087_v53 }
 0x347   :  { %v2845_v18 = vpop.f32.mrb[228].mxu0  ;;  %v9937_v11 = vpop.f32.mrb[164].mxu1 }
 0x348   :  { %v2864_v63 = vadd.f32 %v2845_v18, %v9820_v61  ;;  %v7620_v1 = vpop.f32.mrb[229].mxu0  ;;  %v7728_v40 = vpop.f32.mrb[165].mxu1  ;;  %v8105_v18 = vld [vmem:[%s10661_s5 + $0x60] ss:$8 sps:$4 sm:$0xff]  }
 0x349   :  { %v2848_v49 = vpop.f32.mrb[230].mxu0  ;;  %v9952_v24 = vpop.f32.mrb[166].mxu1  ;;  %v8113_v1 = vld [vmem:[%s10661_s5 + $0x74] ss:$8 sps:$4 sm:$0xff]  }
 0x34a   :  { %v2865_v29 = vadd.f32 %v2848_v49, %v9824_v7  ;;  %v7621_v4 = vpop.f32.mrb[231].mxu0  ;;  %v7729_v0 = vpop.f32.mrb[167].mxu1  ;;  %v9956_v61 = vadd.f32 %v9813_v14, %v2864_v63  ;;  %v8090_v7 = vld [vmem:[%s10661_s5 + $0xc0] ss:$8 sps:$4 sm:$0xff]   ;;  %v8092_v14 = vld [vmem:[%s10661_s5 + $0xc4] ss:$8 sps:$4 sm:$0xff]  }
 0x34b   :  { %4310 = vmatprep.subr.bf16.mxu0 %v8092_v14  ;;  %v8291_v4 = vmov 0  }
 0x34c   :  { %v9959_v47 = vadd.f32 %v9816_v37, %v2865_v29  ;;  %v8093_v37 = vld [vmem:[%s10661_s5 + $0x40] ss:$8 sps:$4 sm:$0xff]   ;;  %4311 = vmatpush1.bf16.msra.mxu0 %v8090_v7  ;;  %v8111_v29 = vld [vmem:[%s10661_s5 + $0x70] ss:$8 sps:$4 sm:$0xff]   ;;  %4334 = vmatprep.mubr.bf16.mxu0 %v8291_v4 }
 0x34d   :  { %4312 = vmatprep.subr.bf16.mxu0 %v8098_v45  ;;  %4487 = vmatprep.mubr.bf16.mxu1 %v8291_v4 }
 0x34f   :  { %v3181_v59 = vpop.f32.mrb[232].mxu0  ;;  %v9961_v26 = vpop.f32.mrb[168].mxu1 }
 0x350   :  { %v3236_v39 = vadd.f32 %v3181_v59, %v9835_v55  ;;  %v7668_v32 = vpop.f32.mrb[233].mxu0  ;;  %v7776_v19 = vpop.f32.mrb[169].mxu1  ;;  %v8095_v55 = vld [vmem:[%s10661_s5 + $0x44] ss:$8 sps:$4 sm:$0xff]   ;;  %4313 = vmatpush1.bf16.msra.mxu0 %v8096_v17 }
 0x351   :  { %v3184_v35 = vpop.f32.mrb[234].mxu0  ;;  %v9970_v58 = vpop.f32.mrb[170].mxu1  ;;  %4463 = vmatprep.subr.bf16.mxu1 %v8095_v55  ;;  %4314 = vmatprep.subr.bf16.mxu0 %v8104_v44 }
 0x352   :  { %v3237_v13 = vadd.f32 %v3184_v35, %v9839_v25  ;;  %v7669_v10 = vpop.f32.mrb[235].mxu0  ;;  %v7777_v52 = vpop.f32.mrb[171].mxu1  ;;  %v9980_v28 = vadd.f32 %v9828_v51, %v3236_v39  ;;  %v8101_v25 = vld [vmem:[%s10661_s5 + $0x54] ss:$8 sps:$4 sm:$0xff]   ;;  %4464 = vmatpush1.bf16.msra.mxu1 %v8093_v37  ;;  %v8099_v51 = vld [vmem:[%s10661_s5 + $0x50] ss:$8 sps:$4 sm:$0xff]  }
 0x353   :  { %4465 = vmatprep.subr.bf16.mxu1 %v8101_v25 }
 0x354   :  { %v9992_v60 = vadd.f32 %v9831_v34, %v3237_v13  ;;  %v8102_v34 = vld [vmem:[%s10661_s5 + $0xe0] ss:$8 sps:$4 sm:$0xff]  }
 0x355   :  { %4315 = vmatpush1.bf16.msra.mxu0 %v8102_v34 }
 0x356   :  { %4466 = vmatpush1.bf16.msra.mxu1 %v8099_v51  ;;  %4316 = vmatprep.subr.bf16.mxu0 %v8110_v15 }
 0x357   :  { %v3189_v43 = vpop.f32.mrb[236].mxu0  ;;  %v10003_v42 = vpop.f32.mrb[172].mxu1  ;;  %4467 = vmatprep.subr.bf16.mxu1 %v8107_v56 }
 0x358   :  { %v3238_v30 = vadd.f32 %v3189_v43, %v9848_v41  ;;  %v7672_v2 = vpop.f32.mrb[237].mxu0  ;;  %v7780_v48 = vpop.f32.mrb[173].mxu1  ;;  %v8108_v41 = vld [vmem:[%s10661_s5 + $0xf0] ss:$8 sps:$4 sm:$0xff]  }
 0x359   :  { %v3192_v27 = vpop.f32.mrb[238].mxu0  ;;  %v10015_v63 = vpop.f32.mrb[174].mxu1  ;;  %4317 = vmatpush1.bf16.msra.mxu0 %v8108_v41 }
 0x35a   :  { %v3239_v40 = vadd.f32 %v3192_v27, %v9851_v6  ;;  %v7673_v53 = vpop.f32.mrb[239].mxu0  ;;  %v7781_v38 = vpop.f32.mrb[175].mxu1  ;;  %v10025_v49 = vadd.f32 %v9841_v33, %v3238_v30  ;;  %4468 = vmatpush1.bf16.msra.mxu1 %v8105_v18 }
 0x35b   :  { %4469 = vmatprep.subr.bf16.mxu1 %v8113_v1 }
 0x35c   :  { %v10033_v0 = vadd.f32 %v9844_v62, %v3239_v40 }
 0x35e   :  { %4470 = vmatpush1.bf16.msra.mxu1 %v8111_v29 }
 0x35f   :  { %v3197_v6 = vpop.f32.mrb[240].mxu0  ;;  %v10035_v59 = vpop.f32.mrb[176].mxu1 }
 0x360   :  { %v3240_v33 = vadd.f32 %v3197_v6, %v9860_v8  ;;  %v7676_v39 = vpop.f32.mrb[241].mxu0  ;;  %v7784_v32 = vpop.f32.mrb[177].mxu1 }
 0x361   :  { %v3200_v19 = vpop.f32.mrb[242].mxu0  ;;  %v10038_v7 = vpop.f32.mrb[178].mxu1 }
 0x362   :  { %v3241_v14 = vadd.f32 %v3200_v19, %v9863_v31  ;;  %v7677_v35 = vpop.f32.mrb[243].mxu0  ;;  %v7785_v62 = vpop.f32.mrb[179].mxu1  ;;  %v10042_v37 = vadd.f32 %v9853_v5, %v3240_v33 }
 0x364   :  { %v10045_v55 = vadd.f32 %v9856_v50, %v3241_v14 }
 0x367   :  { %v3205_v13 = vpop.f32.mrb[244].mxu0  ;;  %v10047_v10 = vpop.f32.mrb[180].mxu1 }
 0x368   :  { %v3242_v8 = vadd.f32 %v3205_v13, %v9875_v3  ;;  %v7680_v52 = vpop.f32.mrb[245].mxu0  ;;  %v7788_v45 = vpop.f32.mrb[181].mxu1  ;;  %v8116_v3 = vld [vmem:[%s10661_s5 + $0x104] ss:$8 sps:$4 sm:$0xff]  }
 0x369   :  { %v3208_v17 = vpop.f32.mrb[246].mxu0  ;;  %v10050_v25 = vpop.f32.mrb[182].mxu1  ;;  %4645 = vmatprep.subr.bf16.mxu1 %v8116_v3 }
 0x36a   :  { %v3243_v31 = vadd.f32 %v3208_v17, %v9887_v23  ;;  %v7681_v51 = vpop.f32.mrb[247].mxu0  ;;  %v7789_v44 = vpop.f32.mrb[183].mxu1  ;;  %v10054_v5 = vadd.f32 %v9865_v46, %v3242_v8 }
 0x36c   :  { %v10057_v50 = vadd.f32 %v9868_v12, %v3243_v31 }
 0x36f   :  { %v3213_v56 = vpop.f32.mrb[248].mxu0  ;;  %v10059_v43 = vpop.f32.mrb[184].mxu1 }
 0x370   :  { %v3244_v34 = vadd.f32 %v3213_v56, %v9908_v54  ;;  %v7684_v30 = vpop.f32.mrb[249].mxu0  ;;  %v7792_v2 = vpop.f32.mrb[185].mxu1 }
 0x371   :  { %v3216_v23 = vpop.f32.mrb[250].mxu0  ;;  %v10065_v48 = vpop.f32.mrb[186].mxu1 }
 0x372   :  { %v3245_v46 = vadd.f32 %v3216_v23, %v9923_v16  ;;  %v7685_v18 = vpop.f32.mrb[251].mxu0  ;;  %v7793_v12 = vpop.f32.mrb[187].mxu1  ;;  %v3436_v15 = vadd.f32 %v9889_v20, %v3244_v34 }
 0x374   :  { %v3437_v27 = vadd.f32 %v9898_v21, %v3245_v46 }
 0x377   :  { %v3221_v41 = vpop.f32.mrb[252].mxu0  ;;  %v10070_v1 = vpop.f32.mrb[188].mxu1 }
 0x378   :  { %v3246_v40 = vadd.f32 %v3221_v41, %v9932_v22  ;;  %v7688_v54 = vpop.f32.mrb[253].mxu0  ;;  %v7796_v53 = vpop.f32.mrb[189].mxu1 }
 0x379   :  { %v3224_v38 = vpop.f32.mrb[254].mxu0  ;;  %v10073_v29 = vpop.f32.mrb[190].mxu1 }
 0x37a   :  { %v3247_v6 = vadd.f32 %v3224_v38, %v9935_v36  ;;  %v7689_v33 = vpop.f32.mrb[255].mxu0  ;;  %v7797_v16 = vpop.f32.mrb[191].mxu1  ;;  %v3438_v39 = vadd.f32 %v9925_v9, %v3246_v40 }
 0x37c   :  { %v3439_v20 = vadd.f32 %v9928_v57, %v3247_v6 }
 0x37f   :  { %v3229_v32 = vpop.f32.mrb[0].mxu0  ;;  %v10078_v21 = vpop.f32.mrb[192].mxu1 }
 0x380   :  { %v3248_v19 = vadd.f32 %v3229_v32, %v9956_v61  ;;  %v7692_v14 = vpop.f32.mrb[1].mxu0  ;;  %v7800_v22 = vpop.f32.mrb[193].mxu1 }
 0x381   :  { %v3232_v35 = vpop.f32.mrb[2].mxu0  ;;  %v3808_v62 = vpop.f32.mrb[194].mxu1 }
 0x382   :  { %v3249_v13 = vadd.f32 %v3232_v35, %v9959_v47  ;;  %v7693_v8 = vpop.f32.mrb[3].mxu0  ;;  %v7801_v52 = vpop.f32.mrb[195].mxu1  ;;  %v3440_v36 = vadd.f32 %v9937_v11, %v3248_v19 }
 0x384   :  { %v3441_v45 = vadd.f32 %v9952_v24, %v3249_v13 }
 0x387   :  { %v3565_v9 = vpop.f32.mrb[4].mxu0 }
 0x388   :  { %v3620_v57 = vadd.f32 %v3565_v9, %v9980_v28  ;;  %v7740_v17 = vpop.f32.mrb[5].mxu0 }
 0x389   :  { %v3568_v31 = vpop.f32.mrb[6].mxu0 }
 0x38a   :  { %v3621_v51 = vadd.f32 %v3568_v31, %v9992_v60  ;;  %v7741_v61 = vpop.f32.mrb[7].mxu0  ;;  %v3812_v44 = vadd.f32 %v9961_v26, %v3620_v57 }
 0x38c   :  { %v3813_v56 = vadd.f32 %v9970_v58, %v3621_v51 }
 0x38f   :  { %v3573_v3 = vpop.f32.mrb[8].mxu0 }
 0x390   :  { %v3622_v47 = vadd.f32 %v3573_v3, %v10025_v49  ;;  %v7744_v34 = vpop.f32.mrb[9].mxu0 }
 0x391   :  { %v3576_v30 = vpop.f32.mrb[10].mxu0 }
 0x392   :  { %v3623_v11 = vadd.f32 %v3576_v30, %v10033_v0  ;;  %v7745_v24 = vpop.f32.mrb[11].mxu0  ;;  %v3814_v2 = vadd.f32 %v10003_v42, %v3622_v47 }
 0x394   :  { %v10092_v28 = vadd.f32 %v10015_v63, %v3623_v11 }
 0x397   :  { %v3581_v23 = vpop.f32.mrb[12].mxu0 }
 0x398   :  { %v3624_v60 = vadd.f32 %v3581_v23, %v10042_v37  ;;  %v7748_v46 = vpop.f32.mrb[13].mxu0 }
 0x399   :  { %v3584_v26 = vpop.f32.mrb[14].mxu0 }
 0x39a   :  { %v3625_v58 = vadd.f32 %v3584_v26, %v10045_v55  ;;  %v7749_v18 = vpop.f32.mrb[15].mxu0  ;;  %v10097_v49 = vadd.f32 %v10035_v59, %v3624_v60  ;;  %v4186_v60 = vld [vmem:[#allocation3 + $0x1] ss:$2 sm:$0xff] }
 0x39c   :  { %v10100_v12 = vadd.f32 %v10038_v7, %v3625_v58  ;;  %v4150_v58 = vld [vmem:[#allocation3] ss:$2 sm:$0xff] }
 0x39f   :  { %v3589_v0 = vpop.f32.mrb[16].mxu0 }
 0x3a0   :  { %v3626_v42 = vadd.f32 %v3589_v0, %v10054_v5  ;;  %v7752_v41 = vpop.f32.mrb[17].mxu0 }
 0x3a1   :  { %v3592_v63 = vpop.f32.mrb[18].mxu0 }
 0x3a2   :  { %v3627_v40 = vadd.f32 %v3592_v63, %v10057_v50  ;;  %v7753_v54 = vpop.f32.mrb[19].mxu0  ;;  %v10105_v37 = vadd.f32 %v10047_v10, %v3626_v42 }
 0x3a4   :  { %v10108_v55 = vadd.f32 %v10050_v25, %v3627_v40 }
 0x3a7   :  { %v3597_v53 = vpop.f32.mrb[20].mxu0 }
 0x3a8   :  { %v3628_v59 = vadd.f32 %v3597_v53, %v3436_v15  ;;  %v7756_v38 = vpop.f32.mrb[21].mxu0  ;;  %v8114_v53 = vld [vmem:[%s10661_s5 + $0x100] ss:$8 sps:$4 sm:$0xff]  }
 0x3a9   :  { %v3600_v6 = vpop.f32.mrb[22].mxu0 }
 0x3aa   :  { %v3629_v7 = vadd.f32 %v3600_v6, %v3437_v27  ;;  %v7757_v33 = vpop.f32.mrb[23].mxu0  ;;  %v10111_v16 = vadd.f32 %v10059_v43, %v3628_v59 }
 0x3ac   :  { %v10114_v5 = vadd.f32 %v10065_v48, %v3629_v7  ;;  %v8119_v7 = vld [vmem:[%s10661_s5 + $0x114] ss:$8 sps:$4 sm:$0xff]  }
 0x3af   :  { %v3605_v50 = vpop.f32.mrb[24].mxu0 }
 0x3b0   :  { %v3630_v32 = vadd.f32 %v3605_v50, %v3438_v39  ;;  %v7760_v19 = vpop.f32.mrb[25].mxu0 }
 0x3b1   :  { %v3608_v10 = vpop.f32.mrb[26].mxu0  ;;  %v8122_v19 = vld [vmem:[%s10661_s5 + $0x124] ss:$8 sps:$4 sm:$0xff]  }
 0x3b2   :  { %v3631_v14 = vadd.f32 %v3608_v10, %v3439_v20  ;;  %v7761_v22 = vpop.f32.mrb[27].mxu0  ;;  %v10117_v25 = vadd.f32 %v10070_v1, %v3630_v32  ;;  %v10130_v1 = vld [vmem:[%s10662_s4] ss:$0 sm:$0xff] }
 0x3b4   :  { %v10120_v15 = vadd.f32 %v10073_v29, %v3631_v14 }
 0x3b7   :  { %v3613_v27 = vpop.f32.mrb[28].mxu0 }
 0x3b8   :  { %v3632_v35 = vadd.f32 %v3613_v27, %v3440_v36  ;;  %v7764_v13 = vpop.f32.mrb[29].mxu0 }
 0x3b9   :  { %v3616_v43 = vpop.f32.mrb[30].mxu0  ;;  %v8120_v13 = vld [vmem:[%s10661_s5 + $0x120] ss:$8 sps:$4 sm:$0xff]  }
 0x3ba   :  { %v3633_v8 = vadd.f32 %v3616_v43, %v3441_v45  ;;  %v7765_v52 = vpop.f32.mrb[31].mxu0  ;;  %v10123_v48 = vadd.f32 %v10078_v21, %v3632_v35 }
 0x3bc   :  { %v10125_v39 = vadd.f32 %v3808_v62, %v3633_v8 }
 0x3bf   :  { %v3949_v9 = vpop.f32.mrb[32].mxu0 }
 0x3c0   :  { %v4004_v20 = vadd.f32 %v3949_v9, %v3812_v44  ;;  %v7812_v29 = vpop.f32.mrb[33].mxu0  ;;  %v8125_v9 = vld [vmem:[%s10661_s5 + $0x134] ss:$8 sps:$4 sm:$0xff]  }
 0x3c1   :  { %v3952_v57 = vpop.f32.mrb[34].mxu0  ;;  %v8123_v29 = vld [vmem:[%s10661_s5 + $0x130] ss:$8 sps:$4 sm:$0xff]  }
 0x3c2   :  { %v4025_v36 = vadd.f32 %v10130_v1, %v4004_v20  ;;  %v4005_v17 = vadd.f32 %v3952_v57, %v3813_v56  ;;  %v7813_v31 = vpop.f32.mrb[35].mxu0 }
 0x3c4   :  { %vm4039_vm1 = vcmp.ge.f32.partialorder %v4025_v36, 0.0  ;;  %v4053_v45 = vmul.f32 0.01, %v4025_v36  ;;  %v4026_v21 = vadd.f32 %v10130_v1, %v4005_v17 }
 0x3c6   :  { %v4067_v51 = vsel %vm4039_vm1, %v4025_v36, %v4053_v45  ;;  %vm4040_vm3 = vcmp.ge.f32.partialorder %v4026_v21, 0.0  ;;  %v4054_v62 = vmul.f32 0.01, %v4026_v21 }
 0x3c7   :  { %4136 = vst [vmem:[#allocation3 + $0x19] sm:$0x7f] %v4067_v51  ;;  %v3957_v61 = vpop.f32.mrb[36].mxu0 }
 0x3c8   :  { %v4068_v3 = vsel %vm4040_vm3, %v4026_v21, %v4054_v62  ;;  %v4006_v47 = vadd.f32 %v3957_v61, %v3814_v2  ;;  %v7816_v34 = vpop.f32.mrb[37].mxu0 }
 0x3c9   :  { %4137 = vst [vmem:[#allocation3 + $0x31] sm:$0x7f] %v4068_v3  ;;  %v3960_v44 = vpop.f32.mrb[38].mxu0 }
 0x3ca   :  { %v4027_v30 = vadd.f32 %v10130_v1, %v4006_v47  ;;  %v4007_v11 = vadd.f32 %v3960_v44, %v10092_v28  ;;  %v7817_v56 = vpop.f32.mrb[39].mxu0 }
 0x3cc   :  { %vm4041_vm5 = vcmp.ge.f32.partialorder %v4027_v30, 0.0  ;;  %v4055_v24 = vmul.f32 0.01, %v4027_v30  ;;  %v4028_v23 = vadd.f32 %v10130_v1, %v4007_v11 }
 0x3ce   :  { %v4069_v46 = vsel %vm4041_vm5, %v4027_v30, %v4055_v24  ;;  %vm4042_vm7 = vcmp.ge.f32.partialorder %v4028_v23, 0.0  ;;  %v4056_v26 = vmul.f32 0.01, %v4028_v23  ;;  %v8126_v30 = vld [vmem:[%s10661_s5 + $0x140] ss:$8 sps:$4 sm:$0xff]  }
 0x3cf   :  { %4138 = vst [vmem:[#allocation3 + $0x49] sm:$0x7f] %v4069_v46  ;;  %v3965_v18 = vpop.f32.mrb[40].mxu0 }
 0x3d0   :  { %v4188_v2 = vld [vmem:[#allocation3 + $0x31] ss:$2 sm:$0xff]  ;;  %v4070_v0 = vsel %vm4042_vm7, %v4028_v23, %v4056_v26  ;;  %v4008_v42 = vadd.f32 %v3965_v18, %v10097_v49  ;;  %v7820_v41 = vpop.f32.mrb[41].mxu0  ;;  %v4152_v63 = vld [vmem:[#allocation3 + $0x30] ss:$2 sm:$0xff] }
 0x3d1   :  { %4139 = vst [vmem:[#allocation3 + $0x61] sm:$0x7f] %v4070_v0  ;;  %v3968_v28 = vpop.f32.mrb[42].mxu0  ;;  %v4201_v40 = vpack.c.bf16 %v4188_v2, %v4186_v60  ;;  %v4165_v54 = vpack.c.bf16 %v4152_v63, %v4150_v58  ;;  %v8134_v58 = vld [vmem:[%s10661_s5 + $0x164] ss:$8 sps:$4 sm:$0xff]  }
 0x3d2   :  { %v4029_v59 = vadd.f32 %v10130_v1, %v4008_v42  ;;  %v4009_v38 = vadd.f32 %v3968_v28, %v10100_v12  ;;  %v7821_v6 = vpop.f32.mrb[43].mxu0  ;;  %v8117_v12 = vld [vmem:[%s10661_s5 + $0x110] ss:$8 sps:$4 sm:$0xff]   ;;  %v8132_v63 = vld [vmem:[%s10661_s5 + $0x160] ss:$8 sps:$4 sm:$0xff]  }
 0x3d3   :  { %4335 = vmatmul.mubr.bf16.vlgmr.msra.gmra.mrb[60].mxu0 %v4201_v40  ;;  %4488 = vmatmul.mubr.bf16.vlgmr.msra.gmra.mrb[196].mxu1 %v4165_v54  ;;  %v4158_v6 = vld [vmem:[#allocation3 + $0xd8] ss:$2 sm:$0xff] }
 0x3d4   :  { %vm4043_vm14 = vcmp.ge.f32.partialorder %v4029_v59, 0.0  ;;  %v4057_v49 = vmul.f32 0.01, %v4029_v59  ;;  %v4030_v33 = vadd.f32 %v10130_v1, %v4009_v38  ;;  %4344 = vmatprep.mubr.bf16.mxu0 %v8291_v4  ;;  %4497 = vmatprep.mubr.bf16.mxu1 %v8291_v4  ;;  %v4194_v38 = vld [vmem:[#allocation3 + $0xd9] ss:$2 sm:$0xff] }
 0x3d5   :  { %4646 = vmatpush1.bf16.msra.mxu1 %v8114_v53  ;;  %v8137_v53 = vld [vmem:[%s10661_s5 + $0x174] ss:$8 sps:$4 sm:$0xff]  }
 0x3d6   :  { %v4071_v50 = vsel %vm4043_vm14, %v4029_v59, %v4057_v49  ;;  %vm4044_vm15 = vcmp.ge.f32.partialorder %v4030_v33, 0.0  ;;  %v4058_v32 = vmul.f32 0.01, %v4030_v33  ;;  %4647 = vmatprep.subr.bf16.mxu1 %v8119_v7  ;;  %v8135_v7 = vld [vmem:[%s10661_s5 + $0x170] ss:$8 sps:$4 sm:$0xff]  }
 0x3d7   :  { %4140 = vst [vmem:[#allocation3 + $0x79] sm:$0x7f] %v4071_v50  ;;  %v3973_v10 = vpop.f32.mrb[44].mxu0 }
 0x3d8   :  { %v4072_v14 = vsel %vm4044_vm15, %v4030_v33, %v4058_v32  ;;  %v4010_v22 = vadd.f32 %v3973_v10, %v10105_v37  ;;  %v7824_v27 = vpop.f32.mrb[45].mxu0  ;;  %v4190_v31 = vld [vmem:[#allocation3 + $0x61] ss:$2 sm:$0xff]  ;;  %v4154_v45 = vld [vmem:[#allocation3 + $0x60] ss:$2 sm:$0xff] }
 0x3d9   :  { %4141 = vst [vmem:[#allocation3 + $0x91] sm:$0x7f] %v4072_v14  ;;  %v3976_v35 = vpop.f32.mrb[46].mxu0  ;;  %4648 = vmatpush1.bf16.msra.mxu1 %v8117_v12 }
 0x3da   :  { %v4031_v43 = vadd.f32 %v10130_v1, %v4010_v22  ;;  %v4011_v8 = vadd.f32 %v3976_v35, %v10108_v55  ;;  %v7825_v52 = vpop.f32.mrb[47].mxu0  ;;  %4649 = vmatprep.subr.bf16.mxu1 %v8122_v19  ;;  %v8128_v55 = vld [vmem:[%s10661_s5 + $0x144] ss:$8 sps:$4 sm:$0xff]  }
 0x3db   :  { %v8140_v19 = vld [vmem:[%s10661_s5 + $0x184] ss:$8 sps:$4 sm:$0xff]  }
 0x3dc   :  { %vm4045_vm0 = vcmp.ge.f32.partialorder %v4031_v43, 0.0  ;;  %v4059_v37 = vmul.f32 0.01, %v4031_v43  ;;  %v4032_v20 = vadd.f32 %v10130_v1, %v4011_v8 }
 0x3dd   :  { %4650 = vmatpush1.bf16.msra.mxu1 %v8120_v13 }
 0x3de   :  { %v4073_v57 = vsel %vm4045_vm0, %v4031_v43, %v4059_v37  ;;  %vm4046_vm2 = vcmp.ge.f32.partialorder %v4032_v20, 0.0  ;;  %v4060_v36 = vmul.f32 0.01, %v4032_v20  ;;  %4651 = vmatprep.subr.bf16.mxu1 %v8125_v9 }
 0x3df   :  { %4142 = vst [vmem:[#allocation3 + $0xa9] sm:$0x7f] %v4073_v57  ;;  %v3981_v17 = vpop.f32.mrb[48].mxu0 }
 0x3e0   :  { %v4074_v21 = vsel %vm4046_vm2, %v4032_v20, %v4060_v36  ;;  %v4012_v51 = vadd.f32 %v3981_v17, %v10111_v16  ;;  %v7828_v62 = vpop.f32.mrb[49].mxu0  ;;  %v4192_v61 = vld [vmem:[#allocation3 + $0x91] ss:$2 sm:$0xff]  ;;  %v4156_v3 = vld [vmem:[#allocation3 + $0x90] ss:$2 sm:$0xff] }
 0x3e1   :  { %4143 = vst [vmem:[#allocation3 + $0xf1] sm:$0x7f] %v4074_v21  ;;  %v3984_v47 = vpop.f32.mrb[50].mxu0  ;;  %v4202_v34 = vpack.c.bf16 %v4192_v61, %v4190_v31  ;;  %v4166_v44 = vpack.c.bf16 %v4156_v3, %v4154_v45  ;;  %4652 = vmatpush1.bf16.msra.mxu1 %v8123_v29  ;;  %v8131_v16 = vld [vmem:[%s10661_s5 + $0x154] ss:$8 sps:$4 sm:$0xff]  }
 0x3e2   :  { %v4033_v11 = vadd.f32 %v10130_v1, %v4012_v51  ;;  %v4013_v56 = vadd.f32 %v3984_v47, %v10114_v5  ;;  %v7829_v24 = vpop.f32.mrb[51].mxu0  ;;  %4653 = vmatprep.subr.bf16.mxu1 %v8128_v55  ;;  %v8129_v5 = vld [vmem:[%s10661_s5 + $0x150] ss:$8 sps:$4 sm:$0xff]   ;;  %v8143_v51 = vld [vmem:[%s10661_s5 + $0x194] ss:$8 sps:$4 sm:$0xff]  }
 0x3e3   :  { %4345 = vmatmul.mubr.bf16.gmra.mrb[64].mxu0 %v4202_v34  ;;  %4498 = vmatmul.mubr.bf16.gmra.mrb[200].mxu1 %v4166_v44  ;;  %v4529_v31 = vld [vmem:[#allocation3 + $0x2] ss:$2 sm:$0xff]  ;;  %v4531_v45 = vld [vmem:[#allocation3 + $0x32] ss:$2 sm:$0xff] }
 0x3e4   :  { %vm4047_vm4 = vcmp.ge.f32.partialorder %v4033_v11, 0.0  ;;  %v4061_v23 = vmul.f32 0.01, %v4033_v11  ;;  %v4034_v60 = vadd.f32 %v10130_v1, %v4013_v56  ;;  %4354 = vmatprep.mubr.bf16.mxu0 %v8291_v4  ;;  %4507 = vmatprep.mubr.bf16.mxu1 %v8291_v4  ;;  %v4544_v21 = vpack.c.bf16 %v4531_v45, %v4529_v31  ;;  %v8141_v62 = vld [vmem:[%s10661_s5 + $0x190] ss:$8 sps:$4 sm:$0xff]  }
 0x3e5   :  { %4654 = vmatpush1.bf16.msra.mxu1 %v8126_v30  ;;  %v8146_v61 = vld [vmem:[%s10661_s5 + $0x1a4] ss:$8 sps:$4 sm:$0xff]   ;;  %v4535_v3 = vld [vmem:[#allocation3 + $0x92] ss:$2 sm:$0xff] }
 0x3e6   :  { %v4075_v46 = vsel %vm4047_vm4, %v4033_v11, %v4061_v23  ;;  %vm4048_vm6 = vcmp.ge.f32.partialorder %v4034_v60, 0.0  ;;  %v4062_v26 = vmul.f32 0.01, %v4034_v60  ;;  %4655 = vmatprep.subr.bf16.mxu1 %v8131_v16  ;;  %v8144_v47 = vld [vmem:[%s10661_s5 + $0x1a0] ss:$8 sps:$4 sm:$0xff]  }
 0x3e7   :  { %4144 = vst [vmem:[#allocation3 + $0x109] sm:$0x7f] %v4075_v46  ;;  %v3989_v18 = vpop.f32.mrb[52].mxu0  ;;  %v4533_v34 = vld [vmem:[#allocation3 + $0x62] ss:$2 sm:$0xff] }
 0x3e8   :  { %v4076_v2 = vsel %vm4048_vm6, %v4034_v60, %v4062_v26  ;;  %v4014_v0 = vadd.f32 %v3989_v18, %v10117_v25  ;;  %v7832_v42 = vpop.f32.mrb[53].mxu0  ;;  %v4545_v44 = vpack.c.bf16 %v4535_v3, %v4533_v34  ;;  %v8149_v30 = vld [vmem:[%s10661_s5 + $0x1b4] ss:$8 sps:$4 sm:$0xff]   ;;  %v8147_v11 = vld [vmem:[%s10661_s5 + $0x1b0] ss:$8 sps:$4 sm:$0xff]  }
 0x3e9   :  { %4145 = vst [vmem:[#allocation3 + $0x121] sm:$0x7f] %v4076_v2  ;;  %v3992_v41 = vpop.f32.mrb[54].mxu0  ;;  %4656 = vmatpush1.bf16.msra.mxu1 %v8129_v5  ;;  %v8152_v56 = vld [vmem:[%s10661_s5 + $0x1c4] ss:$8 sps:$4 sm:$0xff]  }
 0x3ea   :  { %v4035_v28 = vadd.f32 %v10130_v1, %v4014_v0  ;;  %v4015_v40 = vadd.f32 %v3992_v41, %v10120_v15  ;;  %v7833_v54 = vpop.f32.mrb[55].mxu0  ;;  %4657 = vmatprep.subr.bf16.mxu1 %v8134_v58  ;;  %v4537_v24 = vld [vmem:[#allocation3 + $0xda] ss:$2 sm:$0xff]  ;;  %v4946_v31 = vld [vmem:[#allocation3 + $0xa9] ss:$2 sm:$0xff] }
 0x3eb   :  { %v8150_v23 = vld [vmem:[%s10661_s5 + $0x1c0] ss:$8 sps:$4 sm:$0xff]   ;;  %v8155_v5 = vld [vmem:[%s10661_s5 + $0x1d4] ss:$8 sps:$4 sm:$0xff]   ;;  %v8153_v46 = vld [vmem:[%s10661_s5 + $0x1d0] ss:$8 sps:$4 sm:$0xff]  }
 0x3ec   :  { %vm4049_vm8 = vcmp.ge.f32.partialorder %v4035_v28, 0.0  ;;  %v4063_v25 = vmul.f32 0.01, %v4035_v28  ;;  %v4036_v59 = vadd.f32 %v10130_v1, %v4015_v40  ;;  %v8158_v26 = vld [vmem:[%s10661_s5 + $0x1e4] ss:$8 sps:$4 sm:$0xff]  }
 0x3ed   :  { %4658 = vmatpush1.bf16.msra.mxu1 %v8132_v63  ;;  %v8156_v18 = vld [vmem:[%s10661_s5 + $0x1e0] ss:$8 sps:$4 sm:$0xff]   ;;  %v8161_v42 = vld [vmem:[%s10661_s5 + $0x1f4] ss:$8 sps:$4 sm:$0xff]   ;;  %v8159_v41 = vld [vmem:[%s10661_s5 + $0x1f0] ss:$8 sps:$4 sm:$0xff]  }
 0x3ee   :  { %v4077_v49 = vsel %vm4049_vm8, %v4035_v28, %v4063_v25  ;;  %vm4050_vm9 = vcmp.ge.f32.partialorder %v4036_v59, 0.0  ;;  %v4064_v15 = vmul.f32 0.01, %v4036_v59  ;;  %v4196_v33 = vld [vmem:[#allocation3 + $0x109] ss:$2 sm:$0xff]  ;;  %4659 = vmatprep.subr.bf16.mxu1 %v8137_v53 }
 0x3ef   :  { %4146 = vst [vmem:[#allocation3 + $0x139] sm:$0x7f] %v4077_v49  ;;  %v3997_v12 = vpop.f32.mrb[56].mxu0  ;;  %v4203_v50 = vpack.c.bf16 %v4196_v33, %v4194_v38  ;;  %v4160_v32 = vld [vmem:[#allocation3 + $0x108] ss:$2 sm:$0xff] }
 0x3f0   :  { %v4078_v10 = vsel %vm4050_vm9, %v4036_v59, %v4064_v15  ;;  %v4016_v14 = vadd.f32 %v3997_v12, %v10123_v48  ;;  %v7836_v22 = vpop.f32.mrb[57].mxu0  ;;  %v4167_v27 = vpack.c.bf16 %v4160_v32, %v4158_v6  ;;  %v4539_v16 = vld [vmem:[#allocation3 + $0x10a] ss:$2 sm:$0xff]  ;;  %v4950_v3 = vld [vmem:[#allocation3 + $0x121] ss:$2 sm:$0xff] }
 0x3f1   :  { %4147 = vst [vmem:[#allocation3 + $0x151] sm:$0x7f] %v4078_v10  ;;  %v4000_v35 = vpop.f32.mrb[58].mxu0  ;;  %4355 = vmatmul.mubr.bf16.gmra.mrb[68].mxu0 %v4203_v50  ;;  %4660 = vmatpush1.bf16.msra.mxu1 %v8135_v7  ;;  %v4546_v60 = vpack.c.bf16 %v4539_v16, %v4537_v24  ;;  %v8164_v63 = vld [vmem:[%s10661_s5 + $0x204] ss:$8 sps:$4 sm:$0xff]  }
 0x3f2   :  { %v4037_v13 = vadd.f32 %v10130_v1, %v4016_v14  ;;  %v4017_v43 = vadd.f32 %v4000_v35, %v10125_v39  ;;  %4508 = vmatmul.mubr.bf16.gmra.mrb[204].mxu1 %v4167_v27  ;;  %v7837_v8 = vpop.f32.mrb[59].mxu0  ;;  %4364 = vmatprep.mubr.bf16.mxu0 %v8291_v4  ;;  %v4736_v28 = vld [vmem:[#allocation3 + $0x48] ss:$2 sm:$0xff]  ;;  %v4734_v54 = vld [vmem:[#allocation3 + $0x18] ss:$2 sm:$0xff] }
 0x3f3   :  { %4517 = vmatprep.mubr.bf16.mxu1 %v8291_v4  ;;  %4850 = vmatprep.subr.bf16.mxu1 %v8140_v19  ;;  %v8162_v40 = vld [vmem:[%s10661_s5 + $0x200] ss:$8 sps:$4 sm:$0xff]   ;;  %v4749_v53 = vpack.c.bf16 %v4736_v28, %v4734_v54  ;;  %v8167_v25 = vld [vmem:[%s10661_s5 + $0x214] ss:$8 sps:$4 sm:$0xff]   ;;  %v8165_v59 = vld [vmem:[%s10661_s5 + $0x210] ss:$8 sps:$4 sm:$0xff]  }
 0x3f4   :  { %vm4051_vm10 = vcmp.ge.f32.partialorder %v4037_v13, 0.0  ;;  %v4065_v52 = vmul.f32 0.01, %v4037_v13  ;;  %v4038_v48 = vadd.f32 %v10130_v1, %v4017_v43  ;;  %v8138_v1 = vld [vmem:[%s10661_s5 + $0x180] ss:$8 sps:$4 sm:$0xff]  }
 0x3f5   :  { %v8170_v38 = vld [vmem:[%s10661_s5 + $0x224] ss:$8 sps:$4 sm:$0xff]   ;;  %v8168_v7 = vld [vmem:[%s10661_s5 + $0x220] ss:$8 sps:$4 sm:$0xff]   ;;  %v8173_v33 = vld [vmem:[%s10661_s5 + $0x234] ss:$8 sps:$4 sm:$0xff]  }
 0x3f6   :  { %v4079_v9 = vsel %vm4051_vm10, %v4037_v13, %v4065_v52  ;;  %vm4052_vm11 = vcmp.ge.f32.partialorder %v4038_v48, 0.0  ;;  %v4066_v37 = vmul.f32 0.01, %v4038_v48  ;;  %v4198_v29 = vld [vmem:[#allocation3 + $0x139] ss:$2 sm:$0xff] }
 0x3f7   :  { %4148 = vst [vmem:[#allocation3 + $0x169] sm:$0x7f] %v4079_v9  ;;  %v4162_v39 = vld [vmem:[#allocation3 + $0x138] ss:$2 sm:$0xff]  ;;  %v4740_v6 = vld [vmem:[#allocation3 + $0xa8] ss:$2 sm:$0xff] }
 0x3f8   :  { %v4080_v20 = vsel %vm4052_vm11, %v4038_v48, %v4066_v37  ;;  %v4541_v2 = vld [vmem:[#allocation3 + $0x13a] ss:$2 sm:$0xff]  ;;  %v4948_v34 = vld [vmem:[#allocation3 + $0xf1] ss:$2 sm:$0xff]  ;;  %v5152_v28 = vld [vmem:[#allocation3 + $0xaa] ss:$2 sm:$0xff] }
 0x3f9   :  { %4149 = vst [vmem:[#allocation3 + $0x181] sm:$0x7f] %v4080_v20  ;;  %v4738_v49 = vld [vmem:[#allocation3 + $0x78] ss:$2 sm:$0xff]  ;;  %v4942_v20 = vld [vmem:[#allocation3 + $0x49] ss:$2 sm:$0xff] }
 0x3fa   :  { %v4750_v15 = vpack.c.bf16 %v4740_v6, %v4738_v49  ;;  %v8171_v12 = vld [vmem:[%s10661_s5 + $0x230] ss:$8 sps:$4 sm:$0xff]   ;;  %v8176_v50 = vld [vmem:[%s10661_s5 + $0x244] ss:$8 sps:$4 sm:$0xff]   ;;  %v8174_v19 = vld [vmem:[%s10661_s5 + $0x240] ss:$8 sps:$4 sm:$0xff]  }
 0x3fb   :  { %v4744_v32 = vld [vmem:[#allocation3 + $0x120] ss:$2 sm:$0xff]  ;;  %v4742_v10 = vld [vmem:[#allocation3 + $0xf0] ss:$2 sm:$0xff] }
 0x3fc   :  { %v4751_v14 = vpack.c.bf16 %v4744_v32, %v4742_v10  ;;  %v8179_v22 = vld [vmem:[%s10661_s5 + $0x254] ss:$8 sps:$4 sm:$0xff]   ;;  %v8177_v27 = vld [vmem:[%s10661_s5 + $0x250] ss:$8 sps:$4 sm:$0xff]   ;;  %v8182_v35 = vld [vmem:[%s10661_s5 + $0x264] ss:$8 sps:$4 sm:$0xff]  }
 0x3fd   :  { %v8180_v43 = vld [vmem:[%s10661_s5 + $0x260] ss:$8 sps:$4 sm:$0xff]   ;;  %v4746_v8 = vld [vmem:[#allocation3 + $0x150] ss:$2 sm:$0xff]  ;;  %v8188_v37 = vld [vmem:[%s10661_s5 + $0x284] ss:$8 sps:$4 sm:$0xff]  }
 0x3fe   :  { %v4200_v57 = vld [vmem:[#allocation3 + $0x169] ss:$2 sm:$0xff]  ;;  %v4164_v36 = vld [vmem:[#allocation3 + $0x168] ss:$2 sm:$0xff] }
 0x3ff   :  { %v4204_v55 = vpack.c.bf16 %v4200_v57, %v4198_v29  ;;  %v4168_v17 = vpack.c.bf16 %v4164_v36, %v4162_v39  ;;  %v4543_v58 = vld [vmem:[#allocation3 + $0x16a] ss:$2 sm:$0xff]  ;;  %v4940_v57 = vld [vmem:[#allocation3 + $0x19] ss:$2 sm:$0xff]  ;;  %v5150_v54 = vld [vmem:[#allocation3 + $0x7a] ss:$2 sm:$0xff] }
 0x400   :  { %v4547_v0 = vpack.c.bf16 %v4543_v58, %v4541_v2  ;;  %v4748_v13 = vld [vmem:[#allocation3 + $0x180] ss:$2 sm:$0xff]  ;;  %v8185_v48 = vld [vmem:[%s10661_s5 + $0x274] ss:$8 sps:$4 sm:$0xff]   ;;  %v8183_v9 = vld [vmem:[%s10661_s5 + $0x270] ss:$8 sps:$4 sm:$0xff]   ;;  %v4955_v39 = vpack.c.bf16 %v4942_v20, %v4940_v57 }
 0x401   :  { %4365 = vmatmul.mubr.bf16.gmra.mrb[72].mxu0 %v4204_v55  ;;  %4518 = vmatmul.mubr.bf16.gmra.mrb[208].mxu1 %v4168_v17  ;;  %v4752_v52 = vpack.c.bf16 %v4748_v13, %v4746_v8  ;;  %v8186_v29 = vld [vmem:[%s10661_s5 + $0x280] ss:$8 sps:$4 sm:$0xff]   ;;  %v8191_v36 = vld [vmem:[%s10661_s5 + $0x294] ss:$8 sps:$4 sm:$0xff]   ;;  %v8189_v55 = vld [vmem:[%s10661_s5 + $0x290] ss:$8 sps:$4 sm:$0xff]  }
 0x402   :  { %4677 = vmatprep.mubr.bf16.mxu1 %v8291_v4  ;;  %v8194_v17 = vld [vmem:[%s10661_s5 + $0x2a4] ss:$8 sps:$4 sm:$0xff]   ;;  %v8192_v45 = vld [vmem:[%s10661_s5 + $0x2a0] ss:$8 sps:$4 sm:$0xff]   ;;  %v5352_v8 = vld [vmem:[#allocation3 + $0x30] ss:$2 sm:$0xff] }
 0x403   :  { %v4954_v24 = vld [vmem:[#allocation3 + $0x181] ss:$2 sm:$0xff]  ;;  %v5148_v58 = vld [vmem:[#allocation3 + $0x4a] ss:$2 sm:$0xff]  ;;  %v5146_v2 = vld [vmem:[#allocation3 + $0x1a] ss:$2 sm:$0xff] }
 0x404   :  { %v8204_v16 = vld [vmem:[%s10661_s5 + $0x2e0] ss:$8 sps:$4 sm:$0xff]   ;;  %v5356_v20 = vld [vmem:[#allocation3 + $0x90] ss:$2 sm:$0xff] }
 0x405   :  { %v5156_v6 = vld [vmem:[#allocation3 + $0x122] ss:$2 sm:$0xff]  ;;  %v5154_v49 = vld [vmem:[#allocation3 + $0xf2] ss:$2 sm:$0xff] }
 0x406   :  { %v5160_v32 = vld [vmem:[#allocation3 + $0x182] ss:$2 sm:$0xff]  ;;  %v5158_v10 = vld [vmem:[#allocation3 + $0x152] ss:$2 sm:$0xff] }
 0x407   :  { %v5354_v13 = vld [vmem:[#allocation3 + $0x60] ss:$2 sm:$0xff] }
 0x408   :  { %v8240_v57 = vld [vmem:[%s10661_s5 + $0x3a0] ss:$8 sps:$4 sm:$0xff]  }
 0x409   :  { %4678 = vmatmul.mubr.bf16.vlgmr.msra.gmra.mrb[196].mxu1 %v4544_v21 }
 0x40a   :  { %4851 = vmatpush1.bf16.msra.mxu1 %v8138_v1  ;;  %4687 = vmatprep.mubr.bf16.mxu1 %v8291_v4  ;;  %v4944_v1 = vld [vmem:[#allocation3 + $0x79] ss:$2 sm:$0xff] }
 0x40b   :  { %4852 = vmatprep.subr.bf16.mxu1 %v8143_v51  ;;  %v4956_v21 = vpack.c.bf16 %v4946_v31, %v4944_v1  ;;  %v8197_v51 = vld [vmem:[%s10661_s5 + $0x2b4] ss:$8 sps:$4 sm:$0xff]  }
 0x40c   :  { %v5362_v31 = vld [vmem:[#allocation3 + $0x138] ss:$2 sm:$0xff]  ;;  %v5360_v1 = vld [vmem:[#allocation3 + $0x108] ss:$2 sm:$0xff] }
 0x40e   :  { %4853 = vmatpush1.bf16.msra.mxu1 %v8141_v62  ;;  %v8195_v62 = vld [vmem:[%s10661_s5 + $0x2b0] ss:$8 sps:$4 sm:$0xff]  }
 0x40f   :  { %4854 = vmatprep.subr.bf16.mxu1 %v8146_v61  ;;  %v8200_v61 = vld [vmem:[%s10661_s5 + $0x2c4] ss:$8 sps:$4 sm:$0xff]  }
 0x411   :  { %4688 = vmatmul.mubr.bf16.gmra.mrb[200].mxu1 %v4545_v44  ;;  %v4957_v44 = vpack.c.bf16 %v4950_v3, %v4948_v34  ;;  %v5364_v3 = vld [vmem:[#allocation3 + $0x168] ss:$2 sm:$0xff] }
 0x412   :  { %4855 = vmatpush1.bf16.msra.mxu1 %v8144_v47  ;;  %4697 = vmatprep.mubr.bf16.mxu1 %v8291_v4  ;;  %v8198_v47 = vld [vmem:[%s10661_s5 + $0x2c0] ss:$8 sps:$4 sm:$0xff]  }
 0x413   :  { %4856 = vmatprep.subr.bf16.mxu1 %v8149_v30  ;;  %v8203_v30 = vld [vmem:[%s10661_s5 + $0x2d4] ss:$8 sps:$4 sm:$0xff]   ;;  %v8252_v34 = vld [vmem:[%s10661_s5 + $0x3e0] ss:$8 sps:$4 sm:$0xff]  }
 0x416   :  { %4857 = vmatpush1.bf16.msra.mxu1 %v8147_v11  ;;  %v8201_v11 = vld [vmem:[%s10661_s5 + $0x2d0] ss:$8 sps:$4 sm:$0xff]  }
 0x417   :  { %4858 = vmatprep.subr.bf16.mxu1 %v8152_v56  ;;  %v8206_v56 = vld [vmem:[%s10661_s5 + $0x2e4] ss:$8 sps:$4 sm:$0xff]  }
 0x419   :  { %4698 = vmatmul.mubr.bf16.gmra.mrb[204].mxu1 %v4546_v60 }
 0x41a   :  { %4859 = vmatpush1.bf16.msra.mxu1 %v8150_v23  ;;  %4707 = vmatprep.mubr.bf16.mxu1 %v8291_v4  ;;  %v4952_v23 = vld [vmem:[#allocation3 + $0x151] ss:$2 sm:$0xff] }
 0x41b   :  { %4860 = vmatprep.subr.bf16.mxu1 %v8155_v5  ;;  %v4958_v60 = vpack.c.bf16 %v4954_v24, %v4952_v23  ;;  %v8209_v5 = vld [vmem:[%s10661_s5 + $0x2f4] ss:$8 sps:$4 sm:$0xff]   ;;  %v5560_v24 = vld [vmem:[#allocation3 + $0x61] ss:$2 sm:$0xff] }
 0x41c   :  { %v8258_v23 = vld [vmem:[%s10661_s5 + $0x400] ss:$8 sps:$4 sm:$0xff]  }
 0x41e   :  { %4861 = vmatpush1.bf16.msra.mxu1 %v8153_v46  ;;  %v8207_v46 = vld [vmem:[%s10661_s5 + $0x2f0] ss:$8 sps:$4 sm:$0xff]  }
 0x41f   :  { %4862 = vmatprep.subr.bf16.mxu1 %v8158_v26  ;;  %v8212_v26 = vld [vmem:[%s10661_s5 + $0x304] ss:$8 sps:$4 sm:$0xff]  }
 0x421   :  { %4708 = vmatmul.mubr.bf16.gmra.mrb[208].mxu1 %v4547_v0  ;;  %v5161_v0 = vpack.c.bf16 %v5148_v58, %v5146_v2  ;;  %v8261_v2 = vld [vmem:[%s10661_s5 + $0x410] ss:$8 sps:$4 sm:$0xff]  }
 0x422   :  { %4863 = vmatpush1.bf16.msra.mxu1 %v8156_v18  ;;  %4882 = vmatprep.mubr.bf16.mxu1 %v8291_v4  ;;  %v8210_v18 = vld [vmem:[%s10661_s5 + $0x300] ss:$8 sps:$4 sm:$0xff]  }
 0x423   :  { %4864 = vmatprep.subr.bf16.mxu1 %v8161_v42  ;;  %v8215_v42 = vld [vmem:[%s10661_s5 + $0x314] ss:$8 sps:$4 sm:$0xff]  }
 0x426   :  { %4865 = vmatpush1.bf16.msra.mxu1 %v8159_v41  ;;  %v8213_v41 = vld [vmem:[%s10661_s5 + $0x310] ss:$8 sps:$4 sm:$0xff]  }
 0x427   :  { %5056 = vmatprep.subr.bf16.mxu1 %v8164_v63  ;;  %v8218_v63 = vld [vmem:[%s10661_s5 + $0x324] ss:$8 sps:$4 sm:$0xff]  }
 0x429   :  { %4883 = vmatmul.mubr.bf16.vlgmr.msra.gmra.mrb[196].mxu1 %v4749_v53  ;;  %v5162_v53 = vpack.c.bf16 %v5152_v28, %v5150_v54  ;;  %v8267_v54 = vld [vmem:[%s10661_s5 + $0x430] ss:$8 sps:$4 sm:$0xff]  }
 0x42a   :  { %5057 = vmatpush1.bf16.msra.mxu1 %v8162_v40  ;;  %4892 = vmatprep.mubr.bf16.mxu1 %v8291_v4  ;;  %v8216_v40 = vld [vmem:[%s10661_s5 + $0x320] ss:$8 sps:$4 sm:$0xff]  }
 0x42b   :  { %5058 = vmatprep.subr.bf16.mxu1 %v8167_v25  ;;  %v8221_v25 = vld [vmem:[%s10661_s5 + $0x334] ss:$8 sps:$4 sm:$0xff]  }
 0x42e   :  { %5059 = vmatpush1.bf16.msra.mxu1 %v8165_v59  ;;  %v8219_v59 = vld [vmem:[%s10661_s5 + $0x330] ss:$8 sps:$4 sm:$0xff]  }
 0x42f   :  { %5060 = vmatprep.subr.bf16.mxu1 %v8170_v38  ;;  %v8224_v38 = vld [vmem:[%s10661_s5 + $0x344] ss:$8 sps:$4 sm:$0xff]  }
 0x431   :  { %4893 = vmatmul.mubr.bf16.gmra.mrb[200].mxu1 %v4750_v15  ;;  %v5163_v15 = vpack.c.bf16 %v5156_v6, %v5154_v49  ;;  %v5566_v6 = vld [vmem:[#allocation3 + $0x109] ss:$2 sm:$0xff] }
 0x432   :  { %5061 = vmatpush1.bf16.msra.mxu1 %v8168_v7  ;;  %4902 = vmatprep.mubr.bf16.mxu1 %v8291_v4  ;;  %v8222_v7 = vld [vmem:[%s10661_s5 + $0x340] ss:$8 sps:$4 sm:$0xff]  }
 0x433   :  { %5062 = vmatprep.subr.bf16.mxu1 %v8173_v33  ;;  %v8227_v33 = vld [vmem:[%s10661_s5 + $0x354] ss:$8 sps:$4 sm:$0xff]  }
 0x436   :  { %5063 = vmatpush1.bf16.msra.mxu1 %v8171_v12  ;;  %v8225_v12 = vld [vmem:[%s10661_s5 + $0x350] ss:$8 sps:$4 sm:$0xff]  }
 0x437   :  { %5064 = vmatprep.subr.bf16.mxu1 %v8176_v50  ;;  %v8230_v50 = vld [vmem:[%s10661_s5 + $0x364] ss:$8 sps:$4 sm:$0xff]  }
 0x439   :  { %4903 = vmatmul.mubr.bf16.gmra.mrb[204].mxu1 %v4751_v14  ;;  %v5164_v14 = vpack.c.bf16 %v5160_v32, %v5158_v10  ;;  %v8278_v32 = vld [vmem:[%s10661_s5 + $0x464] ss:$8 sps:$4 sm:$0xff]  }
 0x43a   :  { %5065 = vmatpush1.bf16.msra.mxu1 %v8174_v19  ;;  %4912 = vmatprep.mubr.bf16.mxu1 %v8291_v4  ;;  %v8228_v19 = vld [vmem:[%s10661_s5 + $0x360] ss:$8 sps:$4 sm:$0xff]  }
 0x43b   :  { %5066 = vmatprep.subr.bf16.mxu1 %v8179_v22  ;;  %v8233_v22 = vld [vmem:[%s10661_s5 + $0x374] ss:$8 sps:$4 sm:$0xff]  }
 0x43c   :  { %v5572_v10 = vld [vmem:[#allocation3 + $0x199] ss:$2 sm:$0xff] }
 0x43e   :  { %5067 = vmatpush1.bf16.msra.mxu1 %v8177_v27  ;;  %v8231_v27 = vld [vmem:[%s10661_s5 + $0x370] ss:$8 sps:$4 sm:$0xff]  }
 0x43f   :  { %5068 = vmatprep.subr.bf16.mxu1 %v8182_v35  ;;  %v8236_v35 = vld [vmem:[%s10661_s5 + $0x384] ss:$8 sps:$4 sm:$0xff]  }
 0x441   :  { %4913 = vmatmul.mubr.bf16.gmra.mrb[208].mxu1 %v4752_v52  ;;  %v5367_v52 = vpack.c.bf16 %v5354_v13, %v5352_v8 }
 0x442   :  { %5069 = vmatpush1.bf16.msra.mxu1 %v8180_v43  ;;  %5088 = vmatprep.mubr.bf16.mxu1 %v8291_v4  ;;  %v8234_v43 = vld [vmem:[%s10661_s5 + $0x380] ss:$8 sps:$4 sm:$0xff]  }
 0x443   :  { %5070 = vmatprep.subr.bf16.mxu1 %v8185_v48  ;;  %v8239_v48 = vld [vmem:[%s10661_s5 + $0x394] ss:$8 sps:$4 sm:$0xff]  }
 0x446   :  { %5071 = vmatpush1.bf16.msra.mxu1 %v8183_v9  ;;  %v8237_v9 = vld [vmem:[%s10661_s5 + $0x390] ss:$8 sps:$4 sm:$0xff]  }
 0x447   :  { %5262 = vmatprep.subr.bf16.mxu1 %v8188_v37  ;;  %v8242_v37 = vld [vmem:[%s10661_s5 + $0x3a4] ss:$8 sps:$4 sm:$0xff]  }
 0x449   :  { %5089 = vmatmul.mubr.bf16.vlgmr.msra.gmra.mrb[196].mxu1 %v4955_v39 }
 0x44a   :  { %5263 = vmatpush1.bf16.msra.mxu1 %v8186_v29  ;;  %5098 = vmatprep.mubr.bf16.mxu1 %v8291_v4  ;;  %v5358_v29 = vld [vmem:[#allocation3 + $0xc0] ss:$2 sm:$0xff] }
 0x44b   :  { %5264 = vmatprep.subr.bf16.mxu1 %v8191_v36  ;;  %v5368_v39 = vpack.c.bf16 %v5358_v29, %v5356_v20  ;;  %v8245_v36 = vld [vmem:[%s10661_s5 + $0x3b4] ss:$8 sps:$4 sm:$0xff]   ;;  %v5770_v29 = vld [vmem:[#allocation3 + $0xc2] ss:$2 sm:$0xff] }
 0x44c   :  { %v5768_v20 = vld [vmem:[#allocation3 + $0x92] ss:$2 sm:$0xff] }
 0x44e   :  { %5265 = vmatpush1.bf16.msra.mxu1 %v8189_v55  ;;  %v8243_v55 = vld [vmem:[%s10661_s5 + $0x3b0] ss:$8 sps:$4 sm:$0xff]  }
 0x44f   :  { %5266 = vmatprep.subr.bf16.mxu1 %v8194_v17  ;;  %v8248_v17 = vld [vmem:[%s10661_s5 + $0x3c4] ss:$8 sps:$4 sm:$0xff]  }
 0x451   :  { %5099 = vmatmul.mubr.bf16.gmra.mrb[200].mxu1 %v4956_v21  ;;  %v5369_v21 = vpack.c.bf16 %v5362_v31, %v5360_v1  ;;  %v5772_v31 = vld [vmem:[#allocation3 + $0x10a] ss:$2 sm:$0xff] }
 0x452   :  { %5267 = vmatpush1.bf16.msra.mxu1 %v8192_v45  ;;  %5108 = vmatprep.mubr.bf16.mxu1 %v8291_v4  ;;  %v8246_v45 = vld [vmem:[%s10661_s5 + $0x3c0] ss:$8 sps:$4 sm:$0xff]  }
 0x453   :  { %5268 = vmatprep.subr.bf16.mxu1 %v8197_v51  ;;  %v8251_v51 = vld [vmem:[%s10661_s5 + $0x3d4] ss:$8 sps:$4 sm:$0xff]  }
 0x456   :  { %5269 = vmatpush1.bf16.msra.mxu1 %v8195_v62  ;;  %v8249_v62 = vld [vmem:[%s10661_s5 + $0x3d0] ss:$8 sps:$4 sm:$0xff]  }
 0x457   :  { %5270 = vmatprep.subr.bf16.mxu1 %v8200_v61  ;;  %v8254_v61 = vld [vmem:[%s10661_s5 + $0x3e4] ss:$8 sps:$4 sm:$0xff]  }
 0x459   :  { %5109 = vmatmul.mubr.bf16.gmra.mrb[204].mxu1 %v4957_v44 }
 0x45a   :  { %5271 = vmatpush1.bf16.msra.mxu1 %v8198_v47  ;;  %5118 = vmatprep.mubr.bf16.mxu1 %v8291_v4  ;;  %v5366_v47 = vld [vmem:[#allocation3 + $0x198] ss:$2 sm:$0xff] }
 0x45b   :  { %5272 = vmatprep.subr.bf16.mxu1 %v8203_v30  ;;  %v5370_v44 = vpack.c.bf16 %v5366_v47, %v5364_v3  ;;  %v8257_v30 = vld [vmem:[%s10661_s5 + $0x3f4] ss:$8 sps:$4 sm:$0xff]   ;;  %v5971_v3 = vlaneseq }
 0x45d   :  { %v5972_v47 = vshrl.u32 %v5971_v3, 7 }
 0x45e   :  { %5273 = vmatpush1.bf16.msra.mxu1 %v8201_v11  ;;  %v8255_v11 = vld [vmem:[%s10661_s5 + $0x3f0] ss:$8 sps:$4 sm:$0xff]  }
 0x45f   :  { %5274 = vmatprep.subr.bf16.mxu1 %v8206_v56  ;;  %v8260_v56 = vld [vmem:[%s10661_s5 + $0x404] ss:$8 sps:$4 sm:$0xff]  }
 0x461   :  { %5119 = vmatmul.mubr.bf16.gmra.mrb[208].mxu1 %v4958_v60  ;;  %v5558_v60 = vld [vmem:[#allocation3 + $0x31] ss:$2 sm:$0xff] }
 0x462   :  { %5275 = vmatpush1.bf16.msra.mxu1 %v8204_v16  ;;  %5294 = vmatprep.mubr.bf16.mxu1 %v8291_v4 }
 0x463   :  { %5276 = vmatprep.subr.bf16.mxu1 %v8209_v5 }
 0x466   :  { %5277 = vmatpush1.bf16.msra.mxu1 %v8207_v46  ;;  %v5573_v46 = vpack.c.bf16 %v5560_v24, %v5558_v60 }
 0x467   :  { %5468 = vmatprep.subr.bf16.mxu1 %v8212_v26  ;;  %v8263_v26 = vld [vmem:[%s10661_s5 + $0x414] ss:$8 sps:$4 sm:$0xff]  }
 0x469   :  { %5295 = vmatmul.mubr.bf16.vlgmr.msra.gmra.mrb[196].mxu1 %v5161_v0  ;;  %v8266_v0 = vld [vmem:[%s10661_s5 + $0x424] ss:$8 sps:$4 sm:$0xff]  }
 0x46a   :  { %5469 = vmatpush1.bf16.msra.mxu1 %v8210_v18  ;;  %5304 = vmatprep.mubr.bf16.mxu1 %v8291_v4 }
 0x46b   :  { %5470 = vmatprep.subr.bf16.mxu1 %v8215_v42  ;;  %v5562_v42 = vld [vmem:[#allocation3 + $0x91] ss:$2 sm:$0xff] }
 0x46e   :  { %5471 = vmatpush1.bf16.msra.mxu1 %v8213_v41  ;;  %v5564_v41 = vld [vmem:[#allocation3 + $0xc1] ss:$2 sm:$0xff] }
 0x46f   :  { %5472 = vmatprep.subr.bf16.mxu1 %v8218_v63  ;;  %v8264_v63 = vld [vmem:[%s10661_s5 + $0x420] ss:$8 sps:$4 sm:$0xff]   ;;  %v5574_v28 = vpack.c.bf16 %v5564_v41, %v5562_v42 }
 0x471   :  { %5305 = vmatmul.mubr.bf16.gmra.mrb[200].mxu1 %v5162_v53  ;;  %v8272_v53 = vld [vmem:[%s10661_s5 + $0x444] ss:$8 sps:$4 sm:$0xff]  }
 0x472   :  { %5473 = vmatpush1.bf16.msra.mxu1 %v8216_v40  ;;  %5314 = vmatprep.mubr.bf16.mxu1 %v8291_v4  ;;  %v8269_v40 = vld [vmem:[%s10661_s5 + $0x434] ss:$8 sps:$4 sm:$0xff]  }
 0x473   :  { %5474 = vmatprep.subr.bf16.mxu1 %v8221_v25  ;;  %v5568_v25 = vld [vmem:[#allocation3 + $0x139] ss:$2 sm:$0xff] }
 0x474   :  { %v5575_v49 = vpack.c.bf16 %v5568_v25, %v5566_v6  ;;  %v10587_v25 = vld [vmem:[%s10665_s7 + $0x8] sm:$0xff]  ;;  %v10592_v6 = vld [vmem:[%s10665_s7 + $0x18] sm:$0xff] }
 0x476   :  { %5475 = vmatpush1.bf16.msra.mxu1 %v8219_v59 }
 0x477   :  { %5476 = vmatprep.subr.bf16.mxu1 %v8224_v38  ;;  %v8270_v38 = vld [vmem:[%s10661_s5 + $0x440] ss:$8 sps:$4 sm:$0xff]  }
 0x479   :  { %5315 = vmatmul.mubr.bf16.gmra.mrb[204].mxu1 %v5163_v15  ;;  %v8275_v15 = vld [vmem:[%s10661_s5 + $0x454] ss:$8 sps:$4 sm:$0xff]  }
 0x47a   :  { %5477 = vmatpush1.bf16.msra.mxu1 %v8222_v7  ;;  %5324 = vmatprep.mubr.bf16.mxu1 %v8291_v4 }
 0x47b   :  { %5478 = vmatprep.subr.bf16.mxu1 %v8227_v33 }
 0x47e   :  { %5479 = vmatpush1.bf16.msra.mxu1 %v8225_v12 }
 0x47f   :  { %5480 = vmatprep.subr.bf16.mxu1 %v8230_v50  ;;  %v8273_v50 = vld [vmem:[%s10661_s5 + $0x450] ss:$8 sps:$4 sm:$0xff]  }
 0x481   :  { %5325 = vmatmul.mubr.bf16.gmra.mrb[208].mxu1 %v5164_v14  ;;  %v8276_v14 = vld [vmem:[%s10661_s5 + $0x460] ss:$8 sps:$4 sm:$0xff]  }
 0x482   :  { %5481 = vmatpush1.bf16.msra.mxu1 %v8228_v19  ;;  %5500 = vmatprep.mubr.bf16.mxu1 %v8291_v4  ;;  %v5570_v19 = vld [vmem:[#allocation3 + $0x169] ss:$2 sm:$0xff] }
 0x483   :  { %5482 = vmatprep.subr.bf16.mxu1 %v8233_v22  ;;  %v5576_v22 = vpack.c.bf16 %v5572_v10, %v5570_v19 }
 0x486   :  { %5483 = vmatpush1.bf16.msra.mxu1 %v8231_v27  ;;  %v8281_v27 = vld [vmem:[%s10661_s5 + $0x474] ss:$8 sps:$4 sm:$0xff]  }
 0x487   :  { %5674 = vmatprep.subr.bf16.mxu1 %v8236_v35  ;;  %v8279_v35 = vld [vmem:[%s10661_s5 + $0x470] ss:$8 sps:$4 sm:$0xff]  }
 0x489   :  { %5501 = vmatmul.mubr.bf16.vlgmr.msra.gmra.mrb[196].mxu1 %v5367_v52 }
 0x48a   :  { %5675 = vmatpush1.bf16.msra.mxu1 %v8234_v43  ;;  %5510 = vmatprep.mubr.bf16.mxu1 %v8291_v4  ;;  %v5766_v43 = vld [vmem:[#allocation3 + $0x62] ss:$2 sm:$0xff] }
 0x48b   :  { %5676 = vmatprep.subr.bf16.mxu1 %v8239_v48  ;;  %v5764_v48 = vld [vmem:[#allocation3 + $0x32] ss:$2 sm:$0xff] }
 0x48e   :  { %5677 = vmatpush1.bf16.msra.mxu1 %v8237_v9 }
 0x48f   :  { %5678 = vmatprep.subr.bf16.mxu1 %v8242_v37  ;;  %v5779_v37 = vpack.c.bf16 %v5766_v43, %v5764_v48 }
 0x491   :  { %5511 = vmatmul.mubr.bf16.gmra.mrb[200].mxu1 %v5368_v39 }
 0x492   :  { %5679 = vmatpush1.bf16.msra.mxu1 %v8240_v57  ;;  %5520 = vmatprep.mubr.bf16.mxu1 %v8291_v4  ;;  %v5780_v57 = vpack.c.bf16 %v5770_v29, %v5768_v20 }
 0x493   :  { %5680 = vmatprep.subr.bf16.mxu1 %v8245_v36  ;;  %v5774_v36 = vld [vmem:[#allocation3 + $0x13a] ss:$2 sm:$0xff] }
 0x494   :  { %v5781_v1 = vpack.c.bf16 %v5774_v36, %v5772_v31 }
 0x496   :  { %5681 = vmatpush1.bf16.msra.mxu1 %v8243_v55 }
 0x497   :  { %5682 = vmatprep.subr.bf16.mxu1 %v8248_v17 }
 0x499   :  { %5521 = vmatmul.mubr.bf16.gmra.mrb[204].mxu1 %v5369_v21  ;;  %v5776_v21 = vld [vmem:[#allocation3 + $0x16a] ss:$2 sm:$0xff] }
 0x49a   :  { %5683 = vmatpush1.bf16.msra.mxu1 %v8246_v45  ;;  %5530 = vmatprep.mubr.bf16.mxu1 %v8291_v4 }
 0x49b   :  { %5684 = vmatprep.subr.bf16.mxu1 %v8251_v51  ;;  %v5778_v51 = vld [vmem:[#allocation3 + $0x19a] ss:$2 sm:$0xff] }
 0x49e   :  { %5685 = vmatpush1.bf16.msra.mxu1 %v8249_v62  ;;  %v5782_v62 = vpack.c.bf16 %v5778_v51, %v5776_v21 }
 0x49f   :  { %5686 = vmatprep.subr.bf16.mxu1 %v8254_v61  ;;  %v14_v61 = vstv %s10663_s8 }
 0x4a0   :  { %15 = vst [vmem:[#allocation4] sm:$0x1] %v14_v61  ;;  %v10619_v61 = vld [vmem:[%s10665_s7 + $0x30] sm:$0xff] }
 0x4a1   :  { %5531 = vmatmul.mubr.bf16.gmra.mrb[208].mxu1 %v5370_v44  ;;  %v5969_v44 = vld [vmem:[%s10664_s6] sm:$0x3] }
 0x4a2   :  { %5687 = vmatpush1.bf16.msra.mxu1 %v8252_v34  ;;  %5706 = vmatprep.mubr.bf16.mxu1 %v8291_v4  ;;  %v5973_v34 = vsub.s32 0, %v5972_v47 }
 0x4a3   :  { %5688 = vmatprep.subr.bf16.mxu1 %v8257_v30  ;;  %v5977_v30 = vsub.s32 1, %v5972_v47 }
 0x4a6   :  { %5689 = vmatpush1.bf16.msra.mxu1 %v8255_v11  ;;  %v10472_v16 = vpop.f32.mrb[60].mxu0  ;;  %v10562_v11 = vrot.slane %v5969_v44, %v5973_v34 }
 0x4a7   :  { %v10477_v5 = vpop.f32.mrb[61].mxu0  ;;  %5880 = vmatprep.subr.bf16.mxu1 %v8260_v56  ;;  %v10564_v56 = vrot.slane %v5969_v44, %v5977_v30  ;;  %v10625_v44 = vld [vmem:[%s10665_s7 + $0x38] sm:$0xff] }
 0x4a8   :  { %v10482_v58 = vpop.f32.mrb[62].mxu0 }
 0x4a9   :  { %v10484_v18 = vpop.f32.mrb[63].mxu0  ;;  %5707 = vmatmul.mubr.bf16.vlgmr.msra.gmra.mrb[196].mxu1 %v5573_v46 }
 0x4aa   :  { %5881 = vmatpush1.bf16.msra.mxu1 %v8258_v23  ;;  %5716 = vmatprep.mubr.bf16.mxu1 %v8291_v4 }
 0x4ab   :  { %5882 = vmatprep.subr.bf16.mxu1 %v8263_v26 }
 0x4ae   :  { %5883 = vmatpush1.bf16.msra.mxu1 %v8261_v2 }
 0x4af   :  { %5884 = vmatprep.subr.bf16.mxu1 %v8266_v0 }
 0x4b1   :  { %5717 = vmatmul.mubr.bf16.gmra.mrb[200].mxu1 %v5574_v28 }
 0x4b2   :  { %5885 = vmatpush1.bf16.msra.mxu1 %v8264_v63  ;;  %5726 = vmatprep.mubr.bf16.mxu1 %v8291_v4 }
 0x4b3   :  { %5886 = vmatprep.subr.bf16.mxu1 %v8269_v40 }
 0x4b6   :  { %5887 = vmatpush1.bf16.msra.mxu1 %v8267_v54  ;;  %v10506_v59 = vpop.f32.mrb[64].mxu0 }
 0x4b7   :  { %v10511_v7 = vpop.f32.mrb[65].mxu0  ;;  %5888 = vmatprep.subr.bf16.mxu1 %v8272_v53 }
 0x4b8   :  { %v10516_v33 = vpop.f32.mrb[66].mxu0 }
 0x4b9   :  { %v10518_v12 = vpop.f32.mrb[67].mxu0  ;;  %5727 = vmatmul.mubr.bf16.gmra.mrb[204].mxu1 %v5575_v49 }
 0x4ba   :  { %5889 = vmatpush1.bf16.msra.mxu1 %v8270_v38  ;;  %5736 = vmatprep.mubr.bf16.mxu1 %v8291_v4 }
 0x4bb   :  { %5890 = vmatprep.subr.bf16.mxu1 %v8275_v15 }
 0x4be   :  { %5891 = vmatpush1.bf16.msra.mxu1 %v8273_v50 }
 0x4bf   :  { %5892 = vmatprep.subr.bf16.mxu1 %v8278_v32 }
 0x4c1   :  { %5737 = vmatmul.mubr.bf16.gmra.mrb[208].mxu1 %v5576_v22 }
 0x4c2   :  { %5893 = vmatpush1.bf16.msra.mxu1 %v8276_v14  ;;  %5912 = vmatprep.mubr.bf16.mxu1 %v8291_v4 }
 0x4c3   :  { %5894 = vmatprep.subr.bf16.mxu1 %v8281_v27 }
 0x4c4   :  { %v10537_v13 = vpop.f32.mrb[68].mxu0 }
 0x4c5   :  { %v10539_v8 = vpop.f32.mrb[69].mxu0 }
 0x4c6   :  { %5895 = vmatpush1.bf16.msra.mxu1 %v8279_v35  ;;  %v10541_v52 = vpop.f32.mrb[70].mxu0 }
 0x4c7   :  { %v10543_v9 = vpop.f32.mrb[71].mxu0 }
 0x4c9   :  { %5913 = vmatmul.mubr.bf16.vlgmr.msra.gmra.mrb[196].mxu1 %v5779_v37 }
 0x4ca   :  { %5922 = vmatprep.mubr.bf16.mxu1 %v8291_v4 }
 0x4d1   :  { %5923 = vmatmul.mubr.bf16.gmra.mrb[200].mxu1 %v5780_v57 }
 0x4d2   :  { %5932 = vmatprep.mubr.bf16.mxu1 %v8291_v4 }
 0x4d4   :  { %v10547_v39 = vpop.f32.mrb[72].mxu0 }
 0x4d5   :  { %v10549_v55 = vpop.f32.mrb[73].mxu0 }
 0x4d6   :  { %v10551_v17 = vpop.f32.mrb[74].mxu0 }
 0x4d7   :  { %v10553_v45 = vpop.f32.mrb[75].mxu0 }
 0x4d9   :  { %5933 = vmatmul.mubr.bf16.gmra.mrb[204].mxu1 %v5781_v1 }
 0x4da   :  { %5942 = vmatprep.mubr.bf16.mxu1 %v8291_v4 }
 0x4e1   :  { %5943 = vmatmul.mubr.bf16.gmra.mrb[208].mxu1 %v5782_v62 }
 0x59c   :  { %v5914_v4 = vpop.f32.mrb[196].mxu1 }
 0x59d   :  { %v7838_v24 = vadd.f32 %v5914_v4, %v10472_v16  ;;  %v5916_v23 = vpop.f32.mrb[197].mxu1 }
 0x59e   :  { %v7839_v60 = vadd.f32 %v5916_v23, %v10477_v5  ;;  %v5918_v46 = vpop.f32.mrb[198].mxu1  ;;  %v10577_v5 = vld [vmem:[%s10665_s7] sm:$0xff] }
 0x59f   :  { %v5981_v26 = vadd.f32 %v7838_v24, %v10562_v11  ;;  %v7840_v2 = vadd.f32 %v5918_v46, %v10482_v58  ;;  %v5920_v0 = vpop.f32.mrb[199].mxu1 }
 0x5a0   :  { %v5982_v42 = vadd.f32 %v7839_v60, %v10564_v56  ;;  %v7841_v41 = vadd.f32 %v5920_v0, %v10484_v18  ;;  %v10582_v18 = vld [vmem:[%s10665_s7 + $0x10] sm:$0xff] }
 0x5a1   :  { %vm5997_vm12 = vcmp.ge.f32.partialorder %v5981_v26, 0.0  ;;  %v6013_v63 = vmul.f32 0.01, %v5981_v26  ;;  %v5983_v28 = vadd.f32 %v7840_v2, %v10562_v11 }
 0x5a2   :  { %vm5998_vm13 = vcmp.ge.f32.partialorder %v5982_v42, 0.0  ;;  %v6014_v40 = vmul.f32 0.01, %v5982_v42  ;;  %v5984_v16 = vadd.f32 %v7841_v41, %v10564_v56 }
 0x5a3   :  { %v6029_v54 = vsel %vm5997_vm12, %v5981_v26, %v6013_v63  ;;  %vm5999_vm1 = vcmp.ge.f32.partialorder %v5983_v28, 0.0  ;;  %v6015_v58 = vmul.f32 0.01, %v5983_v28  ;;  %vm6109_vm12 = vcmask 1041409  }
 0x5a4   :  { %v6030_v53 = vsel %vm5998_vm13, %v5982_v42, %v6014_v40  ;;  %vm6000_vm3 = vcmp.ge.f32.partialorder %v5984_v16, 0.0  ;;  %v6016_v38 = vmul.f32 0.01, %v5984_v16  ;;  %v5924_v49 = vpop.f32.mrb[200].mxu1  ;;  %v6053_v19 = vmul.f32 %v10577_v5, %v6029_v54 }
 0x5a5   :  { %v6031_v15 = vsel %vm5999_vm1, %v5983_v28, %v6015_v58  ;;  %v7842_v50 = vadd.f32 %v5924_v49, %v10506_v59  ;;  %v5926_v32 = vpop.f32.mrb[201].mxu1  ;;  %v6054_v35 = vmul.f32 %v10587_v25, %v6030_v53  ;;  %vm6114_vm13 = vcmask 1041408  }
 0x5a6   :  { %v6055_v10 = vmul.f32 %v10582_v18, %v6031_v15  ;;  %v6032_v14 = vsel %vm6000_vm3, %v5984_v16, %v6016_v38  ;;  %v7843_v22 = vadd.f32 %v5926_v32, %v10511_v7  ;;  %v5928_v27 = vpop.f32.mrb[202].mxu1  ;;  %v10607_v7 = vld [vmem:[%s10665_s7 + $0x20] sm:$0xff]  ;;  %vm6134_vm1 = vcmask 1024  }
 0x5a7   :  { %v6056_v43 = vmul.f32 %v10592_v6, %v6032_v14  ;;  %v5985_v48 = vadd.f32 %v7842_v50, %v10562_v11  ;;  %v7844_v37 = vadd.f32 %v5928_v27, %v10516_v33  ;;  %v5930_v20 = vpop.f32.mrb[203].mxu1  ;;  %v10613_v33 = vld [vmem:[%s10665_s7 + $0x28] sm:$0xff] }
 0x5a8   :  { %v6069_v29 = vadd.f32 %v6055_v10, %v6053_v19  ;;  %v5986_v59 = vadd.f32 %v7843_v22, %v10564_v56  ;;  %v7845_v57 = vadd.f32 %v5930_v20, %v10518_v12 }
 0x5a9   :  { %v6078_v36 = vadd.f32 %v6056_v43, %v6054_v35  ;;  %vm6001_vm5 = vcmp.ge.f32.partialorder %v5985_v48, 0.0  ;;  %v6017_v31 = vmul.f32 0.01, %v5985_v48  ;;  %v5987_v1 = vadd.f32 %v7844_v37, %v10562_v11 }
 0x5aa   :  { %vm6002_vm7 = vcmp.ge.f32.partialorder %v5986_v59, 0.0  ;;  %v6018_v21 = vmul.f32 0.01, %v5986_v59  ;;  %v5988_v51 = vadd.f32 %v7845_v57, %v10564_v56 }
 0x5ab   :  { %v6033_v12 = vsel %vm6001_vm5, %v5985_v48, %v6017_v31  ;;  %vm6003_vm14 = vcmp.ge.f32.partialorder %v5987_v1, 0.0  ;;  %v6019_v62 = vmul.f32 0.01, %v5987_v1 }
 0x5ac   :  { %v6057_v3 = vmul.f32 %v10607_v7, %v6033_v12  ;;  %v6034_v47 = vsel %vm6002_vm7, %v5986_v59, %v6018_v21  ;;  %vm6004_vm15 = vcmp.ge.f32.partialorder %v5988_v51, 0.0  ;;  %v6020_v34 = vmul.f32 0.01, %v5988_v51  ;;  %v5934_v30 = vpop.f32.mrb[204].mxu1 }
 0x5ad   :  { %v6058_v4 = vmul.f32 %v10613_v33, %v6034_v47  ;;  %v6035_v24 = vsel %vm6003_vm14, %v5987_v1, %v6019_v62  ;;  %v7846_v23 = vadd.f32 %v5934_v30, %v10537_v13  ;;  %v5936_v60 = vpop.f32.mrb[205].mxu1 }
 0x5ae   :  { %v6070_v46 = vadd.f32 %v6069_v29, %v6057_v3  ;;  %v6059_v26 = vmul.f32 %v10619_v61, %v6035_v24  ;;  %v6036_v2 = vsel %vm6004_vm15, %v5988_v51, %v6020_v34  ;;  %v7847_v0 = vadd.f32 %v5936_v60, %v10539_v8  ;;  %v5938_v42 = vpop.f32.mrb[206].mxu1 }
 0x5af   :  { %v6079_v41 = vadd.f32 %v6078_v36, %v6058_v4  ;;  %v6060_v63 = vmul.f32 %v10625_v44, %v6036_v2  ;;  %v5989_v28 = vadd.f32 %v7846_v23, %v10562_v11  ;;  %v7848_v40 = vadd.f32 %v5938_v42, %v10541_v52  ;;  %v5940_v16 = vpop.f32.mrb[207].mxu1 }
 0x5b0   :  { %v6071_v54 = vadd.f32 %v6070_v46, %v6059_v26  ;;  %v5990_v58 = vadd.f32 %v7847_v0, %v10564_v56  ;;  %v7849_v13 = vadd.f32 %v5940_v16, %v10543_v9 }
 0x5b1   :  { %v6080_v53 = vadd.f32 %v6079_v41, %v6060_v63  ;;  %vm6005_vm0 = vcmp.ge.f32.partialorder %v5989_v28, 0.0  ;;  %v6021_v38 = vmul.f32 0.01, %v5989_v28  ;;  %v5991_v49 = vadd.f32 %v7848_v40, %v10562_v11 }
 0x5b2   :  { %vm6006_vm2 = vcmp.ge.f32.partialorder %v5990_v58, 0.0  ;;  %v6022_v8 = vmul.f32 0.01, %v5990_v58  ;;  %v5992_v15 = vadd.f32 %v7849_v13, %v10564_v56  ;;  %v6072_v14 = vrot.slane %v6071_v54, 4 }
 0x5b3   :  { %v6037_v50 = vsel %vm6005_vm0, %v5989_v28, %v6021_v38  ;;  %vm6007_vm4 = vcmp.ge.f32.partialorder %v5991_v49, 0.0  ;;  %v6023_v32 = vmul.f32 0.01, %v5991_v49  ;;  %v6081_v1 = vrot.slane %v6080_v53, 4 }
 0x5b4   :  { %v6038_v19 = vsel %vm6006_vm2, %v5990_v58, %v6022_v8  ;;  %vm6008_vm6 = vcmp.ge.f32.partialorder %v5992_v15, 0.0  ;;  %v6024_v52 = vmul.f32 0.01, %v5992_v15  ;;  %v5944_v10 = vpop.f32.mrb[208].mxu1  ;;  %v6061_v35 = vmul.f32 %v10577_v5, %v6037_v50 }
 0x5b5   :  { %v6039_v22 = vsel %vm6007_vm4, %v5991_v49, %v6023_v32  ;;  %v7850_v9 = vadd.f32 %v5944_v10, %v10547_v39  ;;  %v5946_v27 = vpop.f32.mrb[209].mxu1  ;;  %v6062_v29 = vmul.f32 %v10587_v25, %v6038_v19  ;;  %v6082_v4 = vadd.f32 %v6081_v1, %v6080_v53 }
 0x5b6   :  { %v6063_v43 = vmul.f32 %v10582_v18, %v6039_v22  ;;  %v6040_v48 = vsel %vm6008_vm6, %v5992_v15, %v6024_v52  ;;  %v7851_v37 = vadd.f32 %v5946_v27, %v10549_v55  ;;  %v5948_v20 = vpop.f32.mrb[210].mxu1 }
 0x5b7   :  { %v6064_v59 = vmul.f32 %v10592_v6, %v6040_v48  ;;  %v5993_v57 = vadd.f32 %v7850_v9, %v10562_v11  ;;  %v7852_v36 = vadd.f32 %v5948_v20, %v10551_v17  ;;  %v5950_v31 = vpop.f32.mrb[211].mxu1  ;;  %v6073_v17 = vadd.f32 %v6072_v14, %v6071_v54  ;;  %v6986_v14 = vld [vmem:[#allocation4] ss:$0 sm:$0xff] }
 0x5b8   :  { %v6087_v39 = vadd.f32 %v6063_v43, %v6061_v35  ;;  %v5994_v21 = vadd.f32 %v7851_v37, %v10564_v56  ;;  %v7853_v5 = vadd.f32 %v5950_v31, %v10553_v45  ;;  %v6083_v0 = vrot.slane %v6082_v4, 2 }
 0x5b9   :  { %v6096_v18 = vadd.f32 %v6064_v59, %v6062_v29  ;;  %vm6009_vm8 = vcmp.ge.f32.partialorder %v5993_v57, 0.0  ;;  %v6025_v51 = vmul.f32 0.01, %v5993_v57  ;;  %v5995_v55 = vadd.f32 %v7852_v36, %v10562_v11 }
 0x5ba   :  { %vm6010_vm9 = vcmp.ge.f32.partialorder %v5994_v21, 0.0  ;;  %v6026_v25 = vmul.f32 0.01, %v5994_v21  ;;  %v5996_v6 = vadd.f32 %v7853_v5, %v10564_v56  ;;  %v6074_v26 = vrot.slane %v6073_v17, 2 }
 0x5bb   :  { %v6041_v12 = vsel %vm6009_vm8, %v5993_v57, %v6025_v51  ;;  %vm6011_vm10 = vcmp.ge.f32.partialorder %v5995_v55, 0.0  ;;  %v6027_v62 = vmul.f32 0.01, %v5995_v55  ;;  %v6084_v28 = vadd.f32 %v6083_v0, %v6082_v4 }
 0x5bc   :  { %v6065_v3 = vmul.f32 %v10607_v7, %v6041_v12  ;;  %v6042_v47 = vsel %vm6010_vm9, %v5994_v21, %v6026_v25  ;;  %vm6012_vm11 = vcmp.ge.f32.partialorder %v5996_v6, 0.0  ;;  %v6028_v34 = vmul.f32 0.01, %v5996_v6 }
 0x5bd   :  { %v6066_v45 = vmul.f32 %v10613_v33, %v6042_v47  ;;  %v6043_v30 = vsel %vm6011_vm10, %v5995_v55, %v6027_v62  ;;  %v6075_v41 = vadd.f32 %v6074_v26, %v6073_v17  ;;  %v6085_v13 = vrot.slane %v6084_v28, 1 }
 0x5be   :  { %v6088_v24 = vadd.f32 %v6087_v39, %v6065_v3  ;;  %v6067_v11 = vmul.f32 %v10619_v61, %v6043_v30  ;;  %v6044_v23 = vsel %vm6012_vm11, %v5996_v6, %v6028_v34 }
 0x5bf   :  { %v6097_v60 = vadd.f32 %v6096_v18, %v6066_v45  ;;  %v6068_v56 = vmul.f32 %v10625_v44, %v6044_v23  ;;  %v6076_v54 = vrot.slane %v6075_v41, 1  ;;  %v6086_v8 = vadd.f32 %v6085_v13, %v6084_v28 }
 0x5c0   :  { %v6089_v46 = vadd.f32 %v6088_v24, %v6067_v11 }
 0x5c1   :  { %v6098_v2 = vadd.f32 %v6097_v60, %v6068_v56  ;;  %v6077_v44 = vadd.f32 %v6076_v54, %v6075_v41 }
 0x5c2   :  { %v6090_v42 = vrot.slane %v6089_v46, 4 }
 0x5c3   :  { %v6099_v7 = vrot.slane %v6098_v2, 4 }
 0x5c4   :  { %v6091_v63 = vadd.f32 %v6090_v42, %v6089_v46 }
 0x5c5   :  { %v6100_v40 = vadd.f32 %v6099_v7, %v6098_v2 }
 0x5c6   :  { %v6092_v33 = vrot.slane %v6091_v63, 2 }
 0x5c7   :  { %v6101_v16 = vrot.slane %v6100_v40, 2 }
 0x5c8   :  { %v6093_v58 = vadd.f32 %v6092_v33, %v6091_v63 }
 0x5c9   :  { %v6102_v61 = vadd.f32 %v6101_v16, %v6100_v40 }
 0x5ca   :  { %v6094_v53 = vrot.slane %v6093_v58, 1 }
 0x5cb   :  { %v6103_v38 = vrot.slane %v6102_v61, 1 }
 0x5cc   :  { %v6095_v49 = vadd.f32 %v6094_v53, %v6093_v58 }
 0x5cd   :  { %v6104_v15 = vadd.f32 %v6103_v38, %v6102_v61 }
 0x5ce   :  { %v6110_v50 = vsel %vm6109_vm12, %v6095_v49, %v6077_v44 }
 0x5cf   :  { %v6111_v32 = vsel %vm6109_vm12, %v6104_v15, %v6086_v8  ;;  %v6115_v19 = vsel %vm6114_vm13, %v6110_v50, 0.0 }
 0x5d0   :  { %v6116_v52 = vsel %vm6114_vm13, %v6111_v32, 0.0 }
 0x5d1   :  { %v6117_v10 = vadd.f32 %v6116_v52, %v6115_v19 }
 0x5d3   :  { %6118 = vadd.xlane.f32.xlu0 %v6117_v10 }
 0x660   :  { %v6119_v22 = vpop.xlane.xlu0 %6118 }
 0x661   :  { %v6127_v9 = vadd.f32 %v6986_v14, %v6119_v22 }
 0x663   :  { %v6128_v27 = vsub.f32 0.0, %v6127_v9 }
 0x665   :  { %v6129_v35 = vmul.f32 1.442695, %v6128_v27 }
 0x667   :  { %8282 = vpow2.f32 %v6129_v35 }
 0x671   :  { %v8283_v43 = vpop.eup %8282 }
 0x672   :  { %v6131_v48 = vadd.f32 1.0, %v8283_v43 }
 0x674   :  { %8284 = vrcp.f32 %v6131_v48 }
 0x67e   :  { %v8285_v37 = vpop.eup %8284 }
 0x67f   :  { %6135 = vst.msk [vmem:[%s10666_s9] sm:$0x3] %vm6134_vm1, %v8285_v37 }

</bundles_post_ra>
